<compile_context>
chip_gen: v5e
topology: v5e:2x2
jax: 0.10.0
libtpu: 0.0.40
codegen_flags: <defaults>
</compile_context>

<pallas_src>
import functools

import jax
import jax.numpy as jnp
from jax.experimental import pallas as pl
from jax.experimental.pallas import tpu as pltpu


def _round_up(x, m):
    return (x + m - 1) // m * m


# ------------------------------ Pallas kernel -------------------------------

def _resblock_kernel(xp_ref, w1_ref, b1_ref, w2_ref, b2_ref, res_ref,
                     out_ref, win_ref, sem_ref, *, TH, H, W, W1, n_h, Cp):
    """One (image n, H-tile i) step of the fused residual block.

    xp_ref : (N, H+4, Wp, Cp) bf16 HBM ref (zero-padded by 2 rows/cols) -- halo
             windows are DMA'd manually because consecutive tiles overlap.
    w*_ref : (9*Cp, Cp) bf16, BN scale already folded in.   b*_ref: (1, Cp) f32.
    res_ref/out_ref : (TH*W, Cp) f32 blocks (lane-dense, auto-pipelined).
    win_ref: (2, TH+4, Wp, Cp) bf16 VMEM double buffer, sem_ref: DMA((2,)).
    """
    n = pl.program_id(0)
    i = pl.program_id(1)
    slot = i & 1
    Hh = TH + 2  # conv1 output rows needed (output rows + 1-row halo for conv2)

    def window_copy(row_tile, dst_slot):
        return pltpu.make_async_copy(
            xp_ref.at[n, pl.ds(row_tile * TH, TH + 4)],
            win_ref.at[dst_slot],
            sem_ref.at[dst_slot])

    # Prime the first window of this image, wait for the current one, and
    # prefetch the next one (hidden behind this tile's compute).
    @pl.when(i == 0)
    def _prime():
        window_copy(0, 0).start()

    window_copy(i, slot).wait()

    @pl.when(i + 1 < n_h)
    def _prefetch():
        window_copy(i + 1, 1 - slot).start()

    # ---- conv1 (+ folded BN1 + ReLU), computed on the halo window ----------
    # im2col built in VMEM: 9 shifted views concatenated along the lane axis.
    cols1 = [win_ref[slot, kh:kh + Hh, kw:kw + W1, :]
             for kh in range(3) for kw in range(3)]
    patches1 = jnp.concatenate(cols1, axis=-1).reshape(Hh * W1, 9 * Cp)
    h1 = jnp.dot(patches1, w1_ref[...], preferred_element_type=jnp.float32)
    h1 = jnp.maximum(h1 + b1_ref[...], 0.0).reshape(Hh, W1, Cp)

    # Zero the halo ring so conv2 sees exactly PyTorch's zero padding
    # (positions outside the real conv1 output must be 0, not extrapolated).
    row_ids = jax.lax.broadcasted_iota(jnp.int32, (Hh, W1, 1), 0) + (i * TH - 1)
    col_ids = jax.lax.broadcasted_iota(jnp.int32, (Hh, W1, 1), 1)
    valid = (row_ids >= 0) & (row_ids < H) & (col_ids >= 1) & (col_ids <= W)
    h1 = jnp.where(valid, h1, 0.0).astype(jnp.bfloat16)

    # ---- conv2 (+ folded BN2) + residual add -------------------------------
    cols2 = [h1[kh:kh + TH, kw:kw + W, :] for kh in range(3) for kw in range(3)]
    patches2 = jnp.concatenate(cols2, axis=-1).reshape(TH * W, 9 * Cp)
    y = jnp.dot(patches2, w2_ref[...], preferred_element_type=jnp.float32)
    out_ref[...] = y + b2_ref[...] + res_ref[...]


# ------------------------------ host-side glue ------------------------------

def _fold_conv_bn(w_oihw, gamma, beta, mean, var, cp, eps=1e-5):
    """Fold eval-mode BN into the conv weight matrix (bf16) + f32 bias."""
    cout, cin = w_oihw.shape[0], w_oihw.shape[1]
    scale = gamma / jnp.sqrt(var + eps)
    bias = beta - mean * scale
    w_hwio = jnp.transpose(w_oihw, (2, 3, 1, 0)) * scale[None, None, None, :]
    w_pad = jnp.zeros((3, 3, cp, cp), jnp.float32).at[:, :, :cin, :cout].set(w_hwio)
    w_mat = w_pad.reshape(9 * cp, cp).astype(jnp.bfloat16)   # rows: (kh,kw,cin)
    b_pad = jnp.zeros((1, cp), jnp.float32).at[0, :cout].set(bias)
    return w_mat, b_pad


def _pick_tile_h(H, W, W1, Wp, Cp, vmem_budget=8 * 1024 * 1024):
    """Largest H-tile whose working set fits the VMEM budget, capped so there
    are >= 2 H tiles when possible (enables halo prefetch + more grid steps)."""
    cap = max(1, H // 2) if H > 8 else H
    best = 1
    for th in range(1, H + 1):
        if H % th or th > cap:
            continue
        hh = th + 2
        need = (2 * (th + 4) * Wp * Cp * 2        # double-buffered bf16 halo window
                + hh * W1 * 9 * Cp * 2            # conv1 im2col patches (bf16)
                + hh * W1 * Cp * 4                # conv1 output (f32)
                + th * W * 9 * Cp * 2             # conv2 im2col patches (bf16)
                + 2 * 2 * th * W * Cp * 4)        # residual-in + out blocks (dbl buffered)
        if need <= vmem_budget:
            best = th
    return best


def residual_block_forward(x_nchw, params):
    """PyTorch-convention NCHW in/out; NHWC (channel-padded to 128) inside."""
    N, C, H, W = x_nchw.shape
    assert W % 8 == 0, "W must be a multiple of 8 (sublane alignment)"
    Cp = _round_up(C, 128)          # lane-dense channels (pad, slice at the end)
    W1 = _round_up(W + 2, 8)        # conv1 computed width (8-aligned)
    Wp = _round_up(W1 + 2, 8)       # padded-input width held in HBM / VMEM
    TH = _pick_tile_h(H, W, W1, Wp, Cp)
    n_h = H // TH

    x_nhwc = jnp.transpose(x_nchw, (0, 2, 3, 1))

    # bf16, zero-padded (2 rows/cols of spatial halo + channel pad) conv input.
    xp = jnp.zeros((N, H + 4, Wp, Cp), jnp.bfloat16)
    xp = xp.at[:, 2:2 + H, 2:2 + W, :C].set(x_nhwc.astype(jnp.bfloat16))

    # f32 residual, flattened to lane-dense (N, H*W, Cp) blocks.
    res = jnp.pad(x_nhwc, ((0, 0), (0, 0), (0, 0), (0, Cp - C))).reshape(N, H * W, Cp)

    w1_mat, bias1 = _fold_conv_bn(params["w1"], params["gamma1"], params["beta1"],
                                  params["mean1"], params["var1"], Cp)
    w2_mat, bias2 = _fold_conv_bn(params["w2"], params["gamma2"], params["beta2"],
                                  params["mean2"], params["var2"], Cp)

    kernel = functools.partial(_resblock_kernel, TH=TH, H=H, W=W, W1=W1,
                               n_h=n_h, Cp=Cp)
    out = pl.pallas_call(
        kernel,
        out_shape=jax.ShapeDtypeStruct((N, H * W, Cp), jnp.float32),
        grid_spec=pltpu.PrefetchScalarGridSpec(
            num_scalar_prefetch=0,
            grid=(N, n_h),
            in_specs=[
                pl.BlockSpec(memory_space=pl.ANY),                         # xp (manual halo DMA)
                pl.BlockSpec((9 * Cp, Cp), lambda n, i: (0, 0)),           # w1 (BN1 folded)
                pl.BlockSpec((1, Cp), lambda n, i: (0, 0)),                # bias1
                pl.BlockSpec((9 * Cp, Cp), lambda n, i: (0, 0)),           # w2 (BN2 folded)
                pl.BlockSpec((1, Cp), lambda n, i: (0, 0)),                # bias2
                pl.BlockSpec((None, TH * W, Cp), lambda n, i: (n, i, 0)),  # residual
            ],
            out_specs=pl.BlockSpec((None, TH * W, Cp), lambda n, i: (n, i, 0)),
            scratch_shapes=[
                pltpu.VMEM((2, TH + 4, Wp, Cp), jnp.bfloat16),   # halo window dbl buffer
                pltpu.SemaphoreType.DMA((2,)),
            ]),
        compiler_params=pltpu.CompilerParams(
            dimension_semantics=("parallel", "arbitrary")),
    )(xp, w1_mat, bias1, w2_mat, bias2, res)

    y = out.reshape(N, H, W, Cp)[..., :C]
    return jnp.transpose(y, (0, 3, 1, 2))


# ----------------------------- pure-JAX reference ---------------------------

def residual_block_reference(x_nchw, params):
    def conv(x, w):
        return jax.lax.conv_general_dilated(
            x, w, window_strides=(1, 1), padding=((1, 1), (1, 1)),
            dimension_numbers=("NCHW", "OIHW", "NCHW"),
            precision=jax.lax.Precision.HIGHEST)

    def bn(x, gamma, beta, mean, var, eps=1e-5):
        scale = gamma / jnp.sqrt(var + eps)
        bias = beta - mean * scale
        return x * scale[None, :, None, None] + bias[None, :, None, None]

    h = jax.nn.relu(bn(conv(x_nchw, params["w1"]), params["gamma1"],
                       params["beta1"], params["mean1"], params["var1"]))
    y = bn(conv(h, params["w2"]), params["gamma2"], params["beta2"],
           params["mean2"], params["var2"])
    return y + x_nchw


# ---------------------------------- driver ----------------------------------

if __name__ == "__main__":
    key = jax.random.PRNGKey(0)
    ks = jax.random.split(key, 11)
    B, C, H, W = 2, 32, 16, 16

    params = {
        "w1": jax.random.normal(ks[0], (C, C, 3, 3), jnp.float32) / jnp.sqrt(9.0 * C),
        "gamma1": 1.0 + 0.1 * jax.random.normal(ks[1], (C,), jnp.float32),
        "beta1": 0.1 * jax.random.normal(ks[2], (C,), jnp.float32),
        "mean1": 0.1 * jax.random.normal(ks[3], (C,), jnp.float32),
        "var1": 0.9 + 0.2 * jax.random.uniform(ks[4], (C,), jnp.float32),
        "w2": jax.random.normal(ks[5], (C, C, 3, 3), jnp.float32) / jnp.sqrt(9.0 * C),
        "gamma2": 1.0 + 0.1 * jax.random.normal(ks[6], (C,), jnp.float32),
        "beta2": 0.1 * jax.random.normal(ks[7], (C,), jnp.float32),
        "mean2": 0.1 * jax.random.normal(ks[8], (C,), jnp.float32),
        "var2": 0.9 + 0.2 * jax.random.uniform(ks[9], (C,), jnp.float32),
    }
    x = jax.random.normal(ks[10], (B, C, H, W), jnp.float32)

    fwd = jax.jit(residual_block_forward)
    y = fwd(x, params)
    jax.block_until_ready(y)

    y_ref = residual_block_reference(x, params)
    assert y.shape == (B, C, H, W), y.shape
    assert bool(jnp.all(jnp.isfinite(y)))
    max_err = float(jnp.max(jnp.abs(y - y_ref)))
    assert max_err < 0.1, f"max abs error vs reference: {max_err}"
    print("KERNEL_OK")
</pallas_src>

<mosaic_0001>
module attributes {stable_mosaic.version = 11 : i64} {
  func.func @_resblock_kernel(%arg0: i32, %arg1: i32, %arg2: memref<2x20x32x128xbf16, #tpu.memory_space<any>>, %arg3: memref<1152x128xbf16, #tpu.memory_space<vmem>>, %arg4: memref<1x128xf32, #tpu.memory_space<vmem>>, %arg5: memref<1152x128xbf16, #tpu.memory_space<vmem>>, %arg6: memref<1x128xf32, #tpu.memory_space<vmem>>, %arg7: memref<1x128x128xf32, #tpu.memory_space<vmem>>, %arg8: memref<1x128x128xf32, #tpu.memory_space<vmem>>, %arg9: memref<2x12x32x128xbf16, #tpu.memory_space<vmem>>, %arg10: memref<2x!tpu.dma_semaphore, #tpu.memory_space<semaphore_mem>>) attributes {dimension_semantics = [#tpu.dimension_semantics<parallel>, #tpu.dimension_semantics<arbitrary>], iteration_bounds = array<i64: 2, 2>, scalar_prefetch = 0 : i64, scratch_operands = 2 : i64, tpu.core_type = #tpu.core_type<tc>, window_params = [{}, {pipeline_mode = #tpu.pipeline_mode<synchronous>, transform_indices = @transform_1, window_bounds = array<i64: 1152, 128>}, {pipeline_mode = #tpu.pipeline_mode<synchronous>, transform_indices = @transform_2, window_bounds = array<i64: 1, 128>}, {pipeline_mode = #tpu.pipeline_mode<synchronous>, transform_indices = @transform_3, window_bounds = array<i64: 1152, 128>}, {pipeline_mode = #tpu.pipeline_mode<synchronous>, transform_indices = @transform_4, window_bounds = array<i64: 1, 128>}, {transform_indices = @transform_5, window_bounds = array<i64: 1, 128, 128>}, {transform_indices = @transform_6, window_bounds = array<i64: 1, 128, 128>}]} {
    %c1_i32 = arith.constant 1 : i32
    %0 = arith.andi %arg1, %c1_i32 : i32
    %c0_i32 = arith.constant 0 : i32
    %1 = arith.cmpi eq, %arg1, %c0_i32 : i32
    %2 = arith.extui %1 : i1 to i32
    %c0_i32_0 = arith.constant 0 : i32
    %3 = arith.cmpi ne, %2, %c0_i32_0 : i32
    scf.if %3 {
      %c0_i32_54 = arith.constant 0 : i32
      %c0_i32_55 = arith.constant 0 : i32
      %c0_i32_56 = arith.constant 0 : i32
      %c0_i32_57 = arith.constant 0 : i32
      %c0_i32_58 = arith.constant 0 : i32
      %96 = tpu.memref_slice %arg2[%arg0, %c0_i32_56, %c0_i32_57, %c0_i32_58] : memref<2x20x32x128xbf16, #tpu.memory_space<any>> -> memref<1x12x32x128xbf16, #tpu.memory_space<any>>
      %97 = tpu.memref_squeeze %96 : memref<1x12x32x128xbf16, #tpu.memory_space<any>> -> memref<12x32x128xbf16, #tpu.memory_space<any>>
      %c0_i32_59 = arith.constant 0 : i32
      %c0_i32_60 = arith.constant 0 : i32
      %c0_i32_61 = arith.constant 0 : i32
      %98 = tpu.memref_slice %arg9[%c0_i32_54, %c0_i32_59, %c0_i32_60, %c0_i32_61] : memref<2x12x32x128xbf16, #tpu.memory_space<vmem>> -> memref<1x12x32x128xbf16, #tpu.memory_space<vmem>>
      %99 = tpu.memref_squeeze %98 : memref<1x12x32x128xbf16, #tpu.memory_space<vmem>> -> memref<12x32x128xbf16, #tpu.memory_space<vmem>>
      %100 = tpu.memref_slice %arg10[%c0_i32_55] : memref<2x!tpu.dma_semaphore, #tpu.memory_space<semaphore_mem>> -> memref<1x!tpu.dma_semaphore, #tpu.memory_space<semaphore_mem>>
      %101 = tpu.memref_squeeze %100 : memref<1x!tpu.dma_semaphore, #tpu.memory_space<semaphore_mem>> -> memref<!tpu.dma_semaphore, #tpu.memory_space<semaphore_mem>>
      tpu.enqueue_dma source(%97 : memref<12x32x128xbf16, #tpu.memory_space<any>>) target(%99 : memref<12x32x128xbf16, #tpu.memory_space<vmem>>) target_semaphore(%101 : memref<!tpu.dma_semaphore, #tpu.memory_space<semaphore_mem>>)
    } else {
    }
    %c8_i32 = arith.constant 8 : i32
    %4 = arith.muli %arg1, %c8_i32 : i32
    %c0_i32_1 = arith.constant 0 : i32
    %c0_i32_2 = arith.constant 0 : i32
    %5 = tpu.memref_slice %arg2[%arg0, %4, %c0_i32_1, %c0_i32_2] : memref<2x20x32x128xbf16, #tpu.memory_space<any>> -> memref<1x12x32x128xbf16, #tpu.memory_space<any>>
    %6 = tpu.memref_squeeze %5 : memref<1x12x32x128xbf16, #tpu.memory_space<any>> -> memref<12x32x128xbf16, #tpu.memory_space<any>>
    %c0_i32_3 = arith.constant 0 : i32
    %c0_i32_4 = arith.constant 0 : i32
    %c0_i32_5 = arith.constant 0 : i32
    %7 = tpu.memref_slice %arg9[%0, %c0_i32_3, %c0_i32_4, %c0_i32_5] : memref<2x12x32x128xbf16, #tpu.memory_space<vmem>> -> memref<1x12x32x128xbf16, #tpu.memory_space<vmem>>
    %8 = tpu.memref_squeeze %7 : memref<1x12x32x128xbf16, #tpu.memory_space<vmem>> -> memref<12x32x128xbf16, #tpu.memory_space<vmem>>
    %9 = tpu.memref_slice %arg10[%0] : memref<2x!tpu.dma_semaphore, #tpu.memory_space<semaphore_mem>> -> memref<1x!tpu.dma_semaphore, #tpu.memory_space<semaphore_mem>>
    %10 = tpu.memref_squeeze %9 : memref<1x!tpu.dma_semaphore, #tpu.memory_space<semaphore_mem>> -> memref<!tpu.dma_semaphore, #tpu.memory_space<semaphore_mem>>
    tpu.wait_dma2 semaphore(%10 : memref<!tpu.dma_semaphore, #tpu.memory_space<semaphore_mem>>) src(%6 : memref<12x32x128xbf16, #tpu.memory_space<any>>) dst(%8 : memref<12x32x128xbf16, #tpu.memory_space<vmem>>)
    %c1_i32_6 = arith.constant 1 : i32
    %11 = arith.addi %arg1, %c1_i32_6 : i32
    %c2_i32 = arith.constant 2 : i32
    %12 = arith.cmpi slt, %11, %c2_i32 : i32
    %13 = arith.extui %12 : i1 to i32
    %c0_i32_7 = arith.constant 0 : i32
    %14 = arith.cmpi ne, %13, %c0_i32_7 : i32
    scf.if %14 {
      %c1_i32_54 = arith.constant 1 : i32
      %96 = arith.addi %arg1, %c1_i32_54 : i32
      %c1_i32_55 = arith.constant 1 : i32
      %97 = arith.subi %c1_i32_55, %0 : i32
      %c8_i32_56 = arith.constant 8 : i32
      %98 = arith.muli %96, %c8_i32_56 : i32
      %c0_i32_57 = arith.constant 0 : i32
      %c0_i32_58 = arith.constant 0 : i32
      %99 = tpu.memref_slice %arg2[%arg0, %98, %c0_i32_57, %c0_i32_58] : memref<2x20x32x128xbf16, #tpu.memory_space<any>> -> memref<1x12x32x128xbf16, #tpu.memory_space<any>>
      %100 = tpu.memref_squeeze %99 : memref<1x12x32x128xbf16, #tpu.memory_space<any>> -> memref<12x32x128xbf16, #tpu.memory_space<any>>
      %c0_i32_59 = arith.constant 0 : i32
      %c0_i32_60 = arith.constant 0 : i32
      %c0_i32_61 = arith.constant 0 : i32
      %101 = tpu.memref_slice %arg9[%97, %c0_i32_59, %c0_i32_60, %c0_i32_61] : memref<2x12x32x128xbf16, #tpu.memory_space<vmem>> -> memref<1x12x32x128xbf16, #tpu.memory_space<vmem>>
      %102 = tpu.memref_squeeze %101 : memref<1x12x32x128xbf16, #tpu.memory_space<vmem>> -> memref<12x32x128xbf16, #tpu.memory_space<vmem>>
      %103 = tpu.memref_slice %arg10[%97] : memref<2x!tpu.dma_semaphore, #tpu.memory_space<semaphore_mem>> -> memref<1x!tpu.dma_semaphore, #tpu.memory_space<semaphore_mem>>
      %104 = tpu.memref_squeeze %103 : memref<1x!tpu.dma_semaphore, #tpu.memory_space<semaphore_mem>> -> memref<!tpu.dma_semaphore, #tpu.memory_space<semaphore_mem>>
      tpu.enqueue_dma source(%100 : memref<12x32x128xbf16, #tpu.memory_space<any>>) target(%102 : memref<12x32x128xbf16, #tpu.memory_space<vmem>>) target_semaphore(%104 : memref<!tpu.dma_semaphore, #tpu.memory_space<semaphore_mem>>)
    } else {
    }
    %15 = arith.index_cast %0 : i32 to index
    %c0 = arith.constant 0 : index
    %c0_8 = arith.constant 0 : index
    %c0_9 = arith.constant 0 : index
    %16 = vector.load %arg9[%15, %c0, %c0_8, %c0_9] : memref<2x12x32x128xbf16, #tpu.memory_space<vmem>>, vector<1x10x24x128xbf16>
    %17 = vector.shape_cast %16 : vector<1x10x24x128xbf16> to vector<10x24x128xbf16>
    %18 = arith.index_cast %0 : i32 to index
    %c0_10 = arith.constant 0 : index
    %c1 = arith.constant 1 : index
    %c0_11 = arith.constant 0 : index
    %19 = vector.load %arg9[%18, %c0_10, %c1, %c0_11] : memref<2x12x32x128xbf16, #tpu.memory_space<vmem>>, vector<1x10x24x128xbf16>
    %20 = vector.shape_cast %19 : vector<1x10x24x128xbf16> to vector<10x24x128xbf16>
    %21 = arith.index_cast %0 : i32 to index
    %c0_12 = arith.constant 0 : index
    %c2 = arith.constant 2 : index
    %c0_13 = arith.constant 0 : index
    %22 = vector.load %arg9[%21, %c0_12, %c2, %c0_13] : memref<2x12x32x128xbf16, #tpu.memory_space<vmem>>, vector<1x10x24x128xbf16>
    %23 = vector.shape_cast %22 : vector<1x10x24x128xbf16> to vector<10x24x128xbf16>
    %24 = arith.index_cast %0 : i32 to index
    %c1_14 = arith.constant 1 : index
    %c0_15 = arith.constant 0 : index
    %c0_16 = arith.constant 0 : index
    %25 = vector.load %arg9[%24, %c1_14, %c0_15, %c0_16] : memref<2x12x32x128xbf16, #tpu.memory_space<vmem>>, vector<1x10x24x128xbf16>
    %26 = vector.shape_cast %25 : vector<1x10x24x128xbf16> to vector<10x24x128xbf16>
    %27 = arith.index_cast %0 : i32 to index
    %c1_17 = arith.constant 1 : index
    %c1_18 = arith.constant 1 : index
    %c0_19 = arith.constant 0 : index
    %28 = vector.load %arg9[%27, %c1_17, %c1_18, %c0_19] : memref<2x12x32x128xbf16, #tpu.memory_space<vmem>>, vector<1x10x24x128xbf16>
    %29 = vector.shape_cast %28 : vector<1x10x24x128xbf16> to vector<10x24x128xbf16>
    %30 = arith.index_cast %0 : i32 to index
    %c1_20 = arith.constant 1 : index
    %c2_21 = arith.constant 2 : index
    %c0_22 = arith.constant 0 : index
    %31 = vector.load %arg9[%30, %c1_20, %c2_21, %c0_22] : memref<2x12x32x128xbf16, #tpu.memory_space<vmem>>, vector<1x10x24x128xbf16>
    %32 = vector.shape_cast %31 : vector<1x10x24x128xbf16> to vector<10x24x128xbf16>
    %33 = arith.index_cast %0 : i32 to index
    %c2_23 = arith.constant 2 : index
    %c0_24 = arith.constant 0 : index
    %c0_25 = arith.constant 0 : index
    %34 = vector.load %arg9[%33, %c2_23, %c0_24, %c0_25] : memref<2x12x32x128xbf16, #tpu.memory_space<vmem>>, vector<1x10x24x128xbf16>
    %35 = vector.shape_cast %34 : vector<1x10x24x128xbf16> to vector<10x24x128xbf16>
    %36 = arith.index_cast %0 : i32 to index
    %c2_26 = arith.constant 2 : index
    %c1_27 = arith.constant 1 : index
    %c0_28 = arith.constant 0 : index
    %37 = vector.load %arg9[%36, %c2_26, %c1_27, %c0_28] : memref<2x12x32x128xbf16, #tpu.memory_space<vmem>>, vector<1x10x24x128xbf16>
    %38 = vector.shape_cast %37 : vector<1x10x24x128xbf16> to vector<10x24x128xbf16>
    %39 = arith.index_cast %0 : i32 to index
    %c2_29 = arith.constant 2 : index
    %c2_30 = arith.constant 2 : index
    %c0_31 = arith.constant 0 : index
    %40 = vector.load %arg9[%39, %c2_29, %c2_30, %c0_31] : memref<2x12x32x128xbf16, #tpu.memory_space<vmem>>, vector<1x10x24x128xbf16>
    %41 = vector.shape_cast %40 : vector<1x10x24x128xbf16> to vector<10x24x128xbf16>
    %42 = tpu.concatenate %17, %20, %23, %26, %29, %32, %35, %38, %41 in 2 : vector<10x24x128xbf16>, vector<10x24x128xbf16>, vector<10x24x128xbf16>, vector<10x24x128xbf16>, vector<10x24x128xbf16>, vector<10x24x128xbf16>, vector<10x24x128xbf16>, vector<10x24x128xbf16>, vector<10x24x128xbf16> -> vector<10x24x1152xbf16>
    %43 = vector.shape_cast %42 : vector<10x24x1152xbf16> to vector<240x1152xbf16>
    %c0_32 = arith.constant 0 : index
    %c0_33 = arith.constant 0 : index
    %44 = vector.load %arg3[%c0_32, %c0_33] : memref<1152x128xbf16, #tpu.memory_space<vmem>>, vector<1152x128xbf16>
    %cst = arith.constant dense<0.000000e+00> : vector<240x128xf32>
    %45 = tpu.matmul %43, %44, %cst {dimension_numbers = #tpu.dot_dimension_numbers<[1], [0], [0], [1], [0, 0, 1, 1], [], []>} : vector<240x1152xbf16>, vector<1152x128xbf16>, vector<240x128xf32> -> vector<240x128xf32>
    %c0_34 = arith.constant 0 : index
    %c0_35 = arith.constant 0 : index
    %46 = vector.load %arg4[%c0_34, %c0_35] : memref<1x128xf32, #tpu.memory_space<vmem>>, vector<1x128xf32>
    %47 = vector.broadcast %46 : vector<1x128xf32> to vector<240x128xf32>
    %48 = arith.addf %45, %47 : vector<240x128xf32>
    %cst_36 = arith.constant 0.000000e+00 : f32
    %49 = vector.broadcast %cst_36 : f32 to vector<240x128xf32>
    %50 = arith.maximumf %48, %49 : vector<240x128xf32>
    %51 = vector.shape_cast %50 : vector<240x128xf32> to vector<10x24x128xf32>
    %52 = tpu.iota {dimensions = array<i32: 0>} : vector<10x24x1xi32>
    %c8_i32_37 = arith.constant 8 : i32
    %53 = arith.muli %arg1, %c8_i32_37 : i32
    %c1_i32_38 = arith.constant 1 : i32
    %54 = arith.subi %53, %c1_i32_38 : i32
    %55 = vector.broadcast %54 : i32 to vector<10x24x1xi32>
    %56 = arith.addi %52, %55 : vector<10x24x1xi32>
    %57 = tpu.iota {dimensions = array<i32: 1>} : vector<10x24x1xi32>
    %c0_i32_39 = arith.constant 0 : i32
    %58 = vector.broadcast %c0_i32_39 : i32 to vector<10x24x1xi32>
    %59 = arith.cmpi sge, %56, %58 : vector<10x24x1xi32>
    %c16_i32 = arith.constant 16 : i32
    %60 = vector.broadcast %c16_i32 : i32 to vector<10x24x1xi32>
    %61 = arith.cmpi slt, %56, %60 : vector<10x24x1xi32>
    %62 = arith.andi %59, %61 : vector<10x24x1xi1>
    %c1_i32_40 = arith.constant 1 : i32
    %63 = vector.broadcast %c1_i32_40 : i32 to vector<10x24x1xi32>
    %64 = arith.cmpi sge, %57, %63 : vector<10x24x1xi32>
    %65 = arith.andi %62, %64 : vector<10x24x1xi1>
    %c16_i32_41 = arith.constant 16 : i32
    %66 = vector.broadcast %c16_i32_41 : i32 to vector<10x24x1xi32>
    %67 = arith.cmpi sle, %57, %66 : vector<10x24x1xi32>
    %68 = arith.andi %65, %67 : vector<10x24x1xi1>
    %cst_42 = arith.constant 0.000000e+00 : f32
    %69 = vector.shape_cast %68 : vector<10x24x1xi1> to vector<10x24x1xi1>
    %70 = vector.broadcast %69 : vector<10x24x1xi1> to vector<10x24x128xi1>
    %71 = vector.broadcast %cst_42 : f32 to vector<10x24x128xf32>
    %72 = arith.select %70, %51, %71 : vector<10x24x128xi1>, vector<10x24x128xf32>
    %73 = arith.truncf %72 : vector<10x24x128xf32> to vector<10x24x128xbf16>
    %74 = vector.extract_strided_slice %73 {offsets = [0, 0, 0], sizes = [8, 16, 128], strides = [1, 1, 1]} : vector<10x24x128xbf16> to vector<8x16x128xbf16>
    %75 = vector.extract_strided_slice %73 {offsets = [0, 1, 0], sizes = [8, 16, 128], strides = [1, 1, 1]} : vector<10x24x128xbf16> to vector<8x16x128xbf16>
    %76 = vector.extract_strided_slice %73 {offsets = [0, 2, 0], sizes = [8, 16, 128], strides = [1, 1, 1]} : vector<10x24x128xbf16> to vector<8x16x128xbf16>
    %77 = vector.extract_strided_slice %73 {offsets = [1, 0, 0], sizes = [8, 16, 128], strides = [1, 1, 1]} : vector<10x24x128xbf16> to vector<8x16x128xbf16>
    %78 = vector.extract_strided_slice %73 {offsets = [1, 1, 0], sizes = [8, 16, 128], strides = [1, 1, 1]} : vector<10x24x128xbf16> to vector<8x16x128xbf16>
    %79 = vector.extract_strided_slice %73 {offsets = [1, 2, 0], sizes = [8, 16, 128], strides = [1, 1, 1]} : vector<10x24x128xbf16> to vector<8x16x128xbf16>
    %80 = vector.extract_strided_slice %73 {offsets = [2, 0, 0], sizes = [8, 16, 128], strides = [1, 1, 1]} : vector<10x24x128xbf16> to vector<8x16x128xbf16>
    %81 = vector.extract_strided_slice %73 {offsets = [2, 1, 0], sizes = [8, 16, 128], strides = [1, 1, 1]} : vector<10x24x128xbf16> to vector<8x16x128xbf16>
    %82 = vector.extract_strided_slice %73 {offsets = [2, 2, 0], sizes = [8, 16, 128], strides = [1, 1, 1]} : vector<10x24x128xbf16> to vector<8x16x128xbf16>
    %83 = tpu.concatenate %74, %75, %76, %77, %78, %79, %80, %81, %82 in 2 : vector<8x16x128xbf16>, vector<8x16x128xbf16>, vector<8x16x128xbf16>, vector<8x16x128xbf16>, vector<8x16x128xbf16>, vector<8x16x128xbf16>, vector<8x16x128xbf16>, vector<8x16x128xbf16>, vector<8x16x128xbf16> -> vector<8x16x1152xbf16>
    %84 = vector.shape_cast %83 : vector<8x16x1152xbf16> to vector<128x1152xbf16>
    %c0_43 = arith.constant 0 : index
    %c0_44 = arith.constant 0 : index
    %85 = vector.load %arg5[%c0_43, %c0_44] : memref<1152x128xbf16, #tpu.memory_space<vmem>>, vector<1152x128xbf16>
    %cst_45 = arith.constant dense<0.000000e+00> : vector<128x128xf32>
    %86 = tpu.matmul %84, %85, %cst_45 {dimension_numbers = #tpu.dot_dimension_numbers<[1], [0], [0], [1], [0, 0, 1, 1], [], []>} : vector<128x1152xbf16>, vector<1152x128xbf16>, vector<128x128xf32> -> vector<128x128xf32>
    %c0_46 = arith.constant 0 : index
    %c0_47 = arith.constant 0 : index
    %87 = vector.load %arg6[%c0_46, %c0_47] : memref<1x128xf32, #tpu.memory_space<vmem>>, vector<1x128xf32>
    %88 = vector.broadcast %87 : vector<1x128xf32> to vector<128x128xf32>
    %89 = arith.addf %86, %88 : vector<128x128xf32>
    %c0_48 = arith.constant 0 : index
    %c0_49 = arith.constant 0 : index
    %c0_50 = arith.constant 0 : index
    %90 = vector.load %arg7[%c0_48, %c0_49, %c0_50] : memref<1x128x128xf32, #tpu.memory_space<vmem>>, vector<1x128x128xf32>
    %91 = vector.shape_cast %90 : vector<1x128x128xf32> to vector<128x128xf32>
    %92 = arith.addf %89, %91 : vector<128x128xf32>
    %c0_51 = arith.constant 0 : index
    %c0_52 = arith.constant 0 : index
    %c0_53 = arith.constant 0 : index
    %93 = vector.load %arg8[%c0_51, %c0_52, %c0_53] : memref<1x128x128xf32, #tpu.memory_space<vmem>>, vector<1x128x128xf32>
    %94 = vector.shape_cast %93 : vector<1x128x128xf32> to vector<128x128xf32>
    %95 = vector.shape_cast %92 : vector<128x128xf32> to vector<1x128x128xf32>
    tpu.vector_store %arg8[%c0_51, %c0_52, %c0_53], %95 {strides = array<i32>} : memref<1x128x128xf32, #tpu.memory_space<vmem>>, vector<1x128x128xf32>,
    return
  }
  func.func @transform_1(%arg0: i32, %arg1: i32) -> (i32, i32) {
    %c0_i32 = arith.constant 0 : i32
    %c0_i32_0 = arith.constant 0 : i32
    %c0_i32_1 = arith.constant 0 : i32
    return %c0_i32, %c0_i32_0 : i32, i32
  }
  func.func @transform_2(%arg0: i32, %arg1: i32) -> (i32, i32) {
    %c0_i32 = arith.constant 0 : i32
    %c0_i32_0 = arith.constant 0 : i32
    %c0_i32_1 = arith.constant 0 : i32
    return %c0_i32, %c0_i32_0 : i32, i32
  }
  func.func @transform_3(%arg0: i32, %arg1: i32) -> (i32, i32) {
    %c0_i32 = arith.constant 0 : i32
    %c0_i32_0 = arith.constant 0 : i32
    %c0_i32_1 = arith.constant 0 : i32
    return %c0_i32, %c0_i32_0 : i32, i32
  }
  func.func @transform_4(%arg0: i32, %arg1: i32) -> (i32, i32) {
    %c0_i32 = arith.constant 0 : i32
    %c0_i32_0 = arith.constant 0 : i32
    %c0_i32_1 = arith.constant 0 : i32
    return %c0_i32, %c0_i32_0 : i32, i32
  }
  func.func @transform_5(%arg0: i32, %arg1: i32) -> (i32, i32, i32) {
    %c0_i32 = arith.constant 0 : i32
    %c0_i32_0 = arith.constant 0 : i32
    return %arg0, %arg1, %c0_i32 : i32, i32, i32
  }
  func.func @transform_6(%arg0: i32, %arg1: i32) -> (i32, i32, i32) {
    %c0_i32 = arith.constant 0 : i32
    %c0_i32_0 = arith.constant 0 : i32
    return %arg0, %arg1, %c0_i32 : i32, i32, i32
  }
}

</mosaic_0001>

<bundles_post_ra>
// kernel: residual_block_forward.1
= control target key start
LH: loop header
LB: loop body
LE: loop exit
PB: predicated region body
PF: predicated region fallthrough
CT: control target
= control target key end

     0   :  { %s6223_s21 = smov 0   ;;  %s6225_s22 = smov 0   ;;  %s8826_s0 = inlined_call_operand.vmem [shape: bf16[2,20,32,128], index: 0, kind: input, shape index: {}]   ;;  %s8827_s1 = inlined_call_operand.vmem [shape: bf16[1152,128], index: 1, kind: input, shape index: {}]   ;;  %s8828_s2 = inlined_call_operand.vmem [shape: f32[1,128], index: 2, kind: input, shape index: {}]   ;;  %s8829_s3 = inlined_call_operand.vmem [shape: bf16[1152,128], index: 3, kind: input, shape index: {}]   ;;  %s8830_s4 = inlined_call_operand.vmem [shape: f32[1,128], index: 4, kind: input, shape index: {}]   ;;  %s8831_s5 = inlined_call_operand.vmem [shape: f32[2,256,128], index: 5, kind: input, shape index: {}]   ;;  %s8832_s6 = inlined_call_operand.vmem [shape: f32[2,256,128], index: 6, kind: output, shape index: {}]  }
   0x1   :  { %s6227_s23 = smov 0   ;;  %s6229_s24 = smov 0  }
   0x2   :  { %s6231_s25 = smov 0  }
   0x3 LB: > { %s25_s26 = sadd.s32 1, %s6178_s23  ;;  %s28_s27 = sadd.s32 1, %s6182_s24  ;;  %s6186_s25 = sphi %s6231_s25, %s16_s25   ;;  %s6182_s24 = sphi %s6229_s24, %s9074_s24   ;;  %s6178_s23 = sphi %s6227_s23, %s9073_s23   ;;  %s6174_s22 = sphi %s6225_s22, %s9072_s22   ;;  %s6170_s21 = sphi %s6223_s21, %s9071_s21  }
   0x4   : > { %p26_p0 = scmp.ge.s32.totalorder %s25_s26, 2  ;;  %p5013_p1 = scmp.ge.s32.totalorder %s6186_s25, 1 }
   0x5   : > { %p209_p2 = scmp.lt.s32.totalorder %s6186_s25, 5 }
   0x6   : > { %s9076_s26 = smov (%p26_p0, %s25_s26), 0  ;;  %s9078_s27 = smov (!%p26_p0, %s28_s27), %s6182_s24 }
   0x7   : > { %p210_p3 = pnand %p5013_p1, %p209_p2  ;;  %p30_p4 = scmp.ge.s32.totalorder %s9078_s27, 2 }
   0x9   : > { %s9080_s27 = smov (%p30_p4, %s9078_s27), 0  ;;  %213 = sbr.rel (%p210_p3) target bundleno = 1326 (0x52e), region = 40 }
   0xe   : > { %s5014_s28 = sshll.u32 %s6170_s21, 4  ;;  %p246_p5 = scmp.lt.s32.totalorder %s6174_s22, 1 }
   0xf   : > { %p248_p6 = scmp.lt.s32.totalorder %s5014_s28, 31  ;;  %s6260_s29 = sand.u32 1, %s6170_s21 }
  0x10   : > { %s247_s30 = scalar_select %p246_p5, %s6174_s22, 1 }
  0x11   : > { %s9082_s28 = smov (!%p248_p6, %s5014_s28), 31  ;;  %p5020_p7 = scmp.ne.s32.totalorder %s6170_s21, 0 }
  0x12   : > { %s5015_s7 = sshll.u32 %s247_s30, 5  ;;  %s5735_s16 = smul.u32 (!%p5020_p7), 320, %s6174_s22 }
  0x13   : > { %s251_s8 = sadd.s32 %s5015_s7, %s9082_s28  ;;  %269 = sbr.rel (%p5020_p7) target bundleno = 50 (0x32), region = 44 }
  0x14   : > { %s5016_s9 = sshll.u32 %s251_s8, 3  ;;  %s6278_s19 = scalar_lea.vmem (!%p5020_p7), %s8826_s0, %s5735_s16 }
  0x15   : > { %s6266_s12 = scalar_lea.vmem %s8831_s5, %s5016_s9  ;;  %s6271_s15 = scalar_lea.vmem %s8832_s6, %s5016_s9 }
  0x18   : > { %v283_v0 = vld [vmem:[%s6278_s19] sm:$0xff]  ;;  %v285_v1 = vld [vmem:[%s6278_s19 + $0x8] sm:$0xff]  ;;  %v287_v2 = vld [vmem:[%s6278_s19 + $0x10] sm:$0xff] }
  0x19   : > { %284 = vst [vmem:[#allocation2] sm:$0xff] %v283_v0  ;;  %v289_v3 = vld [vmem:[%s6278_s19 + $0x18] sm:$0xff]  ;;  %v291_v4 = vld [vmem:[%s6278_s19 + $0x20] sm:$0xff]  ;;  %v293_v5 = vld [vmem:[%s6278_s19 + $0x28] sm:$0xff] }
  0x1a   : > { %286 = vst [vmem:[#allocation2 + $0x8] sm:$0xff] %v285_v1  ;;  %v295_v6 = vld [vmem:[%s6278_s19 + $0x30] sm:$0xff]  ;;  %v297_v7 = vld [vmem:[%s6278_s19 + $0x38] sm:$0xff]  ;;  %v299_v8 = vld [vmem:[%s6278_s19 + $0x40] sm:$0xff] }
  0x1b   : > { %288 = vst [vmem:[#allocation2 + $0x10] sm:$0xff] %v287_v2  ;;  %v301_v9 = vld [vmem:[%s6278_s19 + $0x48] sm:$0xff]  ;;  %v303_v10 = vld [vmem:[%s6278_s19 + $0x50] sm:$0xff]  ;;  %v305_v11 = vld [vmem:[%s6278_s19 + $0x58] sm:$0xff] }
  0x1c   : > { %290 = vst [vmem:[#allocation2 + $0x18] sm:$0xff] %v289_v3  ;;  %v307_v12 = vld [vmem:[%s6278_s19 + $0x60] sm:$0xff]  ;;  %v309_v13 = vld [vmem:[%s6278_s19 + $0x68] sm:$0xff]  ;;  %v311_v14 = vld [vmem:[%s6278_s19 + $0x70] sm:$0xff] }
  0x1d   : > { %292 = vst [vmem:[#allocation2 + $0x20] sm:$0xff] %v291_v4  ;;  %v313_v15 = vld [vmem:[%s6278_s19 + $0x78] sm:$0xff]  ;;  %v315_v16 = vld [vmem:[%s6278_s19 + $0x80] sm:$0xff]  ;;  %v317_v17 = vld [vmem:[%s6278_s19 + $0x88] sm:$0xff] }
  0x1e   : > { %294 = vst [vmem:[#allocation2 + $0x28] sm:$0xff] %v293_v5  ;;  %v319_v18 = vld [vmem:[%s6278_s19 + $0x90] sm:$0xff]  ;;  %v321_v19 = vld [vmem:[%s6278_s19 + $0x98] sm:$0xff]  ;;  %v323_v20 = vld [vmem:[%s6278_s19 + $0xa0] sm:$0xff] }
  0x1f   : > { %296 = vst [vmem:[#allocation2 + $0x30] sm:$0xff] %v295_v6  ;;  %v325_v21 = vld [vmem:[%s6278_s19 + $0xa8] sm:$0xff]  ;;  %v327_v22 = vld [vmem:[%s6278_s19 + $0xb0] sm:$0xff]  ;;  %v329_v23 = vld [vmem:[%s6278_s19 + $0xb8] sm:$0xff] }
  0x20   : > { %298 = vst [vmem:[#allocation2 + $0x38] sm:$0xff] %v297_v7 }
  0x21   : > { %300 = vst [vmem:[#allocation2 + $0x40] sm:$0xff] %v299_v8 }
  0x22   : > { %302 = vst [vmem:[#allocation2 + $0x48] sm:$0xff] %v301_v9 }
  0x23   : > { %304 = vst [vmem:[#allocation2 + $0x50] sm:$0xff] %v303_v10 }
  0x24   : > { %306 = vst [vmem:[#allocation2 + $0x58] sm:$0xff] %v305_v11 }
  0x25   : > { %308 = vst [vmem:[#allocation2 + $0x60] sm:$0xff] %v307_v12 }
  0x26   : > { %310 = vst [vmem:[#allocation2 + $0x68] sm:$0xff] %v309_v13 }
  0x27   : > { %312 = vst [vmem:[#allocation2 + $0x70] sm:$0xff] %v311_v14 }
  0x28   : > { %314 = vst [vmem:[#allocation2 + $0x78] sm:$0xff] %v313_v15 }
  0x29   : > { %316 = vst [vmem:[#allocation2 + $0x80] sm:$0xff] %v315_v16 }
  0x2a   : > { %318 = vst [vmem:[#allocation2 + $0x88] sm:$0xff] %v317_v17 }
  0x2b   : > { %320 = vst [vmem:[#allocation2 + $0x90] sm:$0xff] %v319_v18 }
  0x2c   : > { %322 = vst [vmem:[#allocation2 + $0x98] sm:$0xff] %v321_v19 }
  0x2d   : > { %324 = vst [vmem:[#allocation2 + $0xa0] sm:$0xff] %v323_v20 }
  0x2e   : > { %326 = vst [vmem:[#allocation2 + $0xa8] sm:$0xff] %v325_v21 }
  0x2f   : > { %328 = vst [vmem:[#allocation2 + $0xb0] sm:$0xff] %v327_v22 }
  0x30   : > { %330 = vst [vmem:[#allocation2 + $0xb8] sm:$0xff] %v329_v23 }
  0x31   : > { %336 = vsyncadd [#allocation3], 3072 }
  0x32 PF: > { %s5022_s20 = sshll.u32 %s6170_s21, 3  ;;  %s338_s28 = scalar_lea.sflag [#allocation3], %s6260_s29 }
  0x33   : > { %6166 = dma.done.wait %s338_s28, 3072 }
  0x34   : > { %6167 = vsyncadd %s338_s28, 4294964224  ;;  %s344_s30 = sadd.s32 1, %s6170_s21 }
  0x35   : > { %p5023_p8 = scmp.ge.s32.totalorder %s344_s30, 2 }
  0x36   : > { %s349_s7 = ssub.s32 (!%p5023_p8), 1, %s6260_s29  ;;  %s5024_s8 = sshll.u32 (!%p5023_p8), %s6170_s21, 5 }
  0x37   : > { %348 = sbr.rel (%p5023_p8) target bundleno = 87 (0x57), region = 67  ;;  %s359_s18 = scalar_lea.sflag (!%p5023_p8), [#allocation3], %s349_s7 }
  0x38   : > { %s4943_s9 = smul.u32 (!%p5023_p8), 80, %s6174_s22 }
  0x39   : > { %s5736_s10 = smul.u32 (!%p5023_p8), 192, %s349_s7 }
  0x3a   : > { %s4944_s11 = sadd.s32 (!%p5023_p8), %s5024_s8, %s4943_s9 }
  0x3b   : > { %s5025_s13 = sshll.u32 (!%p5023_p8), %s4944_s11, 2  ;;  %s6320_s22 = scalar_lea.vmem (!%p5023_p8), [#allocation2], %s5736_s10 }
  0x3c   : > { %s6315_s17 = scalar_lea.vmem %s8826_s0, %s5025_s13 }
  0x3d   : > { %v5027_v24 = vld [vmem:[%s6315_s17 + $0x80] sm:$0xff]  ;;  %v5028_v25 = vld [vmem:[%s6315_s17 + $0x88] sm:$0xff]  ;;  %v5029_v26 = vld [vmem:[%s6315_s17 + $0x90] sm:$0xff] }
  0x3e   : > { %371 = vst [vmem:[%s6320_s22] sm:$0xff] %v5027_v24  ;;  %v5030_v27 = vld [vmem:[%s6315_s17 + $0x98] sm:$0xff]  ;;  %v5031_v28 = vld [vmem:[%s6315_s17 + $0xa0] sm:$0xff]  ;;  %v5032_v29 = vld [vmem:[%s6315_s17 + $0xa8] sm:$0xff] }
  0x3f   : > { %373 = vst [vmem:[%s6320_s22 + $0x8] sm:$0xff] %v5028_v25  ;;  %v5033_v30 = vld [vmem:[%s6315_s17 + $0xb0] sm:$0xff]  ;;  %v5034_v31 = vld [vmem:[%s6315_s17 + $0xb8] sm:$0xff]  ;;  %v5035_v32 = vld [vmem:[%s6315_s17 + $0xc0] sm:$0xff] }
  0x40   : > { %375 = vst [vmem:[%s6320_s22 + $0x10] sm:$0xff] %v5029_v26  ;;  %v5036_v33 = vld [vmem:[%s6315_s17 + $0xc8] sm:$0xff]  ;;  %v5037_v34 = vld [vmem:[%s6315_s17 + $0xd0] sm:$0xff]  ;;  %v5038_v35 = vld [vmem:[%s6315_s17 + $0xd8] sm:$0xff] }
  0x41   : > { %377 = vst [vmem:[%s6320_s22 + $0x18] sm:$0xff] %v5030_v27  ;;  %v5039_v36 = vld [vmem:[%s6315_s17 + $0xe0] sm:$0xff]  ;;  %v5040_v37 = vld [vmem:[%s6315_s17 + $0xe8] sm:$0xff]  ;;  %v5041_v38 = vld [vmem:[%s6315_s17 + $0xf0] sm:$0xff] }
  0x42   : > { %379 = vst [vmem:[%s6320_s22 + $0x20] sm:$0xff] %v5031_v28  ;;  %v5042_v39 = vld [vmem:[%s6315_s17 + $0xf8] sm:$0xff]  ;;  %v5043_v40 = vld [vmem:[%s6315_s17 + $0x100] sm:$0xff]  ;;  %v5044_v41 = vld [vmem:[%s6315_s17 + $0x108] sm:$0xff] }
  0x43   : > { %381 = vst [vmem:[%s6320_s22 + $0x28] sm:$0xff] %v5032_v29  ;;  %v5045_v42 = vld [vmem:[%s6315_s17 + $0x110] sm:$0xff]  ;;  %v5046_v43 = vld [vmem:[%s6315_s17 + $0x118] sm:$0xff]  ;;  %v5047_v44 = vld [vmem:[%s6315_s17 + $0x120] sm:$0xff] }
  0x44   : > { %383 = vst [vmem:[%s6320_s22 + $0x30] sm:$0xff] %v5033_v30  ;;  %v5048_v45 = vld [vmem:[%s6315_s17 + $0x128] sm:$0xff]  ;;  %v5049_v46 = vld [vmem:[%s6315_s17 + $0x130] sm:$0xff]  ;;  %v5050_v47 = vld [vmem:[%s6315_s17 + $0x138] sm:$0xff] }
  0x45   : > { %385 = vst [vmem:[%s6320_s22 + $0x38] sm:$0xff] %v5034_v31 }
  0x46   : > { %387 = vst [vmem:[%s6320_s22 + $0x40] sm:$0xff] %v5035_v32 }
  0x47   : > { %389 = vst [vmem:[%s6320_s22 + $0x48] sm:$0xff] %v5036_v33 }
  0x48   : > { %391 = vst [vmem:[%s6320_s22 + $0x50] sm:$0xff] %v5037_v34 }
  0x49   : > { %393 = vst [vmem:[%s6320_s22 + $0x58] sm:$0xff] %v5038_v35 }
  0x4a   : > { %395 = vst [vmem:[%s6320_s22 + $0x60] sm:$0xff] %v5039_v36 }
  0x4b   : > { %397 = vst [vmem:[%s6320_s22 + $0x68] sm:$0xff] %v5040_v37 }
  0x4c   : > { %399 = vst [vmem:[%s6320_s22 + $0x70] sm:$0xff] %v5041_v38 }
  0x4d   : > { %401 = vst [vmem:[%s6320_s22 + $0x78] sm:$0xff] %v5042_v39 }
  0x4e   : > { %403 = vst [vmem:[%s6320_s22 + $0x80] sm:$0xff] %v5043_v40 }
  0x4f   : > { %405 = vst [vmem:[%s6320_s22 + $0x88] sm:$0xff] %v5044_v41 }
  0x50   : > { %407 = vst [vmem:[%s6320_s22 + $0x90] sm:$0xff] %v5045_v42 }
  0x51   : > { %409 = vst [vmem:[%s6320_s22 + $0x98] sm:$0xff] %v5046_v43 }
  0x52   : > { %411 = vst [vmem:[%s6320_s22 + $0xa0] sm:$0xff] %v5047_v44 }
  0x53   : > { %413 = vst [vmem:[%s6320_s22 + $0xa8] sm:$0xff] %v5048_v45 }
  0x54   : > { %415 = vst [vmem:[%s6320_s22 + $0xb0] sm:$0xff] %v5049_v46 }
  0x55   : > { %417 = vst [vmem:[%s6320_s22 + $0xb8] sm:$0xff] %v5050_v47 }
  0x56   : > { %423 = vsyncadd %s359_s18, 3072 }
  0x57 PF: > { %v5745_v48 = vld [vmem:[%s8827_s1 + $0x38] sm:$0xff]  ;;  %s5737_s11 = smul.u32 192, %s6260_s29  ;;  %v5744_v51 = vld [vmem:[%s8827_s1 + $0x30] sm:$0xff]  ;;  %v5743_v54 = vld [vmem:[%s8827_s1 + $0x28] sm:$0xff]  ;;  %vm683_vm0 = vsmask.f32 7424 }
  0x58   : > { %v5753_v49 = vld [vmem:[%s8827_s1 + $0x78] sm:$0xff]  ;;  %2530 = vmatpush.bf16.msra.mxu0 %v5745_v48  ;;  %v5752_v52 = vld [vmem:[%s8827_s1 + $0x70] sm:$0xff]  ;;  %v5751_v55 = vld [vmem:[%s8827_s1 + $0x68] sm:$0xff]  ;;  %vm864_vm1 = vcmask 1046528   ;;  %s5442_s17 = sadd.s32 4294967295, %s5022_s20 }
  0x59   : > { %v6378_v50 = vld [vmem:[%s8827_s1 + $0xb8] sm:$0xff]  ;;  %6076 = vmatpush.bf16.msra.mxu3 %v5753_v49  ;;  %2614 = vmatpush.bf16.msra.mxu1 %v5753_v49  ;;  %v6391_v53 = vld [vmem:[%s8827_s1 + $0xb0] sm:$0xff]  ;;  %v6403_v56 = vld [vmem:[%s8827_s1 + $0xa8] sm:$0xff]  ;;  %s6405_s9 = scalar_lea.vmem [#allocation2], %s5737_s11 }
  0x5a   : > { %2698 = vmatpush.bf16.msra.mxu2 %v6378_v50  ;;  %v5742_v62 = vld [vmem:[%s8827_s1 + $0x20] sm:$0xff]  ;;  %v5741_v11 = vld [vmem:[%s8827_s1 + $0x18] sm:$0xff]  ;;  %v5740_v22 = vld [vmem:[%s8827_s1 + $0x10] sm:$0xff] }
  0x5b   : > { %v5750_v63 = vld [vmem:[%s8827_s1 + $0x60] sm:$0xff]  ;;  %v5749_v12 = vld [vmem:[%s8827_s1 + $0x58] sm:$0xff]  ;;  %v5748_v23 = vld [vmem:[%s8827_s1 + $0x50] sm:$0xff] }
  0x5c   : > { %2531 = vmatpush.bf16.msra.mxu0 %v5744_v51  ;;  %v6408_v57 = vld [vmem:[%s6405_s9 + $0x88] sm:$0xf]  ;;  %v6411_v58 = vld [vmem:[%s6405_s9 + $0x90] sm:$0xff]   ;;  %v6414_v59 = vld [vmem:[%s6405_s9 + $0x98] sm:$0xf] }
  0x5d   : > { %6077 = vmatpush.bf16.msra.mxu3 %v5752_v52  ;;  %2615 = vmatpush.bf16.msra.mxu1 %v5752_v52  ;;  %v465_v60 = vld [vmem:[%s6405_s9 + $0x8c] sm:$0x1]  ;;  %v639_v61 = vunpack.c.l.b16 %v6408_v57  ;;  %v466_v0 = vld [vmem:[%s6405_s9 + $0x9c] sm:$0x1]  ;;  %v642_v1 = vunpack.c.l.b16 %v6414_v59  ;;  %v822_v3 = vshll.u32 %v6411_v58, 16  ;;  %v6431_v4 = vld [vmem:[%s8827_s1 + $0xa0] sm:$0xff] }
  0x5e   : > { %2699 = vmatpush.bf16.msra.mxu2 %v6391_v53  ;;  %v661_v2 = vunpack.c.l.b16 %v465_v60  ;;  %v662_v5 = vunpack.c.l.b16 %v466_v0  ;;  %v6434_v6 = vld [vmem:[%s6405_s9 + $0x8] sm:$0xf]  ;;  %v457_v7 = vld [vmem:[%s6405_s9 + $0xc] sm:$0x1]  ;;  %v820_v10 = vshrl.u32 %v6411_v58, 16  ;;  %v6458_v17 = vld [vmem:[%s8827_s1 + $0x98] sm:$0xff] }
  0x5f   : > { %v824_v14 = vrot.slane %v822_v3, 1  ;;  %v615_v15 = vunpack.c.l.b16 %v6434_v6  ;;  %v653_v16 = vunpack.c.l.b16 %v457_v7  ;;  %v6461_v18 = vld [vmem:[%s6405_s9] sm:$0xff]   ;;  %v6484_v28 = vld [vmem:[%s8827_s1 + $0x90] sm:$0xff]  ;;  %v6489_v31 = vld [vmem:[%s6405_s9 + $0x18] sm:$0xf] }
  0x60   : > { %2532 = vmatpush.bf16.msra.mxu0 %v5743_v54  ;;  %v6439_v8 = vpack.c.b16 %v661_v2, %v639_v61  ;;  %v6443_v9 = vpack.c.b16 %v662_v5, %v642_v1  ;;  %v687_v24 = vshll.u32 %v6461_v18, 16  ;;  %v6031_v29 = vld [vmem:[%s6405_s9] sm:$0xf0]  ;;  %v6032_v30 = vld [vmem:[%s6405_s9] sm:$0xe]  ;;  %v685_v33 = vshrl.u32 %v6461_v18, 16 }
  0x61   : > { %6078 = vmatpush.bf16.msra.mxu3 %v5751_v55  ;;  %2616 = vmatpush.bf16.msra.mxu1 %v5751_v55  ;;  %v825_v25 = vor.u32 %v824_v14, %v820_v10  ;;  %v6478_v27 = vpack.c.b16 %v653_v16, %v615_v15  ;;  %v458_v32 = vld [vmem:[%s6405_s9 + $0x1c] sm:$0x1]  ;;  %v5739_v35 = vld [vmem:[%s8827_s1 + $0x8] sm:$0xff]  ;;  %v6033_v39 = vor.u32 %v6032_v30, %v6031_v29  ;;  %v618_v42 = vunpack.c.l.b16 %v6489_v31  ;;  %v6513_v44 = vld [vmem:[%s6405_s9 + $0x10] sm:$0xff]  }
  0x62   : > { %2700 = vmatpush.bf16.msra.mxu2 %v6403_v56  ;;  %v812_v13 = vshll.u32 %v6439_v8, 16  ;;  %v827_v19 = vshll.u32 %v6443_v9, 16  ;;  %v816_v21 = vshrl.u32 %v6439_v8, 16  ;;  %v5747_v36 = vld [vmem:[%s8827_s1 + $0x48] sm:$0xff]  ;;  %v689_v37 = vrot.slane %v687_v24, 1  ;;  %v5738_v48 = vld [vmem:[%s8827_s1] sm:$0xff] }
  0x63   : > { %v692_v40 = vshll.u32 %v6478_v27, 16  ;;  %v6509_v41 = vld [vmem:[%s8827_s1 + $0x88] sm:$0xff]  ;;  %v654_v43 = vunpack.c.l.b16 %v458_v32  ;;  %v468_v45 = vld [vmem:[%s6405_s9 + $0x10] sm:$0xe]  ;;  %v5746_v49 = vld [vmem:[%s8827_s1 + $0x40] sm:$0xff]  ;;  %v865_v51 = vrot.slane %v6033_v39, 1  ;;  %v5888_v32 = vunpack.c.l.b16 %v6513_v44 }
  0x64   : > { %2533 = vmatpush.bf16.msra.mxu0 %v5742_v62  ;;  %v6464_v20 = vrot.slane %v812_v13, 1  ;;  %v6474_v26 = vrot.slane %v827_v19, 1  ;;  %v866_v52 = vrot.slane %v6478_v27, 1  ;;  %v690_v54 = vor.u32 %v689_v37, %v685_v33  ;;  %v6528_v60 = vld [vmem:[%s8827_s1 + $0x80] sm:$0xff]  ;;  %v5777_v3 = vld [vmem:[%s8827_s1 + $0x138] sm:$0xff]  ;;  %v5776_v16 = vld [vmem:[%s8827_s1 + $0x130] sm:$0xff] }
  0x65   : > { %6079 = vmatpush.bf16.msra.mxu3 %v5750_v63  ;;  %2617 = vmatpush.bf16.msra.mxu1 %v5750_v63  ;;  %v694_v55 = vrot.slane %v692_v40, 1  ;;  %v5889_v62 = vunpack.c.h.b16 %v6513_v44  ;;  %v6533_v63 = vpack.c.b16 %v654_v43, %v618_v42  ;;  %v845_v0 = vunpack.c.l.b16 %v468_v45 }
  0x66   : > { %2701 = vmatpush.bf16.msra.mxu2 %v6431_v4  ;;  %v818_v34 = vor.u32 %v816_v21, %v6464_v20  ;;  %v6502_v38 = vsel %vm683_vm0, %v825_v25, %v6474_v26  ;;  %v702_v2 = vshll.u32 %v6513_v44, 16  ;;  %v867_v7 = vsel %vm864_vm1, %v865_v51, %v866_v52  ;;  %v5769_v51 = vld [vmem:[%s8827_s1 + $0xf8] sm:$0xff] }
  0x67   : > { %v1677_v47 = vunpack.c.l.b16 %v6502_v38  ;;  %v695_v10 = vsel %vm683_vm0, %v690_v54, %v694_v55  ;;  %v707_v14 = vshll.u32 %v6533_v63, 16  ;;  %v831_v19 = vshrl.u32 %v6443_v9, 16 }
  0x68   : > { %2534 = vmatpush.bf16.msra.mxu0 %v5741_v11  ;;  %v1671_v46 = vunpack.c.l.b16 %v818_v34  ;;  %v855_v11 = vpack.c.b16 %v5889_v62, %v845_v0  ;;  %v704_v13 = vrot.slane %v702_v2, 1  ;;  %v696_v21 = vshrl.u32 %v6478_v27, 16  ;;  %v476_v27 = vld [vmem:[%s6405_s9 + $0x90] sm:$0xe]  ;;  %v459_v0 = vld [vmem:[%s6405_s9 + $0x2c] sm:$0x1] }
  0x69   : > { %6080 = vmatpush.bf16.msra.mxu3 %v5749_v12  ;;  %2618 = vmatpush.bf16.msra.mxu1 %v5749_v12  ;;  %v700_v12 = vshrl.u32 %v6513_v44, 16  ;;  %v833_v25 = vor.u32 %v831_v19, %v6474_v26  ;;  %v1683_v33 = vunpack.c.h.b16 %v6502_v38  ;;  %v5921_v26 = vunpack.c.h.b16 %v6411_v58 }
  0x6a   : > { %2702 = vmatpush.bf16.msra.mxu2 %v6458_v17  ;;  %v1946_v5 = vpack.c.b16 %v1677_v47, %v1671_v46  ;;  %v853_v39 = vunpack.c.l.b16 %v476_v27  ;;  %v1849_v40 = vpack.c.b16 %v5888_v32, %v615_v15  ;;  %v893_v47 = vrot.slane %v6443_v9, 1 }
  0x6b   : > { %v6554_v24 = vor.u32 %v704_v13, %v700_v12  ;;  %v1689_v34 = vunpack.c.l.b16 %v833_v25  ;;  %v890_v6 = vrot.slane %v6439_v8, 1  ;;  %v6034_v12 = vld [vmem:[%s6405_s9 + $0x20] sm:$0xf0]  ;;  %v6035_v13 = vld [vmem:[%s6405_s9 + $0x20] sm:$0xe]  ;;  %v5781_v8 = vld [vmem:[%s8827_s1 + $0x158] sm:$0xff] }
  0x6c   : > { %2535 = vmatpush.bf16.msra.mxu0 %v5740_v22  ;;  %v868_v22 = vrot.slane %v855_v11, 1  ;;  %v863_v46 = vpack.c.b16 %v5921_v26, %v853_v39  ;;  %v6600_v11 = vld [vmem:[%s6405_s9 + $0x20] sm:$0xff]   ;;  %v1690_v32 = vunpack.c.l.b16 %v893_v47 }
  0x6d   : > { %6081 = vmatpush.bf16.msra.mxu3 %v5748_v23  ;;  %2619 = vmatpush.bf16.msra.mxu1 %v5748_v23  ;;  %v869_v23 = vrot.slane %v6533_v63, 1  ;;  %v1955_v43 = vpack.c.b16 %v1689_v34, %v1683_v33  ;;  %v1672_v9 = vunpack.c.l.b16 %v890_v6  ;;  %v717_v31 = vshll.u32 %v6600_v11, 16 }
  0x6e   : > { %2703 = vmatpush.bf16.msra.mxu2 %v6484_v28  ;;  %v892_v38 = vrot.slane %v863_v46, 1  ;;  %v715_v19 = vshrl.u32 %v6600_v11, 16 }
  0x6f   : > { %v870_v29 = vsel %vm864_vm1, %v868_v22, %v869_v23  ;;  %v6036_v22 = vor.u32 %v6035_v13, %v6034_v12 }
  0x70   : > { %2536 = vmatpush.bf16.msra.mxu0 %v5739_v35  ;;  %v1528_v35 = vunpack.c.l.b16 %v866_v52  ;;  %v894_v15 = vsel %vm864_vm1, %v892_v38, %v893_v47  ;;  %v1546_v52 = vunpack.c.l.b16 %v869_v23  ;;  %v5764_v38 = vld [vmem:[%s8827_s1 + $0xd0] sm:$0xff] }
  0x71   : > { %6082 = vmatpush.bf16.msra.mxu3 %v5747_v36  ;;  %2620 = vmatpush.bf16.msra.mxu1 %v5747_v36  ;;  %v1684_v27 = vunpack.c.h.b16 %v894_v15  ;;  %v871_v33 = vrot.slane %v6036_v22, 1 }
  0x72   : > { %2704 = vmatpush.bf16.msra.mxu2 %v6509_v41 }
  0x74   : > { %2537 = vmatpush.bf16.msra.mxu0 %v5738_v48 }
  0x75   : > { %6083 = vmatpush.bf16.msra.mxu3 %v5746_v49  ;;  %2621 = vmatpush.bf16.msra.mxu1 %v5746_v49  ;;  %v1678_v49 = vunpack.c.l.b16 %v894_v15 }
  0x76   : > { %2705 = vmatpush.bf16.msra.mxu2 %v6528_v60 }
  0x77   : > { %2538 = vmatmul.bf16.vlgmr.msra.gmra.mxu0 %v6461_v18  ;;  %v698_v18 = vor.u32 %v696_v21, %v694_v55  ;;  %v1947_v2 = vpack.c.b16 %v1678_v49, %v1672_v9  ;;  %v719_v21 = vrot.slane %v717_v31, 1  ;;  %v5774_v9 = vld [vmem:[%s8827_s1 + $0x120] sm:$0xff]  ;;  %v5763_v49 = vld [vmem:[%s8827_s1 + $0xc8] sm:$0xff] }
  0x78   : > { %2866 = vmatpush.bf16.msrb.mxu0 %v5777_v3  ;;  %2687 = vmatmul.bf16.vlgmr.msra.gmra.mxu3 %v1946_v5 }
  0x79   : > { %6084 = vmatpush.bf16.msrb.mxu3 %v6378_v50  ;;  %2706 = vmatmul.bf16.vlgmr.msra.gmra.mxu2 %v867_v7  ;;  %v709_v50 = vrot.slane %v707_v14, 1  ;;  %v1527_v36 = vunpack.c.l.b16 %v698_v18  ;;  %v6611_v14 = vld [vmem:[%s6405_s9 + $0x38] sm:$0xf] }
  0x7a   : > { %2622 = vmatmul.bf16.vlgmr.msra.gmra.mxu1 %v695_v10  ;;  %v655_v10 = vunpack.c.l.b16 %v459_v0  ;;  %v624_v25 = vunpack.c.l.b16 %v6611_v14  ;;  %v5762_v0 = vld [vmem:[%s8827_s1 + $0xc0] sm:$0xff] }
  0x7b   : > { %v710_v30 = vsel %vm683_vm0, %v6554_v24, %v709_v50 }
  0x7c   : > { %2867 = vmatpush.bf16.msrb.mxu0 %v5776_v16  ;;  %v1533_v37 = vunpack.c.l.b16 %v710_v30  ;;  %v1539_v54 = vunpack.c.h.b16 %v710_v30  ;;  %v460_v16 = vld [vmem:[%s6405_s9 + $0x3c] sm:$0x1]  ;;  %v470_v30 = vld [vmem:[%s6405_s9 + $0x30] sm:$0xe] }
  0x7d   : > { %6085 = vmatpush.bf16.msrb.mxu3 %v6391_v53  ;;  %v1534_v53 = vunpack.c.l.b16 %v870_v29  ;;  %v656_v18 = vunpack.c.l.b16 %v460_v16  ;;  %v6659_v16 = vld [vmem:[%s6405_s9 + $0x18] sm:$0xf] }
  0x7e   : > { %v927_v22 = vunpack.c.l.b16 %v6659_v16 }
  0x7f   : > { %v1851_v45 = vpack.c.b16 %v1534_v53, %v1528_v35  ;;  %v6623_v35 = vor.u32 %v719_v21, %v715_v19  ;;  %v5765_v53 = vld [vmem:[%s8827_s1 + $0xd8] sm:$0xff]  ;;  %v670_v39 = vpack.c.b16 %v656_v18, %v624_v25  ;;  %v5928_v21 = vunpack.c.l.b16 %v6600_v11  ;;  %v6664_v18 = vld [vmem:[%s6405_s9 + $0x48] sm:$0xf] }
  0x81   : > { %6086 = vmatpush.bf16.msrb.mxu3 %v6403_v56  ;;  %v1850_v56 = vpack.c.b16 %v1533_v37, %v1527_v36  ;;  %v741_v13 = vshrl.u32 %v670_v39, 16 }
  0x85   : > { %6087 = vmatpush.bf16.msrb.mxu3 %v6431_v4  ;;  %v711_v4 = vshrl.u32 %v6533_v63, 16  ;;  %v6587_v63 = vld [vmem:[%s6405_s9 + $0x28] sm:$0xf] }
  0x86   : > { %v621_v7 = vunpack.c.l.b16 %v6587_v63 }
  0x87   : > { %2543 = vmatmul.bf16.gmra.mxu0 %v1849_v40  ;;  %v713_v48 = vor.u32 %v711_v4, %v709_v50  ;;  %v5766_v50 = vld [vmem:[%s8827_s1 + $0xe0] sm:$0xff]  ;;  %v847_v40 = vunpack.c.l.b16 %v470_v30  ;;  %v461_v30 = vld [vmem:[%s6405_s9 + $0x4c] sm:$0x1] }
  0x88   : > { %2692 = vmatmul.bf16.gmra.mxu3 %v1955_v43 }
  0x89   : > { %6088 = vmatpush.bf16.msrb.mxu3 %v6458_v17  ;;  %2711 = vmatmul.bf16.gmra.mxu2 %v1851_v45  ;;  %v5775_v17 = vld [vmem:[%s8827_s1 + $0x128] sm:$0xff]  ;;  %v1545_v55 = vunpack.c.l.b16 %v713_v48  ;;  %v1956_v45 = vpack.c.b16 %v1690_v32, %v1684_v27  ;;  %v737_v48 = vshll.u32 %v670_v39, 16  ;;  %v1852_v27 = vpack.c.b16 %v5928_v21, %v927_v22 }
  0x8a   : > { %2627 = vmatmul.bf16.gmra.mxu1 %v1850_v56  ;;  %2868 = vmatpush.bf16.msrb.mxu0 %v5775_v17 }
  0x8b   : > { %v1859_v5 = vpack.c.b16 %v1545_v55, %v1539_v54  ;;  %v739_v54 = vrot.slane %v737_v48, 1 }
  0x8d   : > { %6089 = vmatpush.bf16.msrb.mxu3 %v6484_v28  ;;  %v1540_v28 = vunpack.c.h.b16 %v870_v29  ;;  %v6620_v29 = vld [vmem:[%s6405_s9 + $0x30] sm:$0xff]   ;;  %v743_v19 = vor.u32 %v741_v13, %v739_v54 }
  0x8e   : > { %v5897_v37 = vunpack.c.h.b16 %v6620_v29  ;;  %v732_v43 = vshll.u32 %v6620_v29, 16  ;;  %v730_v4 = vshrl.u32 %v6620_v29, 16  ;;  %2869 = vmatpush.bf16.msrb.mxu0 %v5774_v9  ;;  %v472_v9 = vld [vmem:[%s6405_s9 + $0x50] sm:$0xe] }
  0x8f   : > { %v1860_v3 = vpack.c.b16 %v1546_v52, %v1540_v28  ;;  %v875_v28 = vrot.slane %v670_v39, 1  ;;  %v6037_v39 = vld [vmem:[%s6405_s9 + $0x40] sm:$0xf0] }
  0x90   : > { %v857_v47 = vpack.c.b16 %v5897_v37, %v847_v40  ;;  %v734_v15 = vrot.slane %v732_v43, 1  ;;  %v6038_v40 = vld [vmem:[%s6405_s9 + $0x40] sm:$0xe]  ;;  %v6682_v43 = vld [vmem:[%s6405_s9 + $0x58] sm:$0xf] }
  0x91   : > { %6090 = vmatpush.bf16.msrb.mxu3 %v6509_v41  ;;  %v1858_v41 = vpack.c.b16 %v618_v42, %v5889_v62  ;;  %v668_v42 = vpack.c.b16 %v655_v10, %v621_v7  ;;  %v5767_v62 = vld [vmem:[%s8827_s1 + $0xe8] sm:$0xff] }
  0x92   : > { %v6646_v52 = vor.u32 %v734_v15, %v730_v4  ;;  %v630_v15 = vunpack.c.l.b16 %v6682_v43 }
  0x93   : > { %v722_v23 = vshll.u32 %v668_v42, 16  ;;  %v872_v34 = vrot.slane %v668_v42, 1  ;;  %v726_v17 = vshrl.u32 %v668_v42, 16 }
  0x95   : > { %6091 = vmatpush.bf16.msrb.mxu3 %v6528_v60  ;;  %v5768_v60 = vld [vmem:[%s8827_s1 + $0xf0] sm:$0xff]  ;;  %v724_v36 = vrot.slane %v722_v23, 1  ;;  %v873_v56 = vsel %vm864_vm1, %v871_v33, %v872_v34 }
  0x97   : > { %2548 = vmatmul.bf16.gmra.mxu0 %v1858_v41  ;;  %v725_v46 = vsel %vm683_vm0, %v6623_v35, %v724_v36  ;;  %v728_v55 = vor.u32 %v726_v17, %v724_v36  ;;  %v657_v36 = vunpack.c.l.b16 %v461_v30  ;;  %v6691_v17 = vld [vmem:[%s6405_s9 + $0x50] sm:$0xff]  }
  0x98   : > { %2771 = vmatmul.bf16.vlgmr.msrb.gmra.mxu3 %v1947_v2  ;;  %v740_v2 = vsel %vm683_vm0, %v6646_v52, %v739_v54 }
  0x99   : > { %2782 = vmatpush.bf16.msra.mxu3 %v5769_v51  ;;  %2716 = vmatmul.bf16.gmra.mxu2 %v1860_v3  ;;  %v874_v51 = vrot.slane %v857_v47, 1  ;;  %v5896_v3 = vunpack.c.l.b16 %v6620_v29  ;;  %v1569_v31 = vunpack.c.l.b16 %v740_v2  ;;  %v1575_v23 = vunpack.c.h.b16 %v740_v2  ;;  %v6687_v47 = vld [vmem:[%s6405_s9 + $0x28] sm:$0xf] }
  0x9a   : > { %2632 = vmatmul.bf16.gmra.mxu1 %v1859_v5  ;;  %v1564_v5 = vunpack.c.l.b16 %v872_v34  ;;  %v627_v34 = vunpack.c.l.b16 %v6664_v18 }
  0x9b   : > { %v876_v41 = vsel %vm864_vm1, %v874_v51, %v875_v28  ;;  %v1873_v42 = vpack.c.b16 %v5896_v3, %v621_v7  ;;  %v1582_v7 = vunpack.c.l.b16 %v875_v28  ;;  %v930_v51 = vunpack.c.l.b16 %v6687_v47 }
  0x9c   : > { %v1570_v10 = vunpack.c.l.b16 %v876_v41  ;;  %v1576_v63 = vunpack.c.h.b16 %v876_v41  ;;  %v5905_v41 = vunpack.c.h.b16 %v6691_v17  ;;  %v849_v3 = vunpack.c.l.b16 %v472_v9  ;;  %v6730_v9 = vld [vmem:[%s6405_s9 + $0x68] sm:$0xf] }
  0x9d   : > { %2783 = vmatpush.bf16.msra.mxu3 %v5768_v60  ;;  %v1563_v60 = vunpack.c.l.b16 %v728_v55 }
  0x9e   : > { %v1884_v32 = vpack.c.b16 %v1582_v7, %v1576_v63 }
  0x9f   : > { %v1874_v12 = vpack.c.b16 %v1569_v31, %v1563_v60 }
  0xa1   : > { %2784 = vmatpush.bf16.msra.mxu3 %v5767_v62  ;;  %v1875_v62 = vpack.c.b16 %v1570_v10, %v1564_v5  ;;  %v762_v5 = vshll.u32 %v6691_v17, 16 }
  0xa5   : > { %2785 = vmatpush.bf16.msra.mxu3 %v5766_v50  ;;  %v1581_v50 = vunpack.c.l.b16 %v743_v19 }
  0xa7   : > { %2553 = vmatmul.bf16.gmra.mxu0 %v6600_v11  ;;  %v1883_v33 = vpack.c.b16 %v1581_v50, %v1575_v23 }
  0xa8   : > { %2776 = vmatmul.bf16.gmra.mxu3 %v1956_v45  ;;  %v462_v45 = vld [vmem:[%s6405_s9 + $0x5c] sm:$0x1] }
  0xa9   : > { %2786 = vmatpush.bf16.msra.mxu3 %v5765_v53  ;;  %2721 = vmatmul.bf16.gmra.mxu2 %v873_v56  ;;  %v6673_v53 = vld [vmem:[%s6405_s9 + $0x40] sm:$0xff]   ;;  %v658_v48 = vunpack.c.l.b16 %v462_v45  ;;  %v5772_v45 = vld [vmem:[%s8827_s1 + $0x110] sm:$0xff] }
  0xaa   : > { %2637 = vmatmul.bf16.gmra.mxu1 %v725_v46  ;;  %v747_v14 = vshll.u32 %v6673_v53, 16  ;;  %v745_v56 = vshrl.u32 %v6673_v53, 16 }
  0xab   : > { %v674_v2 = vpack.c.b16 %v658_v48, %v630_v15  ;;  %v6727_v48 = vld [vmem:[%s8828_s2] ss:$0 sm:$0xff] }
  0xac   : > { %v749_v46 = vrot.slane %v747_v14, 1 }
  0xad   : > { %2787 = vmatpush.bf16.msra.mxu3 %v5764_v38  ;;  %v6039_v38 = vor.u32 %v6038_v40, %v6037_v39  ;;  %v767_v13 = vshll.u32 %v674_v2, 16  ;;  %v881_v63 = vrot.slane %v674_v2, 1  ;;  %v771_v39 = vshrl.u32 %v674_v2, 16  ;;  %v6717_v40 = vld [vmem:[%s6405_s9 + $0x38] sm:$0xf] }
  0xae   : > { %v6696_v55 = vor.u32 %v749_v46, %v745_v56  ;;  %v5936_v56 = vunpack.c.l.b16 %v6673_v53 }
  0xaf   : > { %v877_v28 = vrot.slane %v6039_v38, 1  ;;  %v769_v23 = vrot.slane %v767_v13, 1  ;;  %v1618_v38 = vunpack.c.l.b16 %v881_v63  ;;  %v6041_v13 = vld [vmem:[%s6405_s9 + $0x60] sm:$0xe] }
  0xb1   : > { %2788 = vmatpush.bf16.msra.mxu3 %v5763_v49  ;;  %v5929_v49 = vunpack.c.h.b16 %v6600_v11  ;;  %v773_v43 = vor.u32 %v771_v39, %v769_v23  ;;  %v474_v39 = vld [vmem:[%s6405_s9 + $0x70] sm:$0xe] }
  0xb3   : > { %v1861_v10 = vpack.c.b16 %v930_v51, %v5929_v49 }
  0xb5   : > { %2789 = vmatpush.bf16.msra.mxu3 %v5762_v0 }
  0xb7   : > { %2558 = vmatmul.bf16.gmra.mxu0 %v1873_v42  ;;  %v859_v42 = vpack.c.b16 %v5905_v41, %v849_v3 }
  0xb8   : > { %2790 = vmatmul.bf16.vlgmr.msra.gmra.mxu3 %v6513_v44  ;;  %v1882_v44 = vpack.c.b16 %v624_v25, %v5897_v37  ;;  %v672_v25 = vpack.c.b16 %v657_v36, %v627_v34  ;;  %v5773_v37 = vld [vmem:[%s8827_s1 + $0x118] sm:$0xff] }
  0xb9   : > { %2726 = vmatmul.bf16.gmra.mxu2 %v1875_v62  ;;  %2870 = vmatpush.bf16.msrb.mxu0 %v5773_v37  ;;  %v760_v62 = vshrl.u32 %v6691_v17, 16  ;;  %v880_v21 = vrot.slane %v859_v42, 1 }
  0xba   : > { %2642 = vmatmul.bf16.gmra.mxu1 %v1874_v12  ;;  %v752_v4 = vshll.u32 %v672_v25, 16  ;;  %v878_v54 = vrot.slane %v672_v25, 1  ;;  %v764_v12 = vrot.slane %v762_v5, 1  ;;  %v756_v19 = vshrl.u32 %v672_v25, 16 }
  0xbb   : > { %v882_v18 = vsel %vm864_vm1, %v880_v21, %v881_v63  ;;  %v6750_v63 = vld [vmem:[%s6405_s9 + $0x78] sm:$0xf] }
  0xbc   : > { %v754_v0 = vrot.slane %v752_v4, 1  ;;  %v879_v60 = vsel %vm864_vm1, %v877_v28, %v878_v54  ;;  %v6709_v7 = vor.u32 %v764_v12, %v760_v62  ;;  %v1612_v46 = vunpack.c.h.b16 %v882_v18  ;;  %v463_v28 = vld [vmem:[%s6405_s9 + $0x6c] sm:$0x1]  ;;  %v6738_v62 = vld [vmem:[%s6405_s9 + $0x60] sm:$0xff]  }
  0xbd   : > { %2871 = vmatpush.bf16.msrb.mxu0 %v5772_v45  ;;  %v1617_v4 = vunpack.c.l.b16 %v773_v43  ;;  %v636_v43 = vunpack.c.l.b16 %v6750_v63 }
  0xbe   : > { %v755_v31 = vsel %vm683_vm0, %v6696_v55, %v754_v0  ;;  %v758_v50 = vor.u32 %v756_v19, %v754_v0  ;;  %v770_v30 = vsel %vm683_vm0, %v6709_v7, %v769_v23  ;;  %v1908_v3 = vpack.c.b16 %v1618_v38, %v1612_v46  ;;  %v464_v23 = vld [vmem:[%s6405_s9 + $0x7c] sm:$0x1] }
  0xbf   : > { %v1605_v36 = vunpack.c.l.b16 %v770_v30  ;;  %v660_v45 = vunpack.c.l.b16 %v464_v23 }
  0xc7   : > { %2563 = vmatmul.bf16.gmra.mxu0 %v1882_v44  ;;  %v5904_v44 = vunpack.c.l.b16 %v6691_v17 }
  0xc8   : > { %2795 = vmatmul.bf16.gmra.mxu3 %v1852_v27  ;;  %v1600_v27 = vunpack.c.l.b16 %v878_v54  ;;  %v1906_v54 = vpack.c.b16 %v630_v15, %v5905_v41  ;;  %v777_v15 = vshll.u32 %v6738_v62, 16  ;;  %v6040_v41 = vld [vmem:[%s6405_s9 + $0x60] sm:$0xf0] }
  0xc9   : > { %2731 = vmatmul.bf16.gmra.mxu2 %v1884_v32  ;;  %v1606_v32 = vunpack.c.l.b16 %v882_v18  ;;  %v1897_v14 = vpack.c.b16 %v5904_v44, %v627_v34  ;;  %v8838_v34 = vunpack.c.l.b16 %v6717_v40  ;;  %v6042_v18 = vor.u32 %v6041_v13, %v6040_v41 }
  0xca   : > { %2647 = vmatmul.bf16.gmra.mxu1 %v1883_v33  ;;  %v1599_v33 = vunpack.c.l.b16 %v758_v50 }
  0xcb   : > { %v1899_v25 = vpack.c.b16 %v1606_v32, %v1600_v27  ;;  %v1876_v0 = vpack.c.b16 %v5936_v56, %v8838_v34  ;;  %v775_v27 = vshrl.u32 %v6738_v62, 16  ;;  %v779_v32 = vrot.slane %v777_v15, 1 }
  0xcc   : > { %v1898_v37 = vpack.c.b16 %v1605_v36, %v1599_v33  ;;  %v6757_v33 = vld [vmem:[%s6405_s9 + $0x48] sm:$0xf]  ;;  %v8833_v56 = vunpack.c.h.b16 %v6673_v53  ;;  %v883_v38 = vrot.slane %v6042_v18, 1 }
  0xd7   : > { %2568 = vmatmul.bf16.gmra.mxu0 %v6673_v53 }
  0xd8   : > { %2800 = vmatmul.bf16.gmra.mxu3 %v1861_v10  ;;  %v633_v10 = vunpack.c.l.b16 %v6730_v9 }
  0xd9   : > { %2736 = vmatmul.bf16.gmra.mxu2 %v879_v60  ;;  %v659_v60 = vunpack.c.l.b16 %v463_v28  ;;  %v6769_v28 = vor.u32 %v779_v32, %v775_v27 }
  0xda   : > { %2652 = vmatmul.bf16.gmra.mxu1 %v755_v31 }
  0xdb   : > { %v6745_v19 = vpack.c.b16 %v659_v60, %v633_v10 }
  0xdd   : > { %v782_v36 = vshll.u32 %v6745_v19, 16 }
  0xe7   : > { %2573 = vmatmul.bf16.gmra.mxu0 %v1897_v14 }
  0xe8   : > { %2805 = vmatmul.bf16.gmra.mxu3 %v6620_v29  ;;  %v1611_v29 = vunpack.c.h.b16 %v770_v30 }
  0xe9   : > { %2741 = vmatmul.bf16.gmra.mxu2 %v1899_v25 }
  0xea   : > { %2657 = vmatmul.bf16.gmra.mxu1 %v1898_v37  ;;  %v1907_v5 = vpack.c.b16 %v1617_v4, %v1611_v29  ;;  %v6762_v37 = vld [vmem:[%s6405_s9 + $0x70] sm:$0xff]   ;;  %v884_v29 = vrot.slane %v6745_v19, 1  ;;  %v8834_v4 = vunpack.c.l.b16 %v6757_v33 }
  0xec   : > { %v885_v41 = vsel %vm864_vm1, %v883_v38, %v884_v29 }
  0xf4   : > { %v2539_v2 = vpop.f32.mrf.mxu0 }
  0xf5   : > { %v2540_v31 = vadd.f32 %v6727_v48, %v2539_v2  ;;  %v851_v2 = vunpack.c.l.b16 %v474_v39 }
  0xf7   : > { %v2623_v42 = vpop.f32.mrf.mxu1  ;;  %2578 = vmatmul.bf16.gmra.mxu0 %v1906_v54  ;;  %v784_v54 = vrot.slane %v782_v36, 1 }
  0xf8   : > { %v2624_v12 = vadd.f32 %v2623_v42, %v2540_v31  ;;  %2810 = vmatmul.bf16.gmra.mxu3 %v1876_v0  ;;  %v5913_v0 = vunpack.c.h.b16 %v6762_v37  ;;  %v1885_v42 = vpack.c.b16 %v8834_v4, %v8833_v56 }
  0xf9   : > { %2746 = vmatmul.bf16.gmra.mxu2 %v1908_v3  ;;  %v6774_v3 = vpack.c.b16 %v660_v45, %v636_v43  ;;  %v785_v13 = vsel %vm683_vm0, %v6769_v28, %v784_v54 }
  0xfa   : > { %2662 = vmatmul.bf16.gmra.mxu1 %v1907_v5  ;;  %v792_v5 = vshll.u32 %v6762_v37, 16  ;;  %v861_v23 = vpack.c.b16 %v5913_v0, %v851_v2 }
  0xfb   : > { %v6747_v21 = vpop.f32.mrf.mxu3  ;;  %v797_v32 = vshll.u32 %v6774_v3, 16  ;;  %v887_v39 = vrot.slane %v6774_v3, 1 }
  0xfc   : > { %v2707_v50 = vpop.f32.mrf.mxu2  ;;  %v2541_v44 = vpop.f32.mrf.mxu0  ;;  %v794_v27 = vrot.slane %v792_v5, 1 }
  0xfd   : > { %v6753_v30 = vadd.f32 %v2707_v50, %v2624_v12  ;;  %v2542_v14 = vadd.f32 %v6727_v48, %v2541_v44  ;;  %v790_v44 = vshrl.u32 %v6762_v37, 16 }
  0xff   : > { %v2625_v25 = vpop.f32.mrf.mxu1  ;;  %v6796_v45 = vor.u32 %v794_v27, %v790_v44  ;;  %v1636_v44 = vunpack.c.l.b16 %v884_v29  ;;  %v801_v29 = vshrl.u32 %v6774_v3, 16 }
 0x100   : > { %v2626_v46 = vadd.f32 %v2625_v25, %v2542_v14  ;;  %v786_v14 = vshrl.u32 %v6745_v19, 16  ;;  %v886_v25 = vrot.slane %v861_v23, 1 }
 0x103   : > { %v6777_v60 = vpop.f32.mrf.mxu3 }
 0x104   : > { %v2709_v31 = vpop.f32.mrf.mxu2  ;;  %v2544_v15 = vpop.f32.mrf.mxu0 }
 0x105   : > { %v6783_v12 = vadd.f32 %v2709_v31, %v2626_v46  ;;  %v2545_v50 = vadd.f32 %v6727_v48, %v2544_v15  ;;  %v799_v46 = vrot.slane %v797_v32, 1  ;;  %v788_v15 = vor.u32 %v786_v14, %v784_v54 }
 0x107   : > { %v2628_v18 = vpop.f32.mrf.mxu1  ;;  %2583 = vmatmul.bf16.gmra.mxu0 %v6738_v62  ;;  %v800_v23 = vsel %vm683_vm0, %v6796_v45, %v799_v46  ;;  %v1635_v32 = vunpack.c.l.b16 %v788_v15 }
 0x108   : > { %v2629_v36 = vadd.f32 %v2628_v18, %v2545_v50  ;;  %2815 = vmatmul.bf16.gmra.mxu3 %v1885_v42  ;;  %v5771_v42 = vld [vmem:[%s8827_s1 + $0x108] sm:$0xff]  ;;  %v5912_v18 = vunpack.c.l.b16 %v6762_v37  ;;  %v1641_v54 = vunpack.c.l.b16 %v800_v23  ;;  %v1647_v3 = vunpack.c.h.b16 %v800_v23  ;;  %v5793_v23 = vld [vmem:[%s8827_s1 + $0x1b8] sm:$0xff] }
 0x109   : > { %2751 = vmatmul.bf16.gmra.mxu2 %v885_v41  ;;  %2872 = vmatpush.bf16.msrb.mxu0 %v5771_v42 }
 0x10a   : > { %2667 = vmatmul.bf16.gmra.mxu1 %v785_v13  ;;  %v888_v13 = vsel %vm864_vm1, %v886_v25, %v887_v39  ;;  %v1922_v4 = vpack.c.b16 %v1641_v54, %v1635_v32  ;;  %3034 = vmatpush.bf16.msrb.mxu2 %v5793_v23 }
 0x10b   : > { %v6798_v38 = vpop.f32.mrf.mxu3  ;;  %v1642_v27 = vunpack.c.l.b16 %v888_v13 }
 0x10c   : > { %8864 = vst [vmem:[#allocation7_spill] sm:$0xff] %v6798_v38  ;;  %v2712_v2 = vpop.f32.mrf.mxu2  ;;  %v2546_v31 = vpop.f32.mrf.mxu0 }
 0x10d   : > { %v6800_v5 = vadd.f32 %v2712_v2, %v2629_v36  ;;  %v2547_v41 = vadd.f32 %v6727_v48, %v2546_v31  ;;  %v1921_v2 = vpack.c.b16 %v5912_v18, %v633_v10  ;;  %v1923_v56 = vpack.c.b16 %v1642_v27, %v1636_v44  ;;  %v6824_v18 = vld [vmem:[%s6405_s9 + $0x58] sm:$0xf] }
 0x10e   : > { %v803_v44 = vor.u32 %v801_v29, %v799_v46  ;;  %v1930_v46 = vpack.c.b16 %v636_v43, %v5913_v0  ;;  %v5770_v43 = vld [vmem:[%s8827_s1 + $0x100] sm:$0xff] }
 0x10f   : > { %v2630_v19 = vpop.f32.mrf.mxu1  ;;  %2873 = vmatpush.bf16.msrb.mxu0 %v5770_v43 }
 0x110   : > { %v2631_v50 = vadd.f32 %v2630_v19, %v2547_v41 }
 0x113   : > { %v6810_v36 = vpop.f32.mrf.mxu3 }
 0x114   : > { %8865 = vst [vmem:[#allocation8_spill] sm:$0xff] %v6810_v36  ;;  %v2714_v14 = vpop.f32.mrf.mxu2  ;;  %v2549_v25 = vpop.f32.mrf.mxu0 }
 0x115   : > { %v6814_v31 = vadd.f32 %v2714_v14, %v2631_v50  ;;  %v2550_v42 = vadd.f32 %v6727_v48, %v2549_v25  ;;  %v5944_v14 = vunpack.c.l.b16 %v6738_v62 }
 0x117   : > { %v2633_v41 = vpop.f32.mrf.mxu1  ;;  %2588 = vmatmul.bf16.gmra.mxu0 %v1921_v2  ;;  %v1653_v2 = vunpack.c.l.b16 %v803_v44  ;;  %v6844_v44 = vld [vmem:[%s6405_s9 + $0x80] sm:$0xff]  }
 0x118   : > { %v2634_v19 = vadd.f32 %v2633_v41, %v2550_v42  ;;  %2820 = vmatmul.bf16.gmra.mxu3 %v6691_v17  ;;  %v8837_v17 = vunpack.c.l.b16 %v6824_v18  ;;  %v807_v0 = vshll.u32 %v6844_v44, 16 }
 0x119   : > { %2756 = vmatmul.bf16.gmra.mxu2 %v1923_v56  ;;  %v1648_v56 = vunpack.c.h.b16 %v888_v13 }
 0x11a   : > { %2672 = vmatmul.bf16.gmra.mxu1 %v1922_v4  ;;  %v1654_v4 = vunpack.c.l.b16 %v887_v39  ;;  %v1900_v41 = vpack.c.b16 %v5944_v14, %v8837_v17  ;;  %v6043_v14 = vld [vmem:[%s6405_s9 + $0x80] sm:$0xf0] }
 0x11b   : > { %v6819_v15 = vpop.f32.mrf.mxu3 }
 0x11c   : > { %v2717_v9 = vpop.f32.mrf.mxu2  ;;  %v2551_v50 = vpop.f32.mrf.mxu0 }
 0x11d   : > { %v6821_v10 = vadd.f32 %v2717_v9, %v2634_v19  ;;  %v2552_v27 = vadd.f32 %v6727_v48, %v2551_v50  ;;  %v1932_v9 = vpack.c.b16 %v1654_v4, %v1648_v56  ;;  %v1931_v50 = vpack.c.b16 %v1653_v2, %v1647_v3  ;;  %v6044_v56 = vld [vmem:[%s6405_s9 + $0x80] sm:$0xe] }
 0x11f   : > { %v2635_v32 = vpop.f32.mrf.mxu1 }
 0x120   : > { %v2636_v54 = vadd.f32 %v2635_v32, %v2552_v27  ;;  %v5785_v27 = vld [vmem:[%s8827_s1 + $0x178] sm:$0xff]  ;;  %v5792_v32 = vld [vmem:[%s8827_s1 + $0x1b0] sm:$0xff] }
 0x121   : > { %2950 = vmatpush.bf16.msrb.mxu1 %v5785_v27  ;;  %3035 = vmatpush.bf16.msrb.mxu2 %v5792_v32  ;;  %v5790_v32 = vld [vmem:[%s8827_s1 + $0x1a0] sm:$0xff] }
 0x123   : > { %v6829_v25 = vpop.f32.mrf.mxu3 }
 0x124   : > { %8866 = vst [vmem:[#allocation9_spill] sm:$0xff] %v6829_v25  ;;  %v2719_v42 = vpop.f32.mrf.mxu2  ;;  %v2554_v29 = vpop.f32.mrf.mxu0 }
 0x125   : > { %v6837_v19 = vadd.f32 %v2719_v42, %v2636_v54  ;;  %v2555_v39 = vadd.f32 %v6727_v48, %v2554_v29  ;;  %v6863_v42 = vld [vmem:[%s6405_s9 + $0x68] sm:$0xf]  ;;  %v805_v29 = vshrl.u32 %v6844_v44, 16 }
 0x126   : > { %v8836_v43 = vunpack.c.l.b16 %v6863_v42 }
 0x127   : > { %v2638_v13 = vpop.f32.mrf.mxu1  ;;  %2593 = vmatmul.bf16.gmra.mxu0 %v1930_v46 }
 0x128   : > { %v2639_v63 = vadd.f32 %v2638_v13, %v2555_v39  ;;  %2825 = vmatmul.bf16.gmra.mxu3 %v1900_v41  ;;  %v5784_v39 = vld [vmem:[%s8827_s1 + $0x170] sm:$0xff]  ;;  %v5791_v13 = vld [vmem:[%s8827_s1 + $0x1a8] sm:$0xff] }
 0x129   : > { %2761 = vmatmul.bf16.gmra.mxu2 %v1932_v9  ;;  %v809_v9 = vrot.slane %v807_v0, 1  ;;  %2951 = vmatpush.bf16.msrb.mxu1 %v5784_v39  ;;  %v5783_v0 = vld [vmem:[%s8827_s1 + $0x168] sm:$0xff] }
 0x12a   : > { %2677 = vmatmul.bf16.gmra.mxu1 %v1931_v50  ;;  %v6045_v50 = vor.u32 %v6044_v56, %v6043_v14  ;;  %3036 = vmatpush.bf16.msrb.mxu2 %v5791_v13  ;;  %v5782_v13 = vld [vmem:[%s8827_s1 + $0x160] sm:$0xff] }
 0x12b   : > { %v6856_v54 = vpop.f32.mrf.mxu3  ;;  %v810_v27 = vor.u32 %v809_v9, %v805_v29 }
 0x12c   : > { %8867 = vst [vmem:[#allocation10_spill] sm:$0xff] %v6856_v54  ;;  %v2722_v4 = vpop.f32.mrf.mxu2  ;;  %v2556_v2 = vpop.f32.mrf.mxu0 }
 0x12d   : > { %v6860_v3 = vadd.f32 %v2722_v4, %v2639_v63  ;;  %v2557_v46 = vadd.f32 %v6727_v48, %v2556_v2  ;;  %v8835_v63 = vunpack.c.h.b16 %v6738_v62  ;;  %v889_v4 = vrot.slane %v6045_v50, 1  ;;  %2952 = vmatpush.bf16.msrb.mxu1 %v5783_v0 }
 0x12e   : > { %v815_v39 = vsel %vm683_vm0, %v810_v27, %v6464_v20  ;;  %3037 = vmatpush.bf16.msrb.mxu2 %v5790_v32  ;;  %v5788_v20 = vld [vmem:[%s8827_s1 + $0x190] sm:$0xff] }
 0x12f   : > { %v2640_v41 = vpop.f32.mrf.mxu1  ;;  %v1909_v2 = vpack.c.b16 %v8836_v43, %v8835_v63  ;;  %v891_v50 = vsel %vm864_vm1, %v889_v4, %v890_v6  ;;  %v6046_v63 = vld [vmem:[%s6405_s9 + $0x10] sm:$0xf0]  ;;  %v6047_v43 = vld [vmem:[%s6405_s9 + $0x10] sm:$0xe] }
 0x130   : > { %v2641_v23 = vadd.f32 %v2640_v41, %v2557_v46 }
 0x131   : > { %2953 = vmatpush.bf16.msrb.mxu1 %v5782_v13 }
 0x133   : > { %v6881_v14 = vpop.f32.mrf.mxu3 }
 0x134   : > { %8868 = vst [vmem:[#allocation11_spill] sm:$0xff] %v6881_v14  ;;  %v2724_v56 = vpop.f32.mrf.mxu2  ;;  %v2559_v41 = vpop.f32.mrf.mxu0 }
 0x135   : > { %v6887_v46 = vadd.f32 %v2724_v56, %v2641_v23  ;;  %v2560_v29 = vadd.f32 %v6727_v48, %v2559_v41  ;;  %v5789_v23 = vld [vmem:[%s8827_s1 + $0x198] sm:$0xff]  ;;  %2954 = vmatpush.bf16.msrb.mxu1 %v5781_v8  ;;  %v5779_v8 = vld [vmem:[%s8827_s1 + $0x148] sm:$0xff] }
 0x136   : > { %3038 = vmatpush.bf16.msrb.mxu2 %v5789_v23  ;;  %v5801_v23 = vld [vmem:[%s8827_s1 + $0x1f8] sm:$0xff] }
 0x137   : > { %v2643_v9 = vpop.f32.mrf.mxu1  ;;  %2598 = vmatmul.bf16.gmra.mxu0 %v6844_v44  ;;  %3118 = vmatpush.bf16.msrb.mxu3 %v5801_v23  ;;  %v6048_v23 = vor.u32 %v6047_v43, %v6046_v63 }
 0x138   : > { %v2644_v0 = vadd.f32 %v2643_v9, %v2560_v29  ;;  %2830 = vmatmul.bf16.gmra.mxu3 %v1909_v2  ;;  %v5780_v29 = vld [vmem:[%s8827_s1 + $0x150] sm:$0xff]  ;;  %v5787_v9 = vld [vmem:[%s8827_s1 + $0x188] sm:$0xff] }
 0x139   : > { %2766 = vmatmul.bf16.gmra.mxu2 %v891_v50  ;;  %v5083_v50 = vld [vmem:[%s6405_s9 + $0x1c] sm:$0x1]  ;;  %2955 = vmatpush.bf16.msrb.mxu1 %v5780_v29 }
 0x13a   : > { %2682 = vmatmul.bf16.gmra.mxu1 %v815_v39  ;;  %3039 = vmatpush.bf16.msrb.mxu2 %v5788_v20  ;;  %v5786_v20 = vld [vmem:[%s8827_s1 + $0x180] sm:$0xff] }
 0x13b   : > { %v2791_v6 = vpop.f32.mrf.mxu3 }
 0x13c   : > { %v2727_v27 = vpop.f32.mrf.mxu2  ;;  %v6909_v4 = vadd.f32 %v2791_v6, %v6753_v30  ;;  %v2561_v56 = vpop.f32.mrf.mxu0  ;;  %v6142_v30 = vld [vmem:[%s6405_s9 + $0x90] sm:$0xff]   ;;  %v965_v6 = vunpack.c.l.b16 %v5083_v50  ;;  %v6943_v50 = vld [vmem:[%s6405_s9 + $0x20] sm:$0xff]  }
 0x13d   : > { %v6911_v32 = vadd.f32 %v2727_v27, %v2644_v0  ;;  %v2562_v2 = vadd.f32 %v6727_v48, %v2561_v56  ;;  %v5920_v13 = vunpack.c.l.b16 %v6142_v30  ;;  %v5084_v0 = vld [vmem:[%s6405_s9 + $0x2c] sm:$0x1]  ;;  %2956 = vmatpush.bf16.msrb.mxu1 %v5779_v8  ;;  %v1175_v8 = vrot.slane %v6048_v23, 1 }
 0x13e   : > { %3040 = vmatpush.bf16.msrb.mxu2 %v5787_v9  ;;  %v966_v56 = vunpack.c.l.b16 %v5084_v0  ;;  %v976_v57 = vpack.c.b16 %v965_v6, %v927_v22  ;;  %v5809_v0 = vld [vmem:[%s8827_s1 + $0x238] sm:$0xff] }
 0x13f   : > { %v2645_v41 = vpop.f32.mrf.mxu1  ;;  %v1945_v29 = vpack.c.b16 %v5920_v13, %v639_v61  ;;  %v5094_v61 = vld [vmem:[%s6405_s9 + $0x20] sm:$0xe]  ;;  %3202 = vmatpush.bf16.msra.mxu0 %v5809_v0 }
 0x140   : > { %v2646_v39 = vadd.f32 %v2645_v41, %v2562_v2  ;;  %v1176_v63 = vrot.slane %v976_v57, 1  ;;  %v1156_v16 = vunpack.c.l.b16 %v5094_v61  ;;  %v1003_v6 = vshll.u32 %v976_v57, 16 }
 0x141   : > { %v1007_v61 = vshrl.u32 %v976_v57, 16  ;;  %v1954_v57 = vpack.c.b16 %v642_v1, %v5921_v26 }
 0x142   : > { %3041 = vmatpush.bf16.msrb.mxu2 %v5786_v20  ;;  %v1177_v47 = vsel %vm864_vm1, %v1175_v8, %v1176_v63  ;;  %v6968_v20 = vld [vmem:[%s6405_s9 + $0x78] sm:$0xf]  ;;  %v1005_v23 = vrot.slane %v1003_v6, 1  ;;  %v6979_v8 = vld [vmem:[%s6405_s9 + $0x28] sm:$0xf] }
 0x143   : > { %v2793_v27 = vpop.f32.mrf.mxu3 }
 0x144   : > { %v2729_v2 = vpop.f32.mrf.mxu2  ;;  %v6933_v41 = vadd.f32 %v2793_v27, %v6783_v12  ;;  %v2564_v30 = vpop.f32.mrf.mxu0  ;;  %v5778_v12 = vld [vmem:[%s8827_s1 + $0x140] sm:$0xff]  ;;  %v1166_v27 = vpack.c.b16 %v5929_v49, %v1156_v16  ;;  %v8840_v16 = vunpack.c.l.b16 %v6979_v8 }
 0x145   : > { %v6937_v9 = vadd.f32 %v2729_v2, %v2646_v39  ;;  %v2565_v17 = vadd.f32 %v6727_v48, %v2564_v30  ;;  %v6953_v39 = vpack.c.b16 %v966_v56, %v930_v51  ;;  %2957 = vmatpush.bf16.msrb.mxu1 %v5778_v12  ;;  %v8839_v12 = vunpack.c.l.b16 %v6968_v20 }
 0x147   : > { %v2648_v34 = vpop.f32.mrf.mxu1  ;;  %2603 = vmatmul.bf16.gmra.mxu0 %v1945_v29  ;;  %v1018_v51 = vshll.u32 %v6953_v39, 16  ;;  %v1179_v0 = vrot.slane %v6953_v39, 1 }
 0x148   : > { %v2649_v13 = vadd.f32 %v2648_v34, %v2565_v17  ;;  %2835 = vmatmul.bf16.gmra.mxu3 %v6762_v37 }
 0x149   : > { %3042 = vmatmul.bf16.vlgmr.msrb.gmra.mxu2 %v6943_v50  ;;  %v6973_v29 = vrot.slane %v1018_v51, 1 }
 0x14a   : > { %2958 = vmatmul.bf16.vlgmr.msrb.gmra.mxu1 %v1177_v47  ;;  %v1009_v47 = vor.u32 %v1007_v61, %v1005_v23  ;;  %v1530_v61 = vunpack.c.l.b16 %v1176_v63 }
 0x14b   : > { %v2796_v22 = vpop.f32.mrf.mxu3  ;;  %v6998_v6 = vsel %vm683_vm0, %v6623_v35, %v6973_v29 }
 0x14c   : > { %v2732_v34 = vpop.f32.mrf.mxu2  ;;  %v6963_v17 = vadd.f32 %v2796_v22, %v6800_v5  ;;  %v2566_v43 = vpop.f32.mrf.mxu0  ;;  %v5952_v5 = vunpack.c.l.b16 %v6844_v44  ;;  %v6982_v22 = vld [vmem:[%s6405_s9 + $0x30] sm:$0xff]   ;;  %v1535_v58 = vunpack.c.l.b16 %v6998_v6  ;;  %v1541_v14 = vunpack.c.h.b16 %v6998_v6 }
 0x14d   : > { %v6965_v37 = vadd.f32 %v2732_v34, %v2649_v13  ;;  %v2567_v56 = vadd.f32 %v6727_v48, %v2566_v43  ;;  %v1178_v13 = vrot.slane %v1166_v27, 1  ;;  %8869 = vst [vmem:[#allocation12_spill] sm:$0xff] %v6982_v22  ;;  %v5968_v49 = vunpack.c.l.b16 %v6982_v22 }
 0x14e   : > { %v1924_v43 = vpack.c.b16 %v5952_v5, %v8839_v12 }
 0x14f   : > { %v2650_v2 = vpop.f32.mrf.mxu1  ;;  %v1180_v26 = vsel %vm864_vm1, %v1178_v13, %v1179_v0 }
 0x150   : > { %v2651_v30 = vadd.f32 %v2650_v2, %v2567_v56  ;;  %v1529_v2 = vunpack.c.l.b16 %v1009_v47  ;;  %v1536_v35 = vunpack.c.l.b16 %v1180_v26 }
 0x152   : > { %v7007_v5 = vpack.c.b16 %v1535_v58, %v1529_v2 }
 0x153   : > { %v2798_v11 = vpop.f32.mrf.mxu3 }
 0x154   : > { %v2734_v51 = vpop.f32.mrf.mxu2  ;;  %v6987_v34 = vadd.f32 %v2798_v11, %v6814_v31  ;;  %v2569_v56 = vpop.f32.mrf.mxu0  ;;  %v1855_v31 = vpack.c.b16 %v5968_v49, %v8840_v16  ;;  %v7015_v16 = vld [vmem:[%s6405_s9 + $0x88] sm:$0xf] }
 0x155   : > { %v7000_v27 = vadd.f32 %v2734_v51, %v2651_v30  ;;  %v2570_v59 = vadd.f32 %v6727_v48, %v2569_v56  ;;  %v1854_v30 = vpack.c.b16 %v1536_v35, %v1530_v61  ;;  %v8843_v2 = vunpack.c.l.b16 %v7015_v16 }
 0x157   : > { %v2653_v1 = vpop.f32.mrf.mxu1  ;;  %2608 = vmatmul.bf16.gmra.mxu0 %v1954_v57  ;;  %v5800_v57 = vld [vmem:[%s8827_s1 + $0x1f0] sm:$0xff] }
 0x158   : > { %v2654_v11 = vadd.f32 %v2653_v1, %v2570_v59  ;;  %2840 = vmatmul.bf16.gmra.mxu3 %v1924_v43  ;;  %v8841_v59 = vunpack.c.h.b16 %v6982_v22 }
 0x159   : > { %3047 = vmatmul.bf16.gmra.mxu2 %v1855_v31  ;;  %v8842_v31 = vunpack.c.h.b16 %v6844_v44  ;;  %3119 = vmatpush.bf16.msrb.mxu3 %v5800_v57  ;;  %v1542_v57 = vunpack.c.h.b16 %v1180_v26 }
 0x15a   : > { %2963 = vmatmul.bf16.gmra.mxu1 %v1854_v30 }
 0x15b   : > { %v2801_v49 = vpop.f32.mrf.mxu3  ;;  %v1933_v35 = vpack.c.b16 %v8843_v2, %v8842_v31  ;;  %v5096_v2 = vld [vmem:[%s6405_s9 + $0x40] sm:$0xe] }
 0x15c   : > { %v2737_v47 = vpop.f32.mrf.mxu2  ;;  %v7010_v51 = vadd.f32 %v2801_v49, %v6821_v10  ;;  %v2571_v12 = vpop.f32.mrf.mxu0  ;;  %v7024_v10 = vld [vmem:[%s6405_s9 + $0x38] sm:$0xf]  ;;  %v1006_v49 = vsel %vm683_vm0, %v6554_v24, %v1005_v23 }
 0x15d   : > { %v7012_v56 = vadd.f32 %v2737_v47, %v2654_v11  ;;  %v2572_v63 = vadd.f32 %v6727_v48, %v2571_v12  ;;  %v8844_v1 = vunpack.c.l.b16 %v7024_v10 }
 0x15f   : > { %v2655_v13 = vpop.f32.mrf.mxu1  ;;  %v1864_v47 = vpack.c.b16 %v8844_v1, %v8841_v59 }
 0x160   : > { %v2656_v43 = vadd.f32 %v2655_v13, %v2572_v63  ;;  %v5808_v13 = vld [vmem:[%s8827_s1 + $0x230] sm:$0xff] }
 0x161   : > { %3203 = vmatpush.bf16.msra.mxu0 %v5808_v13 }
 0x163   : > { %v2803_v58 = vpop.f32.mrf.mxu3 }
 0x164   : > { %v2739_v61 = vpop.f32.mrf.mxu2  ;;  %v7029_v12 = vadd.f32 %v2803_v58, %v6837_v19  ;;  %v2574_v30 = vpop.f32.mrf.mxu0  ;;  %v1548_v58 = vunpack.c.l.b16 %v1179_v0  ;;  %v5086_v0 = vld [vmem:[%s6405_s9 + $0x4c] sm:$0x1] }
 0x165   : > { %v7035_v11 = vadd.f32 %v2739_v61, %v2656_v43  ;;  %v2575_v63 = vadd.f32 %v6727_v48, %v2574_v30 }
 0x166   : > { %v1863_v24 = vpack.c.b16 %v1548_v58, %v1542_v57 }
 0x167   : > { %v2658_v19 = vpop.f32.mrf.mxu1  ;;  %2874 = vmatmul.bf16.vlgmr.msrb.gmra.mxu0 %v1006_v49 }
 0x168   : > { %v2659_v43 = vadd.f32 %v2658_v19, %v2575_v63  ;;  %2845 = vmatmul.bf16.gmra.mxu3 %v1933_v35  ;;  %v5085_v35 = vld [vmem:[%s6405_s9 + $0x3c] sm:$0x1]  ;;  %v968_v19 = vunpack.c.l.b16 %v5086_v0  ;;  %v7073_v0 = vld [vmem:[%s6405_s9 + $0x40] sm:$0xff]  }
 0x169   : > { %3052 = vmatmul.bf16.gmra.mxu2 %v1864_v47  ;;  %v5799_v47 = vld [vmem:[%s8827_s1 + $0x1e8] sm:$0xff] }
 0x16a   : > { %2968 = vmatmul.bf16.gmra.mxu1 %v1863_v24  ;;  %3120 = vmatpush.bf16.msrb.mxu3 %v5799_v47 }
 0x16b   : > { %v2806_v23 = vpop.f32.mrf.mxu3 }
 0x16c   : > { %v2742_v61 = vpop.f32.mrf.mxu2  ;;  %v7048_v59 = vadd.f32 %v2806_v23, %v6860_v3  ;;  %v2576_v31 = vpop.f32.mrf.mxu0  ;;  %v967_v3 = vunpack.c.l.b16 %v5085_v35  ;;  %v7067_v23 = vld [vmem:[%s6405_s9 + $0x90] sm:$0xff]  }
 0x16d   : > { %v7050_v30 = vadd.f32 %v2742_v61, %v2659_v43  ;;  %v2577_v26 = vadd.f32 %v6727_v48, %v2576_v31  ;;  %v5798_v31 = vld [vmem:[%s8827_s1 + $0x1e0] sm:$0xff]  ;;  %v6049_v61 = vld [vmem:[%s6405_s9 + $0x30] sm:$0xf0] }
 0x16e   : > { %8870 = vst [vmem:[#allocation13_spill] sm:$0xff] %v7048_v59  ;;  %3121 = vmatpush.bf16.msrb.mxu3 %v5798_v31  ;;  %v1022_v31 = vshrl.u32 %v6953_v39, 16 }
 0x16f   : > { %v2660_v63 = vpop.f32.mrf.mxu1 }
 0x170   : > { %v2661_v49 = vadd.f32 %v2660_v63, %v2577_v26  ;;  %v6050_v26 = vld [vmem:[%s6405_s9 + $0x30] sm:$0xe] }
 0x171   : > { %v6051_v47 = vor.u32 %v6050_v26, %v6049_v61 }
 0x173   : > { %v2808_v13 = vpop.f32.mrf.mxu3 }
 0x174   : > { %v2744_v57 = vpop.f32.mrf.mxu2  ;;  %v7059_v43 = vadd.f32 %v2808_v13, %v6887_v46  ;;  %v2579_v24 = vpop.f32.mrf.mxu0  ;;  %v8872_v46 = vunpack.c.l.b16 %v6717_v40  ;;  %v1181_v40 = vrot.slane %v6051_v47, 1  ;;  %v5796_v47 = vld [vmem:[%s8827_s1 + $0x1d0] sm:$0xff] }
 0x175   : > { %v7064_v58 = vadd.f32 %v2744_v57, %v2661_v49  ;;  %v2580_v63 = vadd.f32 %v6727_v48, %v2579_v24  ;;  %v8873_v49 = vunpack.c.l.b16 %v6757_v33  ;;  %v5797_v24 = vld [vmem:[%s8827_s1 + $0x1d8] sm:$0xff] }
 0x176   : > { %8871 = vst [vmem:[#allocation14_spill] sm:$0xff] %v7059_v43  ;;  %v7077_v13 = vpack.c.b16 %v967_v3, %v8872_v46  ;;  %v1158_v3 = vunpack.c.l.b16 %v5096_v2  ;;  %3122 = vmatpush.bf16.msrb.mxu3 %v5797_v24 }
 0x177   : > { %v2663_v35 = vpop.f32.mrf.mxu1  ;;  %v7082_v57 = vpack.c.b16 %v968_v19, %v8873_v49  ;;  %2879 = vmatmul.bf16.gmra.mxu0 %v7007_v5  ;;  %v7107_v49 = vld [vmem:[%s6405_s9 + $0x98] sm:$0xf] }
 0x178   : > { %v2664_v1 = vadd.f32 %v2663_v35, %v2580_v63  ;;  %2850 = vmatmul.bf16.gmra.mxu3 %v7067_v23  ;;  %v1182_v33 = vrot.slane %v7077_v13, 1  ;;  %v7098_v63 = vld [vmem:[%s6405_s9 + $0xa0] sm:$0xff]   ;;  %v1024_v35 = vor.u32 %v1022_v31, %v6973_v29  ;;  %v1033_v24 = vshll.u32 %v7077_v13, 16 }
 0x179   : > { %3057 = vmatmul.bf16.gmra.mxu2 %v7073_v0  ;;  %v1048_v19 = vshll.u32 %v7082_v57, 16 }
 0x17a   : > { %v1183_v26 = vsel %vm864_vm1, %v1181_v40, %v1182_v33  ;;  %v8875_v40 = vunpack.c.h.b16 %v6673_v53  ;;  %3123 = vmatpush.bf16.msrb.mxu3 %v5796_v47  ;;  %v1547_v43 = vunpack.c.l.b16 %v1024_v35  ;;  %v5795_v53 = vld [vmem:[%s8827_s1 + $0x1c8] sm:$0xff] }
 0x17b   : > { %v2811_v61 = vpop.f32.mrf.mxu3  ;;  %2973 = vmatmul.bf16.gmra.mxu1 %v1183_v26  ;;  %v7113_v31 = vrot.slane %v1048_v19, 1  ;;  %v1037_v26 = vshrl.u32 %v7077_v13, 16  ;;  %v7124_v19 = vld [vmem:[%s6405_s9 + $0x48] sm:$0xf]  ;;  %v8878_v13 = vunpack.c.l.b16 %v7107_v49 }
 0x17c   : > { %v2747_v5 = vpop.f32.mrf.mxu2  ;;  %v7095_v39 = vadd.f32 %v2811_v61, %v6911_v32  ;;  %v2581_v2 = vpop.f32.mrf.mxu0  ;;  %v1168_v32 = vpack.c.b16 %v8875_v40, %v1158_v3  ;;  %v1035_v3 = vrot.slane %v1033_v24, 1  ;;  %v7127_v40 = vld [vmem:[%s6405_s9 + $0x50] sm:$0xff]   ;;  %v8845_v6 = vunpack.c.l.b16 %v7124_v19 }
 0x17d   : > { %v7104_v46 = vadd.f32 %v2747_v5, %v2664_v1  ;;  %v2582_v61 = vadd.f32 %v6727_v48, %v2581_v2  ;;  %v5960_v1 = vunpack.c.l.b16 %v7098_v63  ;;  %8876 = vst [vmem:[#allocation16_spill] sm:$0xff] %v7127_v40  ;;  %v7142_v47 = vsel %vm683_vm0, %v6696_v55, %v7113_v31 }
 0x17e   : > { %8874 = vst [vmem:[#allocation15_spill] sm:$0xff] %v7095_v39  ;;  %v1184_v2 = vrot.slane %v1168_v32, 1  ;;  %3124 = vmatpush.bf16.msrb.mxu3 %v5795_v53  ;;  %v1039_v35 = vor.u32 %v1037_v26, %v1035_v3  ;;  %v1862_v32 = vpack.c.b16 %v1547_v43, %v1541_v14  ;;  %v5794_v53 = vld [vmem:[%s8827_s1 + $0x1c0] sm:$0xff]  ;;  %v1571_v43 = vunpack.c.l.b16 %v7142_v47 }
 0x17f   : > { %v2665_v29 = vpop.f32.mrf.mxu1  ;;  %v1948_v24 = vpack.c.b16 %v5960_v1, %v8878_v13  ;;  %v8879_v55 = vrot.slane %v7082_v57, 1 }
 0x180   : > { %v2666_v5 = vadd.f32 %v2665_v29, %v2582_v61  ;;  %v5976_v29 = vunpack.c.l.b16 %v7127_v40  ;;  %v1565_v14 = vunpack.c.l.b16 %v1039_v35 }
 0x182   : > { %v1879_v1 = vpack.c.b16 %v5976_v29, %v8845_v6  ;;  %3125 = vmatpush.bf16.msrb.mxu3 %v5794_v53 }
 0x183   : > { %v2813_v61 = vpop.f32.mrf.mxu3 }
 0x184   : > { %v2749_v39 = vpop.f32.mrf.mxu2  ;;  %v7132_v36 = vadd.f32 %v2813_v61, %v6937_v9  ;;  %v2584_v26 = vpop.f32.mrf.mxu0  ;;  %v5807_v9 = vld [vmem:[%s8827_s1 + $0x228] sm:$0xff] }
 0x185   : > { %v7144_v54 = vadd.f32 %v2749_v39, %v2666_v5  ;;  %v2585_v61 = vadd.f32 %v6727_v48, %v2584_v26  ;;  %v1186_v39 = vsel %vm864_vm1, %v1184_v2, %v8879_v55  ;;  %3204 = vmatpush.bf16.msra.mxu0 %v5807_v9  ;;  %v7156_v5 = vpack.c.b16 %v1571_v43, %v1565_v14  ;;  %v7164_v9 = vld [vmem:[%s6405_s9 + $0xa8] sm:$0xf] }
 0x186   : > { %8877 = vst [vmem:[#allocation17_spill] sm:$0xff] %v7132_v36  ;;  %v1566_v36 = vunpack.c.l.b16 %v1182_v33  ;;  %v1572_v59 = vunpack.c.l.b16 %v1186_v39 }
 0x187   : > { %v2668_v13 = vpop.f32.mrf.mxu1  ;;  %2884 = vmatmul.bf16.gmra.mxu0 %v1862_v32  ;;  %v8846_v32 = vunpack.c.h.b16 %v7098_v63 }
 0x188   : > { %v2669_v38 = vadd.f32 %v2668_v13, %v2585_v61  ;;  %2855 = vmatmul.bf16.gmra.mxu3 %v1948_v24  ;;  %v1878_v29 = vpack.c.b16 %v1572_v59, %v1566_v36  ;;  %v5134_v36 = vld [vmem:[%s6405_s9 + $0x2c] sm:$0x1]  ;;  %v7171_v59 = vld [vmem:[%s6405_s9 + $0x58] sm:$0xf] }
 0x189   : > { %3062 = vmatmul.bf16.gmra.mxu2 %v1879_v1  ;;  %v8848_v1 = vunpack.c.l.b16 %v7164_v9 }
 0x18b   : > { %v2816_v35 = vpop.f32.mrf.mxu3  ;;  %2978 = vmatmul.bf16.gmra.mxu1 %v1878_v29  ;;  %v1957_v55 = vpack.c.b16 %v8848_v1, %v8846_v32  ;;  %v1275_v29 = vunpack.c.l.b16 %v5134_v36  ;;  %v8882_v36 = vrot.slane %v7082_v57, 1  ;;  %v8883_v32 = vunpack.c.l.b16 %v6979_v8 }
 0x18c   : > { %v2752_v26 = vpop.f32.mrf.mxu2  ;;  %v7159_v53 = vadd.f32 %v2816_v35, %v6965_v37  ;;  %v2586_v2 = vpop.f32.mrf.mxu0  ;;  %v8847_v37 = vunpack.c.h.b16 %v7127_v40 }
 0x18d   : > { %v7161_v6 = vadd.f32 %v2752_v26, %v2669_v38  ;;  %v2587_v33 = vadd.f32 %v6727_v48, %v2586_v2  ;;  %v8849_v38 = vunpack.c.l.b16 %v7171_v59  ;;  %v1036_v2 = vsel %vm683_vm0, %v6646_v52, %v1035_v3  ;;  %v5135_v3 = vld [vmem:[%s6405_s9 + $0x3c] sm:$0x1] }
 0x18e   : > { %8880 = vst [vmem:[#allocation18_spill] sm:$0xff] %v7159_v53  ;;  %v7196_v52 = vpack.c.b16 %v1275_v29, %v8883_v32 }
 0x18f   : > { %v2670_v14 = vpop.f32.mrf.mxu1 }
 0x190   : > { %v2671_v24 = vadd.f32 %v2670_v14, %v2587_v33  ;;  %v1888_v33 = vpack.c.b16 %v8849_v38, %v8847_v37  ;;  %v1313_v8 = vshll.u32 %v7196_v52, 16 }
 0x193   : > { %v2818_v43 = vpop.f32.mrf.mxu3 }
 0x194   : > { %v2754_v61 = vpop.f32.mrf.mxu2  ;;  %v7176_v13 = vadd.f32 %v2818_v43, %v7000_v27  ;;  %v2589_v26 = vpop.f32.mrf.mxu0  ;;  %v1578_v43 = vunpack.c.h.b16 %v1186_v39 }
 0x195   : > { %v7182_v35 = vadd.f32 %v2754_v61, %v2671_v24  ;;  %v2590_v27 = vadd.f32 %v6727_v48, %v2589_v26  ;;  %v1584_v24 = vunpack.c.l.b16 %v8882_v36  ;;  %v1308_v61 = vshll.u32 %v6943_v50, 16 }
 0x196   : > { %8881 = vst [vmem:[#allocation19_spill] sm:$0xff] %v7176_v13  ;;  %v1306_v26 = vshrl.u32 %v6943_v50, 16  ;;  %v5806_v50 = vld [vmem:[%s8827_s1 + $0x220] sm:$0xff] }
 0x197   : > { %v2673_v14 = vpop.f32.mrf.mxu1  ;;  %2889 = vmatmul.bf16.gmra.mxu0 %v1036_v2  ;;  %v1887_v37 = vpack.c.b16 %v1584_v24, %v1578_v43  ;;  %v1310_v2 = vrot.slane %v1308_v61, 1  ;;  %v1315_v24 = vrot.slane %v1313_v8, 1  ;;  %v1323_v61 = vshll.u32 %v6982_v22, 16 }
 0x198   : > { %v2674_v13 = vadd.f32 %v2673_v14, %v2590_v27  ;;  %2860 = vmatmul.bf16.gmra.mxu3 %v1957_v55  ;;  %v1276_v27 = vunpack.c.l.b16 %v5135_v3  ;;  %3205 = vmatpush.bf16.msra.mxu0 %v5806_v50  ;;  %v6052_v50 = vld [vmem:[%s6405_s9 + $0x50] sm:$0xf0] }
 0x199   : > { %3067 = vmatmul.bf16.gmra.mxu2 %v1888_v33  ;;  %v5087_v33 = vld [vmem:[%s6405_s9 + $0x5c] sm:$0x1]  ;;  %v1325_v8 = vrot.slane %v1323_v61, 1 }
 0x19b   : > { %v2821_v1 = vpop.f32.mrf.mxu3  ;;  %2983 = vmatmul.bf16.gmra.mxu1 %v1887_v37  ;;  %v969_v37 = vunpack.c.l.b16 %v5087_v33 }
 0x19c   : > { %v2757_v39 = vpop.f32.mrf.mxu2  ;;  %v7201_v55 = vadd.f32 %v2821_v1, %v7012_v56  ;;  %v2591_v36 = vpop.f32.mrf.mxu0  ;;  %v1311_v56 = vor.u32 %v1310_v2, %v1306_v26  ;;  %v8885_v1 = vunpack.c.l.b16 %v7024_v10  ;;  %v1321_v26 = vshrl.u32 %v6982_v22, 16  ;;  %v5098_v22 = vld [vmem:[%s6405_s9 + $0x60] sm:$0xe] }
 0x19d   : > { %v7203_v14 = vadd.f32 %v2757_v39, %v2674_v13  ;;  %v2592_v32 = vadd.f32 %v6727_v48, %v2591_v36  ;;  %v5088_v39 = vld [vmem:[%s6405_s9 + $0x6c] sm:$0x1] }
 0x19e   : > { %8884 = vst [vmem:[#allocation20_spill] sm:$0xff] %v7201_v55  ;;  %v7213_v13 = vpack.c.b16 %v1276_v27, %v8885_v1  ;;  %v1316_v27 = vsel %vm683_vm0, %v1311_v56, %v1315_v24  ;;  %v6053_v1 = vld [vmem:[%s6405_s9 + $0x50] sm:$0xe]  ;;  %v7229_v55 = vld [vmem:[%s6405_s9 + $0x60] sm:$0xff]   ;;  %v1317_v56 = vshrl.u32 %v7196_v52, 16  ;;  %v1326_v61 = vor.u32 %v1325_v8, %v1321_v26 }
 0x19f   : > { %v2675_v29 = vpop.f32.mrf.mxu1  ;;  %v6054_v53 = vor.u32 %v6053_v1, %v6052_v50  ;;  %v1160_v50 = vunpack.c.l.b16 %v5098_v22  ;;  %v1577_v1 = vunpack.c.h.b16 %v7142_v47 }
 0x1a0   : > { %v2676_v43 = vadd.f32 %v2675_v29, %v2592_v32  ;;  %8886 = vst [vmem:[#allocation21_spill] sm:$0xff] %v7213_v13  ;;  %v1328_v29 = vshll.u32 %v7213_v13, 16  ;;  %v1319_v26 = vor.u32 %v1317_v56, %v1315_v24 }
 0x1a2   : > { %v7237_v25 = vrot.slane %v1328_v29, 1 }
 0x1a3   : > { %v2823_v3 = vpop.f32.mrf.mxu3 }
 0x1a4   : > { %v2759_v36 = vpop.f32.mrf.mxu2  ;;  %v7218_v32 = vadd.f32 %v2823_v3, %v7035_v11  ;;  %v2594_v2 = vpop.f32.mrf.mxu0  ;;  %v8888_v11 = vunpack.c.l.b16 %v6824_v18  ;;  %v7253_v22 = vsel %vm683_vm0, %v1326_v61, %v7237_v25 }
 0x1a5   : > { %v7221_v10 = vadd.f32 %v2759_v36, %v2676_v43  ;;  %v2595_v33 = vadd.f32 %v6727_v48, %v2594_v2  ;;  %v1052_v43 = vshrl.u32 %v7082_v57, 16  ;;  %v970_v36 = vunpack.c.l.b16 %v5088_v39 }
 0x1a6   : > { %8887 = vst [vmem:[#allocation22_spill] sm:$0xff] %v7218_v32  ;;  %v984_v3 = vpack.c.b16 %v969_v37, %v8888_v11  ;;  %v1187_v48 = vrot.slane %v6054_v53, 1 }
 0x1a7   : > { %v2678_v38 = vpop.f32.mrf.mxu1  ;;  %2894 = vmatmul.bf16.gmra.mxu0 %v7156_v5  ;;  %v1054_v37 = vor.u32 %v1052_v43, %v7113_v31  ;;  %v1531_v43 = vunpack.c.l.b16 %v1319_v26 }
 0x1a8   : > { %v2679_v32 = vadd.f32 %v2678_v38, %v2595_v33  ;;  %3126 = vmatmul.bf16.vlgmr.msrb.gmra.mxu3 %v1316_v27  ;;  %v1188_v2 = vrot.slane %v984_v3, 1  ;;  %v8889_v38 = vunpack.c.l.b16 %v6863_v42  ;;  %v1063_v31 = vshll.u32 %v984_v3, 16 }
 0x1a9   : > { %3072 = vmatmul.bf16.gmra.mxu2 %v7229_v55  ;;  %v8891_v42 = vunpack.c.h.b16 %v6738_v62  ;;  %v1583_v33 = vunpack.c.l.b16 %v1054_v37  ;;  %v1067_v62 = vshrl.u32 %v984_v3, 16 }
 0x1aa   : > { %v1189_v57 = vsel %vm864_vm1, %v1187_v48, %v1188_v2  ;;  %v7244_v39 = vpack.c.b16 %v970_v36, %v8889_v38  ;;  %v1537_v36 = vunpack.c.l.b16 %v7253_v22  ;;  %v1065_v61 = vrot.slane %v1063_v31, 1 }
 0x1ab   : > { %v2826_v18 = vpop.f32.mrf.mxu3  ;;  %2988 = vmatmul.bf16.gmra.mxu1 %v1189_v57  ;;  %v1170_v53 = vpack.c.b16 %v8891_v42, %v1160_v50  ;;  %v7267_v50 = vld [vmem:[%s6405_s9 + $0x68] sm:$0xf] }
 0x1ac   : > { %v2762_v5 = vpop.f32.mrf.mxu2  ;;  %v7247_v27 = vadd.f32 %v2826_v18, %v7050_v30  ;;  %v2596_v29 = vpop.f32.mrf.mxu0  ;;  %v7260_v30 = vld [vmem:[%s8828_s2] ss:$0 sm:$0xff]  ;;  %v1078_v56 = vshll.u32 %v7244_v39, 16  ;;  %v7270_v18 = vld [vmem:[%s6405_s9 + $0x70] sm:$0xff]   ;;  %v8853_v37 = vunpack.c.l.b16 %v7267_v50  ;;  %v1069_v26 = vor.u32 %v1067_v62, %v1065_v61 }
 0x1ad   : > { %v7249_v8 = vadd.f32 %v2762_v5, %v2679_v32  ;;  %v2597_v24 = vadd.f32 %v7260_v30, %v2596_v29  ;;  %v1190_v48 = vrot.slane %v1170_v53, 1  ;;  %v1886_v5 = vpack.c.b16 %v1583_v33, %v1577_v1 }
 0x1ae   : > { %8890 = vst [vmem:[#allocation23_spill] sm:$0xff] %v7247_v27  ;;  %v7272_v57 = vrot.slane %v1078_v56, 1  ;;  %v5984_v47 = vunpack.c.l.b16 %v7270_v18  ;;  %v1856_v31 = vpack.c.b16 %v1537_v36, %v1531_v43  ;;  %v1191_v53 = vrot.slane %v7244_v39, 1 }
 0x1af   : > { %v2680_v32 = vpop.f32.mrf.mxu1  ;;  %v1601_v33 = vunpack.c.l.b16 %v1069_v26 }
 0x1b0   : > { %v2681_v11 = vadd.f32 %v2680_v32, %v2597_v24  ;;  %v7282_v3 = vsel %vm683_vm0, %v6769_v28, %v7272_v57  ;;  %v1903_v1 = vpack.c.b16 %v5984_v47, %v8853_v37  ;;  %v1192_v43 = vsel %vm864_vm1, %v1190_v48, %v1191_v53 }
 0x1b1   : > { %v1607_v56 = vunpack.c.l.b16 %v7282_v3  ;;  %v1602_v28 = vunpack.c.l.b16 %v1188_v2 }
 0x1b3   : > { %v2828_v38 = vpop.f32.mrf.mxu3  ;;  %v7292_v36 = vpack.c.b16 %v1607_v56, %v1601_v33 }
 0x1b4   : > { %v2764_v29 = vpop.f32.mrf.mxu2  ;;  %v7277_v42 = vadd.f32 %v2828_v38, %v7064_v58  ;;  %v2599_v32 = vpop.f32.mrf.mxu0  ;;  %v1608_v38 = vunpack.c.l.b16 %v1192_v43 }
 0x1b5   : > { %v7285_v24 = vadd.f32 %v2764_v29, %v2681_v11  ;;  %v2600_v58 = vadd.f32 %v7260_v30, %v2599_v32  ;;  %v1332_v11 = vshrl.u32 %v7213_v13, 16 }
 0x1b6   : > { %8892 = vst [vmem:[#allocation24_spill] sm:$0xff] %v7277_v42  ;;  %v1902_v47 = vpack.c.b16 %v1608_v38, %v1602_v28  ;;  %v5136_v28 = vld [vmem:[%s6405_s9 + $0x4c] sm:$0x1] }
 0x1b7   : > { %v2683_v62 = vpop.f32.mrf.mxu1  ;;  %2899 = vmatmul.bf16.gmra.mxu0 %v1886_v5  ;;  %v1334_v48 = vor.u32 %v1332_v11, %v7237_v25 }
 0x1b8   : > { %v2684_v42 = vadd.f32 %v2683_v62, %v2600_v58  ;;  %3131 = vmatmul.bf16.gmra.mxu3 %v1856_v31  ;;  %v1543_v58 = vunpack.c.h.b16 %v7253_v22  ;;  %v5805_v62 = vld [vmem:[%s8827_s1 + $0x218] sm:$0xff] }
 0x1b9   : > { %3077 = vmatmul.bf16.gmra.mxu2 %v1903_v1  ;;  %v1549_v1 = vunpack.c.l.b16 %v1334_v48  ;;  %3206 = vmatpush.bf16.msra.mxu0 %v5805_v62  ;;  %v1620_v62 = vunpack.c.l.b16 %v1191_v53  ;;  %v1336_v53 = vshrl.u32 %v7073_v0, 16 }
 0x1bb   : > { %v2831_v26 = vpop.f32.mrf.mxu3  ;;  %2993 = vmatmul.bf16.gmra.mxu1 %v1902_v47  ;;  %v1865_v22 = vpack.c.b16 %v1549_v1, %v1543_v58  ;;  %v5137_v1 = vld [vmem:[%s6405_s9 + $0x5c] sm:$0x1] }
 0x1bc   : > { %v2767_v29 = vpop.f32.mrf.mxu2  ;;  %v7296_v32 = vadd.f32 %v2831_v26, %v7104_v46  ;;  %v2601_v2 = vpop.f32.mrf.mxu0  ;;  %v7308_v46 = vld [vmem:[%s6405_s9 + $0x78] sm:$0xf]  ;;  %v1277_v26 = vunpack.c.l.b16 %v5136_v28 }
 0x1bd   : > { %v7299_v33 = vadd.f32 %v2767_v29, %v2684_v42  ;;  %v2602_v5 = vadd.f32 %v7260_v30, %v2601_v2  ;;  %v8851_v42 = vunpack.c.h.b16 %v7270_v18  ;;  %v8852_v38 = vunpack.c.l.b16 %v7308_v46 }
 0x1be   : > { %8893 = vst [vmem:[#allocation25_spill] sm:$0xff] %v7296_v32  ;;  %v1066_v2 = vsel %vm683_vm0, %v6709_v7, %v1065_v61 }
 0x1bf   : > { %v2685_v31 = vpop.f32.mrf.mxu1 }
 0x1c0   : > { %v2686_v56 = vadd.f32 %v2685_v31, %v2602_v5  ;;  %v1912_v5 = vpack.c.b16 %v8852_v38, %v8851_v42  ;;  %v1614_v31 = vunpack.c.h.b16 %v1192_v43  ;;  %v6056_v42 = vld [vmem:[%s6405_s9 + $0x70] sm:$0xe]  ;;  %v8900_v38 = vunpack.c.l.b16 %v6968_v20 }
 0x1c2   : > { %v1911_v7 = vpack.c.b16 %v1620_v62, %v1614_v31  ;;  %v8898_v31 = vunpack.c.l.b16 %v7171_v59 }
 0x1c3   : > { %v2833_v25 = vpop.f32.mrf.mxu3 }
 0x1c4   : > { %v2769_v11 = vpop.f32.mrf.mxu2  ;;  %v7313_v47 = vadd.f32 %v2833_v25, %v7144_v54  ;;  %v7317_v48 = vpop.f32.mrf.mxu0  ;;  %v1338_v54 = vshll.u32 %v7073_v0, 16 }
 0x1c5   : > { %v7315_v29 = vadd.f32 %v2769_v11, %v2686_v56  ;;  %v8895_v56 = vunpack.c.l.b16 %v7124_v19 }
 0x1c6   : > { %8894 = vst [vmem:[#allocation26_spill] sm:$0xff] %v7313_v47  ;;  %v1340_v11 = vrot.slane %v1338_v54, 1 }
 0x1c7   : > { %2904 = vmatmul.bf16.gmra.mxu0 %v1066_v2  ;;  %v7328_v58 = vpack.c.b16 %v1277_v26, %v8895_v56  ;;  %v7331_v28 = vpop.f32.mrf.mxu1  ;;  %v5089_v26 = vld [vmem:[%s6405_s9 + $0x7c] sm:$0x1]  ;;  %v1353_v56 = vshll.u32 %v7127_v40, 16 }
 0x1c8   : > { %3136 = vmatmul.bf16.gmra.mxu3 %v1865_v22  ;;  %v1278_v22 = vunpack.c.l.b16 %v5137_v1  ;;  %v971_v0 = vunpack.c.l.b16 %v5089_v26  ;;  %v6055_v26 = vld [vmem:[%s6405_s9 + $0x70] sm:$0xf0] }
 0x1c9   : > { %8896 = vst [vmem:[#allocation27_spill] sm:$0xff] %v7328_v58  ;;  %3082 = vmatmul.bf16.gmra.mxu2 %v1912_v5  ;;  %v1343_v19 = vshll.u32 %v7328_v58, 16  ;;  %v1341_v5 = vor.u32 %v1340_v11, %v1336_v53  ;;  %v1351_v53 = vshrl.u32 %v7127_v40, 16  ;;  %v1082_v40 = vshrl.u32 %v7244_v39, 16 }
 0x1ca   : > { %v7365_v37 = vpack.c.b16 %v971_v0, %v8900_v38 }
 0x1cb   : > { %v2836_v61 = vpop.f32.mrf.mxu3  ;;  %2998 = vmatmul.bf16.gmra.mxu1 %v1911_v7  ;;  %v1345_v62 = vrot.slane %v1343_v19, 1  ;;  %v1355_v19 = vrot.slane %v1353_v56, 1  ;;  %v1084_v0 = vor.u32 %v1082_v40, %v7272_v57  ;;  %v8903_v40 = vunpack.c.h.b16 %v6844_v44 }
 0x1cc   : > { %v7334_v25 = vadd.f32 %v2836_v61, %v7161_v6  ;;  %v7336_v43 = vpop.f32.mrf.mxu2  ;;  %v7339_v2 = vpop.f32.mrf.mxu0  ;;  %v7345_v6 = vpack.c.b16 %v1278_v22, %v8898_v31  ;;  %v5090_v61 = vld [vmem:[%s6405_s9 + $0x8c] sm:$0x1]  ;;  %v1194_v56 = vrot.slane %v7365_v37, 1 }
 0x1cd   : > { %v1346_v22 = vsel %vm683_vm0, %v1341_v5, %v1345_v62  ;;  %v972_v47 = vunpack.c.l.b16 %v5090_v61  ;;  %v1356_v32 = vor.u32 %v1355_v19, %v1351_v53 }
 0x1ce   : > { %8897 = vst [vmem:[#allocation28_spill] sm:$0xff] %v7334_v25  ;;  %v1358_v31 = vshll.u32 %v7345_v6, 16  ;;  %v7368_v25 = vld [vmem:[%s6405_s9 + $0x80] sm:$0xff]  }
 0x1cf   : > { %v7348_v54 = vpop.f32.mrf.mxu1 }
 0x1d0   : > { %v7375_v13 = vrot.slane %v1358_v31, 1 }
 0x1d3   : > { %v2838_v1 = vpop.f32.mrf.mxu3 }
 0x1d4   : > { %v7352_v7 = vadd.f32 %v2838_v1, %v7182_v35  ;;  %v7355_v11 = vpop.f32.mrf.mxu2  ;;  %v7357_v59 = vpop.f32.mrf.mxu0  ;;  %v6057_v35 = vor.u32 %v6056_v42, %v6055_v26  ;;  %v5100_v1 = vld [vmem:[%s6405_s9 + $0x80] sm:$0xe]  ;;  %v7395_v26 = vsel %vm683_vm0, %v1356_v32, %v7375_v13 }
 0x1d5   : > { %v1162_v20 = vunpack.c.l.b16 %v5100_v1  ;;  %v1573_v32 = vunpack.c.l.b16 %v7395_v26 }
 0x1d6   : > { %8899 = vst [vmem:[#allocation29_spill] sm:$0xff] %v7352_v7  ;;  %v1347_v7 = vshrl.u32 %v7328_v58, 16  ;;  %v1193_v5 = vrot.slane %v6057_v35, 1  ;;  %v1093_v35 = vshll.u32 %v7365_v37, 16 }
 0x1d7   : > { %2909 = vmatmul.bf16.gmra.mxu0 %v7292_v36  ;;  %v7378_v42 = vpop.f32.mrf.mxu1  ;;  %v8901_v36 = vunpack.c.l.b16 %v7015_v16  ;;  %v1172_v57 = vpack.c.b16 %v8903_v40, %v1162_v20  ;;  %v5804_v16 = vld [vmem:[%s8827_s1 + $0x210] sm:$0xff]  ;;  %v1097_v20 = vshrl.u32 %v7365_v37, 16 }
 0x1d8   : > { %3141 = vmatmul.bf16.gmra.mxu3 %v1346_v22  ;;  %v1195_v39 = vsel %vm864_vm1, %v1193_v5, %v1194_v56  ;;  %v1349_v61 = vor.u32 %v1347_v7, %v1345_v62  ;;  %v1613_v62 = vunpack.c.h.b16 %v7282_v3  ;;  %v1619_v7 = vunpack.c.l.b16 %v1084_v0  ;;  %3207 = vmatpush.bf16.msra.mxu0 %v5804_v16 }
 0x1d9   : > { %3087 = vmatmul.bf16.gmra.mxu2 %v7368_v25  ;;  %v7384_v22 = vpack.c.b16 %v972_v47, %v8901_v36  ;;  %v1095_v44 = vrot.slane %v1093_v35, 1  ;;  %v1196_v36 = vrot.slane %v1172_v57, 1 }
 0x1da   : > { %v1567_v1 = vunpack.c.l.b16 %v1349_v61  ;;  %v1910_v0 = vpack.c.b16 %v1619_v7, %v1613_v62  ;;  %v5992_v61 = vunpack.c.l.b16 %v7067_v23 }
 0x1db   : > { %v2841_v38 = vpop.f32.mrf.mxu3  ;;  %3003 = vmatmul.bf16.gmra.mxu1 %v1195_v39  ;;  %v1108_v39 = vshll.u32 %v7384_v22, 16 }
 0x1dc   : > { %v7387_v53 = vadd.f32 %v2841_v38, %v7203_v14  ;;  %v7389_v19 = vpop.f32.mrf.mxu2  ;;  %v7391_v31 = vpop.f32.mrf.mxu0  ;;  %v6144_v14 = vld [vmem:[%s6405_s9 + $0x80] sm:$0xff]   ;;  %v1880_v35 = vpack.c.b16 %v1573_v32, %v1567_v1  ;;  %v1638_v32 = vunpack.c.l.b16 %v1194_v56 }
 0x1dd   : > { %v1103_v47 = vshll.u32 %v6144_v14, 16  ;;  %v1101_v5 = vshrl.u32 %v6144_v14, 16  ;;  %v7413_v27 = vrot.slane %v1108_v39, 1  ;;  %v1099_v14 = vor.u32 %v1097_v20, %v1095_v44 }
 0x1de   : > { %8902 = vst [vmem:[#allocation30_spill] sm:$0xff] %v7387_v53  ;;  %v7411_v53 = vld [vmem:[%s6405_s9 + $0x88] sm:$0xf] }
 0x1df   : > { %v1105_v38 = vrot.slane %v1103_v47, 1  ;;  %v7408_v40 = vpop.f32.mrf.mxu1  ;;  %v8861_v16 = vunpack.c.l.b16 %v7411_v53  ;;  %v1637_v7 = vunpack.c.l.b16 %v1099_v14 }
 0x1e1   : > { %v1106_v58 = vor.u32 %v1105_v38, %v1101_v5  ;;  %v1197_v5 = vrot.slane %v7384_v22, 1  ;;  %v1927_v62 = vpack.c.b16 %v5992_v61, %v8861_v16  ;;  %v8920_v16 = vld [vmem:[#allocation15_spill] sm:$0xff] }
 0x1e3   : > { %v2843_v3 = vpop.f32.mrf.mxu3  ;;  %v7424_v57 = vsel %vm683_vm0, %v1106_v58, %v7413_v27 }
 0x1e4   : > { %v7418_v47 = vadd.f32 %v2843_v3, %v7221_v10  ;;  %v7420_v37 = vpop.f32.mrf.mxu2  ;;  %v2875_v38 = vpop.f32.mrf.mxu0  ;;  %v1643_v39 = vunpack.c.l.b16 %v7424_v57  ;;  %v1198_v10 = vsel %vm864_vm1, %v1196_v36, %v1197_v5 }
 0x1e5   : > { %v2876_v20 = vadd.f32 %v2875_v38, %v6909_v4  ;;  %v1644_v3 = vunpack.c.l.b16 %v1198_v10 }
 0x1e6   : > { %8904 = vst [vmem:[#allocation31_spill] sm:$0xff] %v7418_v47  ;;  %v7432_v1 = vpack.c.b16 %v1643_v39, %v1637_v7  ;;  %v1362_v47 = vshrl.u32 %v7345_v6, 16  ;;  %v1579_v7 = vunpack.c.h.b16 %v7395_v26  ;;  %v5138_v39 = vld [vmem:[%s6405_s9 + $0x6c] sm:$0x1] }
 0x1e7   : > { %v2960_v58 = vadd.f32 %v7331_v28, %v2876_v20  ;;  %2914 = vmatmul.bf16.gmra.mxu0 %v1910_v0  ;;  %v1926_v61 = vpack.c.b16 %v1644_v3, %v1638_v32  ;;  %v7439_v4 = vpop.f32.mrf.mxu1 }
 0x1e8   : > { %3146 = vmatmul.bf16.gmra.mxu3 %v1880_v35  ;;  %v1364_v56 = vor.u32 %v1362_v47, %v7375_v13  ;;  %v8857_v47 = vunpack.c.h.b16 %v7067_v23 }
 0x1e9   : > { %3092 = vmatmul.bf16.gmra.mxu2 %v1927_v62  ;;  %v7437_v14 = vadd.f32 %v7336_v43, %v2960_v58  ;;  %v1279_v58 = vunpack.c.l.b16 %v5138_v39 }
 0x1ea   : > { %v1585_v43 = vunpack.c.l.b16 %v1364_v56 }
 0x1eb   : > { %v2846_v36 = vpop.f32.mrf.mxu3  ;;  %3008 = vmatmul.bf16.gmra.mxu1 %v1926_v61 }
 0x1ec   : > { %v7442_v38 = vadd.f32 %v2846_v36, %v7249_v8  ;;  %v7445_v28 = vpop.f32.mrf.mxu2  ;;  %v2877_v0 = vpop.f32.mrf.mxu0  ;;  %v7457_v8 = vld [vmem:[%s6405_s9 + $0x98] sm:$0xf] }
 0x1ed   : > { %v2878_v35 = vadd.f32 %v2877_v0, %v6933_v41  ;;  %v8858_v3 = vunpack.c.l.b16 %v7457_v8  ;;  %v1650_v0 = vunpack.c.h.b16 %v1198_v10 }
 0x1ef   : > { %v2962_v62 = vadd.f32 %v7348_v54, %v2878_v35  ;;  %v7454_v32 = vpop.f32.mrf.mxu1  ;;  %v1889_v54 = vpack.c.b16 %v1585_v43, %v1579_v7  ;;  %v1936_v36 = vpack.c.b16 %v8858_v3, %v8857_v47  ;;  %v1656_v35 = vunpack.c.l.b16 %v1197_v5 }
 0x1f0   : > { %v8905_v7 = vunpack.c.l.b16 %v7267_v50  ;;  %v5803_v50 = vld [vmem:[%s8827_s1 + $0x208] sm:$0xff] }
 0x1f1   : > { %v7452_v20 = vadd.f32 %v7355_v11, %v2962_v62  ;;  %v1096_v11 = vsel %vm683_vm0, %v6796_v45, %v1095_v44  ;;  %v1368_v62 = vshll.u32 %v7229_v55, 16  ;;  %v5139_v45 = vld [vmem:[%s6405_s9 + $0x7c] sm:$0x1]  ;;  %3208 = vmatpush.bf16.msra.mxu0 %v5803_v50 }
 0x1f2   : > { %v7477_v43 = vpack.c.b16 %v1279_v58, %v8905_v7  ;;  %v1280_v58 = vunpack.c.l.b16 %v5139_v45  ;;  %v2605_v7 = vadd.f32 %v7260_v30, %v7317_v48 }
 0x1f3   : > { %v2848_v13 = vpop.f32.mrf.mxu3 }
 0x1f4   : > { %v7462_v41 = vadd.f32 %v2848_v13, %v7285_v24  ;;  %v7464_v26 = vpop.f32.mrf.mxu2  ;;  %v2880_v61 = vpop.f32.mrf.mxu0  ;;  %v1366_v13 = vshrl.u32 %v7229_v55, 16 }
 0x1f5   : > { %v2881_v56 = vadd.f32 %v2880_v61, %v6963_v17  ;;  %v1935_v17 = vpack.c.b16 %v1656_v35, %v1650_v0  ;;  %v8906_v0 = vunpack.c.l.b16 %v7308_v46  ;;  %v1383_v35 = vshll.u32 %v7270_v18, 16 }
 0x1f7   : > { %v2965_v24 = vadd.f32 %v7378_v42, %v2881_v56  ;;  %2919 = vmatmul.bf16.gmra.mxu0 %v1096_v11 }
 0x1f8   : > { %3151 = vmatmul.bf16.gmra.mxu3 %v1889_v54  ;;  %v7483_v39 = vpop.f32.mrf.mxu1  ;;  %v1370_v54 = vrot.slane %v1368_v62, 1 }
 0x1f9   : > { %3097 = vmatmul.bf16.gmra.mxu2 %v1936_v36  ;;  %v7481_v44 = vadd.f32 %v7389_v19, %v2965_v24  ;;  %v1373_v19 = vshll.u32 %v7477_v43, 16  ;;  %v7500_v24 = vpack.c.b16 %v1280_v58, %v8906_v0  ;;  %v1385_v58 = vrot.slane %v1383_v35, 1 }
 0x1fa   : > { %v1371_v56 = vor.u32 %v1370_v54, %v1366_v13  ;;  %v1112_v0 = vshrl.u32 %v7384_v22, 16  ;;  %v2607_v22 = vadd.f32 %v7260_v30, %v7339_v2  ;;  %v1426_v2 = vshrl.u32 %v7098_v63, 16 }
 0x1fb   : > { %v2851_v10 = vpop.f32.mrf.mxu3  ;;  %3013 = vmatmul.bf16.gmra.mxu1 %v1935_v17  ;;  %v1375_v55 = vrot.slane %v1373_v19, 1  ;;  %v5092_v17 = vld [vmem:[%s6405_s9 + $0xac] sm:$0x1]  ;;  %v1388_v48 = vshll.u32 %v7500_v24, 16  ;;  %v8907_v19 = vunpack.c.l.b16 %v7107_v49  ;;  %v1428_v49 = vshll.u32 %v7098_v63, 16 }
 0x1fc   : > { %v7486_v42 = vadd.f32 %v2851_v10, %v7299_v33  ;;  %v7488_v5 = vpop.f32.mrf.mxu2  ;;  %v2882_v61 = vpop.f32.mrf.mxu0  ;;  %v5091_v33 = vld [vmem:[%s6405_s9 + $0x9c] sm:$0x1]  ;;  %v1381_v10 = vshrl.u32 %v7270_v18, 16 }
 0x1fd   : > { %v2883_v11 = vadd.f32 %v2882_v61, %v6987_v34  ;;  %v973_v62 = vunpack.c.l.b16 %v5091_v33  ;;  %v1376_v54 = vsel %vm683_vm0, %v1371_v56, %v1375_v55  ;;  %v6058_v61 = vld [vmem:[%s6405_s9 + $0x90] sm:$0xf0]  ;;  %v5102_v33 = vld [vmem:[%s6405_s9 + $0xa0] sm:$0xe]  ;;  %v974_v56 = vunpack.c.l.b16 %v5092_v17 }
 0x1fe   : > { %v1386_v3 = vor.u32 %v1385_v58, %v1381_v10  ;;  %v8908_v58 = vunpack.c.l.b16 %v7164_v9  ;;  %v2691_v9 = vadd.f32 %v6777_v60, %v2607_v22 }
 0x1ff   : > { %v2967_v36 = vadd.f32 %v7408_v40, %v2883_v11  ;;  %v7523_v11 = vpack.c.b16 %v973_v62, %v8907_v19  ;;  %v1164_v19 = vunpack.c.l.b16 %v5102_v33 }
 0x200   : > { %v7508_v45 = vpop.f32.mrf.mxu1 }
 0x201   : > { %v7506_v34 = vadd.f32 %v7420_v37, %v2967_v36  ;;  %v6059_v37 = vld [vmem:[%s6405_s9 + $0x90] sm:$0xe]  ;;  %v1200_v62 = vrot.slane %v7523_v11, 1  ;;  %v1127_v60 = vshrl.u32 %v7523_v11, 16 }
 0x202   : > { %v6060_v47 = vor.u32 %v6059_v37, %v6058_v61 }
 0x203   : > { %v2853_v40 = vpop.f32.mrf.mxu3 }
 0x204   : > { %v7512_v46 = vadd.f32 %v2853_v40, %v7315_v29  ;;  %v7515_v50 = vpop.f32.mrf.mxu2  ;;  %v2885_v13 = vpop.f32.mrf.mxu0  ;;  %v2689_v29 = vadd.f32 %v6747_v21, %v2605_v7  ;;  %v1377_v40 = vshrl.u32 %v7477_v43, 16  ;;  %v7534_v21 = vrot.slane %v1388_v48, 1 }
 0x205   : > { %v2886_v36 = vadd.f32 %v2885_v13, %v7010_v51  ;;  %v1199_v51 = vrot.slane %v6060_v47, 1  ;;  %v1114_v13 = vor.u32 %v1112_v0, %v7413_v27  ;;  %v7549_v48 = vpack.c.b16 %v974_v56, %v8908_v58 }
 0x206   : > { %v7560_v27 = vsel %vm683_vm0, %v1386_v3, %v7534_v21 }
 0x207   : > { %v2970_v35 = vadd.f32 %v7439_v4, %v2886_v36  ;;  %2924 = vmatmul.bf16.gmra.mxu0 %v7432_v1  ;;  %v2773_v1 = vadd.f32 %v6819_v15, %v2689_v29  ;;  %v1201_v10 = vsel %vm864_vm1, %v1199_v51, %v1200_v62  ;;  %v8909_v15 = vunpack.c.h.b16 %v7098_v63  ;;  %v8910_v51 = vld [vmem:[#allocation9_spill] sm:$0xff] }
 0x208   : > { %3156 = vmatmul.bf16.gmra.mxu3 %v1376_v54  ;;  %v7543_v4 = vpop.f32.mrf.mxu1  ;;  %v1379_v54 = vor.u32 %v1377_v40, %v1375_v55  ;;  %v1123_v55 = vshll.u32 %v7523_v11, 16  ;;  %v1649_v36 = vunpack.c.h.b16 %v7424_v57  ;;  %v1655_v0 = vunpack.c.l.b16 %v1114_v13 }
 0x209   : > { %3102 = vmatmul.bf16.gmra.mxu2 %v7098_v63  ;;  %v7540_v7 = vadd.f32 %v7445_v28, %v2970_v35  ;;  %v1430_v28 = vrot.slane %v1428_v49, 1  ;;  %v1174_v37 = vpack.c.b16 %v8909_v15, %v1164_v19  ;;  %v1609_v56 = vunpack.c.l.b16 %v7560_v27 }
 0x20a   : > { %v1603_v40 = vunpack.c.l.b16 %v1379_v54  ;;  %v1138_v3 = vshll.u32 %v7549_v48, 16  ;;  %v7571_v19 = vrot.slane %v1123_v55, 1  ;;  %v2775_v22 = vadd.f32 %v8910_v51, %v2691_v9 }
 0x20b   : > { %v2856_v17 = vpop.f32.mrf.mxu3  ;;  %3018 = vmatmul.bf16.gmra.mxu1 %v1201_v10  ;;  %v7568_v35 = vor.u32 %v1430_v28, %v1426_v2  ;;  %v1202_v49 = vrot.slane %v1174_v37, 1  ;;  %v1934_v10 = vpack.c.b16 %v1655_v0, %v1649_v36  ;;  %v1203_v37 = vrot.slane %v7549_v48, 1  ;;  %v8911_v36 = vld [vmem:[#allocation7_spill] sm:$0xff] }
 0x20c   : > { %v7551_v47 = vadd.f32 %v2856_v17, %v2773_v1  ;;  %v7554_v61 = vpop.f32.mrf.mxu2  ;;  %v2887_v33 = vpop.f32.mrf.mxu0  ;;  %v7583_v1 = vld [vmem:[%s6405_s9 + $0xa8] sm:$0xf]  ;;  %v7586_v17 = vld [vmem:[%s6405_s9 + $0xb0] sm:$0xff]   ;;  %v7588_v13 = vrot.slane %v1138_v3, 1  ;;  %v1904_v2 = vpack.c.b16 %v1609_v56, %v1603_v40 }
 0x20d   : > { %v2888_v29 = vadd.f32 %v2887_v33, %v7029_v12  ;;  %v2610_v12 = vadd.f32 %v7260_v30, %v7357_v59  ;;  %v6000_v11 = vunpack.c.l.b16 %v7586_v17  ;;  %v8859_v58 = vunpack.c.l.b16 %v7583_v1 }
 0x20e   : > { %v1129_v59 = vor.u32 %v1127_v60, %v7571_v19  ;;  %v7600_v15 = vsel %vm683_vm0, %v7568_v35, %v7588_v13  ;;  %v1204_v56 = vsel %vm864_vm1, %v1202_v49, %v1203_v37  ;;  %v1674_v60 = vunpack.c.l.b16 %v1200_v62  ;;  %v5802_v62 = vld [vmem:[%s8827_s1 + $0x200] sm:$0xff] }
 0x20f   : > { %v2972_v63 = vadd.f32 %v7454_v32, %v2888_v29  ;;  %v1951_v55 = vpack.c.b16 %v6000_v11, %v8859_v58  ;;  %v1679_v29 = vunpack.c.l.b16 %v7600_v15  ;;  %v2694_v0 = vadd.f32 %v8911_v36, %v2610_v12  ;;  %3209 = vmatpush.bf16.msra.mxu0 %v5802_v62  ;;  %v5140_v62 = vld [vmem:[%s6405_s9 + $0x8c] sm:$0x1] }
 0x210   : > { %v7580_v32 = vpop.f32.mrf.mxu1  ;;  %v1673_v9 = vunpack.c.l.b16 %v1129_v59  ;;  %v1680_v51 = vunpack.c.l.b16 %v1204_v56  ;;  %v2612_v12 = vadd.f32 %v7260_v30, %v7391_v31  ;;  %v8913_v59 = vld [vmem:[#allocation10_spill] sm:$0xff] }
 0x211   : > { %v7577_v57 = vadd.f32 %v7464_v26, %v2972_v63  ;;  %v8912_v63 = vld [vmem:[#allocation13_spill] sm:$0xff] }
 0x212   : > { %v7611_v3 = vpack.c.b16 %v1679_v29, %v1673_v9  ;;  %v1950_v11 = vpack.c.b16 %v1680_v51, %v1674_v60  ;;  %v8916_v60 = vld [vmem:[#allocation14_spill] sm:$0xff] }
 0x213   : > { %v2858_v54 = vpop.f32.mrf.mxu3 }
 0x214   : > { %v7593_v26 = vadd.f32 %v2858_v54, %v2775_v22  ;;  %v7595_v28 = vpop.f32.mrf.mxu2  ;;  %v2890_v33 = vpop.f32.mrf.mxu0  ;;  %v1392_v22 = vshrl.u32 %v7500_v24, 16  ;;  %v1118_v54 = vshll.u32 %v7067_v23, 16 }
 0x215   : > { %v7608_v40 = vadd.f32 %v2890_v33, %v8912_v63  ;;  %v2778_v33 = vadd.f32 %v8913_v59, %v2694_v0  ;;  %v8915_v0 = vld [vmem:[#allocation8_spill] sm:$0xff] }
 0x216   : > { %v1120_v31 = vrot.slane %v1118_v54, 1  ;;  %v2696_v63 = vadd.f32 %v8915_v0, %v2612_v12  ;;  %v8917_v54 = vld [vmem:[#allocation11_spill] sm:$0xff]  ;;  %v5817_v12 = vld [vmem:[%s8829_s3 + $0x38] sm:$0xff] }
 0x217   : > { %2929 = vmatmul.bf16.gmra.mxu0 %v1934_v10  ;;  %4387 = vmatpush.bf16.msra.mxu1 %v5817_v12 }
 0x218   : > { %3161 = vmatmul.bf16.gmra.mxu3 %v1904_v2  ;;  %v7618_v36 = vpop.f32.mrf.mxu1  ;;  %v1394_v2 = vor.u32 %v1392_v22, %v7534_v21  ;;  %v5825_v21 = vld [vmem:[%s8829_s3 + $0x78] sm:$0xff]  ;;  %v1615_v22 = vunpack.c.h.b16 %v7560_v27 }
 0x219   : > { %3107 = vmatmul.bf16.gmra.mxu2 %v1951_v55  ;;  %v7629_v55 = vld [vmem:[%s6405_s9 + $0x90] sm:$0xff]  }
 0x21a   : > { %v8860_v30 = vshrl.u32 %v7629_v55, 16  ;;  %v1621_v59 = vunpack.c.l.b16 %v1394_v2  ;;  %4436 = vmatpush.bf16.msra.mxu2 %v5825_v21 }
 0x21b   : > { %v2861_v49 = vpop.f32.mrf.mxu3  ;;  %3023 = vmatmul.bf16.gmra.mxu1 %v1950_v11 }
 0x21c   : > { %v7623_v10 = vadd.f32 %v2861_v49, %v2778_v33  ;;  %v7626_v9 = vpop.f32.mrf.mxu2  ;;  %v2892_v29 = vpop.f32.mrf.mxu0  ;;  %v1121_v33 = vor.u32 %v1120_v31, %v8860_v30  ;;  %v2780_v49 = vadd.f32 %v8917_v54, %v2696_v63  ;;  %v1913_v31 = vpack.c.b16 %v1621_v59, %v1615_v22 }
 0x21d   : > { %8914 = vst [vmem:[#allocation9_spill] sm:$0xff] %v7626_v9  ;;  %v7634_v51 = vadd.f32 %v2892_v29, %v8916_v60  ;;  %v7650_v29 = vld [vmem:[%s6405_s9 + $0xb8] sm:$0xf]  ;;  %v8862_v60 = vunpack.c.h.b16 %v7586_v17  ;;  %v1281_v63 = vunpack.c.l.b16 %v5140_v62  ;;  %v1692_v22 = vunpack.c.l.b16 %v1203_v37 }
 0x21e   : > { %v8863_v27 = vunpack.c.l.b16 %v7650_v29  ;;  %v1126_v58 = vsel %vm683_vm0, %v1121_v33, %v7571_v19  ;;  %v1398_v59 = vshll.u32 %v7368_v25, 16  ;;  %v8921_v62 = vunpack.c.l.b16 %v7411_v53  ;;  %v5141_v19 = vld [vmem:[%s6405_s9 + $0x9c] sm:$0x1] }
 0x220   : > { %v7644_v11 = vpop.f32.mrf.mxu1  ;;  %v1960_v30 = vpack.c.b16 %v8863_v27, %v8862_v60  ;;  %v7670_v12 = vpack.c.b16 %v1281_v63, %v8921_v62  ;;  %v1400_v37 = vrot.slane %v1398_v59, 1  ;;  %v8924_v63 = vld [vmem:[#allocation17_spill] sm:$0xff] }
 0x221   : > { %8918 = vst [vmem:[#allocation7_spill] sm:$0xff] %v7644_v11 }
 0x222   : > { %v1403_v53 = vshll.u32 %v7670_v12, 16 }
 0x223   : > { %v2863_v0 = vpop.f32.mrf.mxu3 }
 0x224   : > { %v7654_v2 = vadd.f32 %v2863_v0, %v2780_v49  ;;  %v7656_v21 = vpop.f32.mrf.mxu2  ;;  %v2895_v54 = vpop.f32.mrf.mxu0  ;;  %v1686_v49 = vunpack.c.h.b16 %v1204_v56  ;;  %v1282_v56 = vunpack.c.l.b16 %v5141_v19 }
 0x225   : > { %8919 = vst [vmem:[#allocation13_spill] sm:$0xff] %v7656_v21  ;;  %v7665_v11 = vadd.f32 %v2895_v54, %v8920_v16 }
 0x226   : > { %v1959_v0 = vpack.c.b16 %v1692_v22, %v1686_v49  ;;  %v8925_v49 = vunpack.c.l.b16 %v7457_v8  ;;  %v8928_v8 = vld [vmem:[#allocation18_spill] sm:$0xff] }
 0x227   : > { %2934 = vmatmul.bf16.gmra.mxu0 %v1126_v58  ;;  %v1396_v58 = vshrl.u32 %v7368_v25, 16 }
 0x228   : > { %3166 = vmatmul.bf16.gmra.mxu3 %v1913_v31  ;;  %v7673_v33 = vpop.f32.mrf.mxu1  ;;  %v7687_v22 = vpack.c.b16 %v1282_v56, %v8925_v49  ;;  %v1142_v56 = vshrl.u32 %v7549_v48, 16  ;;  %v5824_v48 = vld [vmem:[%s8829_s3 + $0x70] sm:$0xff] }
 0x229   : > { %3112 = vmatmul.bf16.gmra.mxu2 %v1960_v30  ;;  %8922 = vst [vmem:[#allocation10_spill] sm:$0xff] %v7673_v33  ;;  %v1401_v54 = vor.u32 %v1400_v37, %v1396_v58  ;;  %v5142_v33 = vld [vmem:[%s6405_s9 + $0xac] sm:$0x1] }
 0x22a   : > { %v1418_v58 = vshll.u32 %v7687_v22, 16  ;;  %4437 = vmatpush.bf16.msra.mxu2 %v5824_v48 }
 0x22b   : > { %v3127_v21 = vpop.f32.mrf.mxu3  ;;  %3028 = vmatmul.bf16.gmra.mxu1 %v1959_v0 }
 0x22c   : > { %v7676_v60 = vadd.f32 %v3127_v21, %v7437_v14  ;;  %v7678_v16 = vpop.f32.mrf.mxu2  ;;  %v2897_v31 = vpop.f32.mrf.mxu0  ;;  %v1405_v14 = vrot.slane %v1403_v53, 1  ;;  %v1413_v21 = vshll.u32 %v7629_v55, 16  ;;  %v1407_v53 = vshrl.u32 %v7670_v12, 16 }
 0x22d   : > { %8923 = vst [vmem:[#allocation8_spill] sm:$0xff] %v7678_v16  ;;  %v7683_v30 = vadd.f32 %v2897_v31, %v8924_v63  ;;  %v1486_v16 = vrot.slane %v7196_v52, 1 }
 0x22e   : > { %v1406_v31 = vsel %vm683_vm0, %v1401_v54, %v1405_v14  ;;  %v1415_v63 = vrot.slane %v1413_v21, 1 }
 0x230   : > { %v7690_v62 = vpop.f32.mrf.mxu1 }
 0x231   : > { %8926 = vst [vmem:[#allocation14_spill] sm:$0xff] %v7690_v62 }
 0x233   : > { %v3129_v25 = vpop.f32.mrf.mxu3 }
 0x234   : > { %v7693_v59 = vadd.f32 %v3129_v25, %v7452_v20  ;;  %v7695_v19 = vpop.f32.mrf.mxu2  ;;  %v2900_v0 = vpop.f32.mrf.mxu0  ;;  %v8929_v20 = vshrl.u32 %v7629_v55, 16  ;;  %v1420_v25 = vrot.slane %v1418_v58, 1  ;;  %v1685_v58 = vunpack.c.h.b16 %v7600_v15 }
 0x235   : > { %8927 = vst [vmem:[#allocation11_spill] sm:$0xff] %v7695_v19  ;;  %v7700_v37 = vadd.f32 %v2900_v0, %v8928_v8  ;;  %v1144_v0 = vor.u32 %v1142_v56, %v7588_v13  ;;  %v1409_v8 = vor.u32 %v1407_v53, %v1405_v14  ;;  %v5816_v14 = vld [vmem:[%s8829_s3 + $0x30] sm:$0xff] }
 0x236   : > { %v1416_v49 = vor.u32 %v1415_v63, %v8929_v20  ;;  %4388 = vmatpush.bf16.msra.mxu1 %v5816_v14  ;;  %v6061_v14 = vld [vmem:[%s6405_s9 + $0x20] sm:$0xf0] }
 0x237   : > { %2939 = vmatmul.bf16.gmra.mxu0 %v7611_v3  ;;  %v1639_v20 = vunpack.c.l.b16 %v1409_v8  ;;  %v8936_v8 = vld [vmem:[#allocation20_spill] sm:$0xff] }
 0x238   : > { %3171 = vmatmul.bf16.gmra.mxu3 %v1406_v31  ;;  %v7707_v27 = vpop.f32.mrf.mxu1  ;;  %v1421_v55 = vsel %vm683_vm0, %v1416_v49, %v1420_v25  ;;  %v8932_v31 = vld [vmem:[#allocation19_spill] sm:$0xff] }
 0x239   : > { %8930 = vst [vmem:[#allocation15_spill] sm:$0xff] %v7707_v27  ;;  %v1645_v13 = vunpack.c.l.b16 %v1421_v55 }
 0x23b   : > { %v3132_v54 = vpop.f32.mrf.mxu3  ;;  %v1928_v48 = vpack.c.b16 %v1645_v13, %v1639_v20 }
 0x23c   : > { %v7710_v21 = vadd.f32 %v3132_v54, %v7481_v44  ;;  %v7713_v19 = vpop.f32.mrf.mxu2  ;;  %v2902_v3 = vpop.f32.mrf.mxu0  ;;  %v1691_v44 = vunpack.c.l.b16 %v1144_v0 }
 0x23d   : > { %8931 = vst [vmem:[#allocation17_spill] sm:$0xff] %v7713_v19  ;;  %v7720_v63 = vadd.f32 %v2902_v3, %v8932_v31  ;;  %v1422_v31 = vshrl.u32 %v7687_v22, 16  ;;  %v6062_v19 = vld [vmem:[%s6405_s9 + $0x20] sm:$0xe] }
 0x23e   : > { %v1958_v54 = vpack.c.b16 %v1691_v44, %v1685_v58  ;;  %v6063_v20 = vor.u32 %v6062_v19, %v6061_v14 }
 0x23f   : > { %8933 = vst [vmem:[#allocation18_spill] sm:$0xff] %v7720_v63  ;;  %v1424_v58 = vor.u32 %v1422_v31, %v1420_v25 }
 0x240   : > { %v7726_v53 = vpop.f32.mrf.mxu1  ;;  %v1485_v62 = vrot.slane %v6063_v20, 1 }
 0x241   : > { %8934 = vst [vmem:[#allocation19_spill] sm:$0xff] %v7726_v53 }
 0x243   : > { %v3134_v56 = vpop.f32.mrf.mxu3 }
 0x244   : > { %v7729_v49 = vadd.f32 %v3134_v56, %v7506_v34  ;;  %v2905_v15 = vpop.f32.mrf.mxu0  ;;  %v7731_v0 = vpop.f32.mrf.mxu2  ;;  %v5145_v56 = vld [vmem:[%s6405_s9 + $0x30] sm:$0xe] }
 0x245   : > { %8935 = vst [vmem:[#allocation32_spill] sm:$0xff] %v7731_v0  ;;  %v7734_v3 = vadd.f32 %v2905_v15, %v8936_v8  ;;  %v8939_v0 = vld [vmem:[#allocation22_spill] sm:$0xff]  ;;  %v1657_v8 = vunpack.c.l.b16 %v1424_v58  ;;  %v1466_v27 = vunpack.c.l.b16 %v5145_v56  ;;  %v8947_v56 = vunpack.c.l.b16 %v7583_v1 }
 0x247   : > { %8937 = vst [vmem:[#allocation20_spill] sm:$0xff] %v7734_v3  ;;  %2944 = vmatmul.bf16.gmra.mxu0 %v1958_v54 }
 0x248   : > { %3176 = vmatmul.bf16.gmra.mxu3 %v1928_v48  ;;  %v7742_v13 = vpop.f32.mrf.mxu1  ;;  %v1651_v48 = vunpack.c.h.b16 %v1421_v55  ;;  %v8944_v55 = vld [vmem:[#allocation23_spill] sm:$0xff] }
 0x249   : > { %8938 = vst [vmem:[#allocation33_spill] sm:$0xff] %v7742_v13 }
 0x24a   : > { %v1937_v19 = vpack.c.b16 %v1657_v8, %v1651_v48  ;;  %v8948_v48 = vld [vmem:[#allocation21_spill] sm:$0xff] }
 0x24b   : > { %v3137_v53 = vpop.f32.mrf.mxu3  ;;  %v1489_v8 = vrot.slane %v8948_v48, 1 }
 0x24c   : > { %v7740_v34 = vadd.f32 %v3137_v53, %v7540_v7  ;;  %v2907_v44 = vpop.f32.mrf.mxu0  ;;  %v7748_v54 = vpop.f32.mrf.mxu2  ;;  %v8942_v53 = vld [vmem:[#allocation12_spill] sm:$0xff] }
 0x24d   : > { %v7746_v15 = vadd.f32 %v2907_v44, %v8939_v0  ;;  %8941 = vst [vmem:[#allocation34_spill] sm:$0xff] %v7748_v54  ;;  %v8943_v31 = vunpack.c.h.b16 %v8942_v53  ;;  %v1283_v0 = vunpack.c.l.b16 %v5142_v33  ;;  %v1487_v54 = vsel %vm864_vm1, %v1485_v62, %v1486_v16  ;;  %v5823_v33 = vld [vmem:[%s8829_s3 + $0x68] sm:$0xff] }
 0x24e   : > { %4438 = vmatpush.bf16.msra.mxu2 %v5823_v33 }
 0x24f   : > { %8940 = vst [vmem:[#allocation22_spill] sm:$0xff] %v7746_v15  ;;  %v1476_v14 = vpack.c.b16 %v8943_v31, %v1466_v27  ;;  %v5143_v27 = vld [vmem:[%s6405_s9 + $0xbc] sm:$0x1]  ;;  %v8950_v31 = vld [vmem:[#allocation24_spill] sm:$0xff] }
 0x250   : > { %v7761_v20 = vpop.f32.mrf.mxu1  ;;  %v1284_v53 = vunpack.c.l.b16 %v5143_v27  ;;  %v8959_v15 = vld [vmem:[#allocation26_spill] sm:$0xff] }
 0x251   : > { %8946 = vst [vmem:[#allocation23_spill] sm:$0xff] %v7761_v20  ;;  %v1488_v52 = vrot.slane %v1476_v14, 1 }
 0x253   : > { %v3139_v7 = vpop.f32.mrf.mxu3  ;;  %v1490_v1 = vsel %vm864_vm1, %v1488_v52, %v1489_v8 }
 0x254   : > { %v7753_v25 = vadd.f32 %v3139_v7, %v7577_v57  ;;  %v2910_v44 = vpop.f32.mrf.mxu0  ;;  %v7765_v57 = vpack.c.b16 %v1283_v0, %v8947_v56  ;;  %v7768_v7 = vpop.f32.mrf.mxu2  ;;  %v5815_v0 = vld [vmem:[%s8829_s3 + $0x28] sm:$0xff]  ;;  %v8952_v56 = vunpack.c.l.b16 %v7650_v29 }
 0x255   : > { %v7759_v58 = vadd.f32 %v2910_v44, %v8944_v55  ;;  %8949 = vst [vmem:[#allocation21_spill] sm:$0xff] %v7768_v7  ;;  %v1532_v44 = vunpack.c.l.b16 %v1486_v16  ;;  %v1538_v55 = vunpack.c.l.b16 %v1490_v1  ;;  %4389 = vmatpush.bf16.msra.mxu1 %v5815_v0  ;;  %v1443_v7 = vshll.u32 %v7586_v17, 16 }
 0x256   : > { %v7786_v48 = vpack.c.b16 %v1284_v53, %v8952_v56  ;;  %v1441_v0 = vshrl.u32 %v7586_v17, 16  ;;  %v8955_v53 = vld [vmem:[#allocation25_spill] sm:$0xff]  ;;  %v1437_v56 = vshrl.u32 %v7765_v57, 16 }
 0x257   : > { %8945 = vst [vmem:[#allocation12_spill] sm:$0xff] %v7759_v58  ;;  %3210 = vmatmul.bf16.vlgmr.msra.gmra.mxu0 %v1487_v54  ;;  %v1433_v54 = vshll.u32 %v7765_v57, 16  ;;  %v1445_v13 = vrot.slane %v1443_v7, 1 }
 0x258   : > { %3181 = vmatmul.bf16.gmra.mxu3 %v1937_v19  ;;  %v7788_v33 = vpop.f32.mrf.mxu1  ;;  %v1448_v29 = vshll.u32 %v7786_v48, 16 }
 0x259   : > { %v1435_v27 = vrot.slane %v1433_v54, 1  ;;  %8953 = vst [vmem:[#allocation35_spill] sm:$0xff] %v7788_v33  ;;  %v1446_v33 = vor.u32 %v1445_v13, %v1441_v0  ;;  %v1550_v13 = vunpack.c.l.b16 %v1489_v8  ;;  %v5822_v8 = vld [vmem:[%s8829_s3 + $0x60] sm:$0xff] }
 0x25a   : > { %4439 = vmatpush.bf16.msra.mxu2 %v5822_v8 }
 0x25b   : > { %v7774_v62 = vpop.f32.mrf.mxu3  ;;  %v1436_v16 = vsel %vm683_vm0, %v7568_v35, %v1435_v27 }
 0x25c   : > { %v2912_v19 = vpop.f32.mrf.mxu0 }
 0x25d   : > { %v7779_v14 = vadd.f32 %v2912_v19, %v8950_v31  ;;  %v7793_v19 = vpop.f32.mrf.mxu2  ;;  %v1857_v31 = vpack.c.b16 %v1538_v55, %v1532_v44  ;;  %v1439_v55 = vor.u32 %v1437_v56, %v1435_v27 }
 0x25e   : > { %8954 = vst [vmem:[#allocation36_spill] sm:$0xff] %v7793_v19 }
 0x25f   : > { %8951 = vst [vmem:[#allocation24_spill] sm:$0xff] %v7779_v14  ;;  %v1450_v14 = vrot.slane %v1448_v29, 1 }
 0x260   : > { %v7805_v44 = vpop.f32.mrf.mxu1 }
 0x261   : > { %8957 = vst [vmem:[#allocation37_spill] sm:$0xff] %v7805_v44  ;;  %v1451_v58 = vsel %vm683_vm0, %v1446_v33, %v1450_v14  ;;  %v8962_v33 = vld [vmem:[#allocation28_spill] sm:$0xff] }
 0x263   : > { %v7791_v52 = vpop.f32.mrf.mxu3 }
 0x264   : > { %v2915_v20 = vpop.f32.mrf.mxu0 }
 0x265   : > { %v7800_v54 = vadd.f32 %v2915_v20, %v8955_v53  ;;  %v7808_v7 = vpop.f32.mrf.mxu2  ;;  %v1675_v20 = vunpack.c.l.b16 %v1439_v55  ;;  %v6065_v55 = vld [vmem:[%s6405_s9 + $0x40] sm:$0xe] }
 0x266   : > { %8958 = vst [vmem:[#allocation38_spill] sm:$0xff] %v7808_v7 }
 0x267   : > { %8956 = vst [vmem:[#allocation25_spill] sm:$0xff] %v7800_v54  ;;  %3215 = vmatmul.bf16.gmra.mxu0 %v1857_v31  ;;  %v1681_v31 = vunpack.c.l.b16 %v1451_v58 }
 0x268   : > { %3186 = vmatmul.bf16.gmra.mxu3 %v1436_v16  ;;  %v1544_v16 = vunpack.c.h.b16 %v1490_v1  ;;  %v7815_v27 = vpop.f32.mrf.mxu1  ;;  %v6064_v1 = vld [vmem:[%s6405_s9 + $0x40] sm:$0xf0] }
 0x269   : > { %v1952_v29 = vpack.c.b16 %v1681_v31, %v1675_v20  ;;  %8961 = vst [vmem:[#allocation39_spill] sm:$0xff] %v7815_v27 }
 0x26a   : > { %v1866_v53 = vpack.c.b16 %v1550_v13, %v1544_v16  ;;  %v6066_v16 = vor.u32 %v6065_v55, %v6064_v1  ;;  %v5147_v13 = vld [vmem:[%s6405_s9 + $0x50] sm:$0xe] }
 0x26b   : > { %v7803_v19 = vpop.f32.mrf.mxu3 }
 0x26c   : > { %v2917_v35 = vpop.f32.mrf.mxu0  ;;  %v1491_v8 = vrot.slane %v6066_v16, 1  ;;  %v8975_v16 = vld [vmem:[#allocation31_spill] sm:$0xff] }
 0x26d   : > { %v7811_v3 = vadd.f32 %v2917_v35, %v8959_v15  ;;  %v7820_v7 = vpop.f32.mrf.mxu2  ;;  %v1452_v15 = vshrl.u32 %v7786_v48, 16 }
 0x26e   : > { %8964 = vst [vmem:[#allocation40_spill] sm:$0xff] %v7820_v7  ;;  %v1687_v7 = vunpack.c.h.b16 %v1451_v58 }
 0x26f   : > { %8960 = vst [vmem:[#allocation26_spill] sm:$0xff] %v7811_v3  ;;  %v1454_v20 = vor.u32 %v1452_v15, %v1450_v14  ;;  %v8968_v3 = vld [vmem:[#allocation27_spill] sm:$0xff] }
 0x270   : > { %v1492_v54 = vrot.slane %v8968_v3, 1  ;;  %v1495_v3 = vrot.slane %v7345_v6, 1 }
 0x271   : > { %v1693_v27 = vunpack.c.l.b16 %v1454_v20 }
 0x273   : > { %v7813_v0 = vpop.f32.mrf.mxu3  ;;  %v1961_v63 = vpack.c.b16 %v1693_v27, %v1687_v7  ;;  %v5833_v7 = vld [vmem:[%s8829_s3 + $0xb8] sm:$0xff] }
 0x274   : > { %v2920_v44 = vpop.f32.mrf.mxu0  ;;  %4485 = vmatpush.bf16.msra.mxu3 %v5833_v7 }
 0x275   : > { %v7818_v56 = vadd.f32 %v2920_v44, %v8962_v33  ;;  %v5814_v44 = vld [vmem:[%s8829_s3 + $0x20] sm:$0xff]  ;;  %v7837_v33 = vpop.f32.mrf.mxu1  ;;  %v7840_v14 = vpop.f32.mrf.mxu2 }
 0x276   : > { %4390 = vmatpush.bf16.msra.mxu1 %v5814_v44  ;;  %8969 = vst [vmem:[#allocation27_spill] sm:$0xff] %v7840_v14  ;;  %v8972_v44 = vld [vmem:[#allocation30_spill] sm:$0xff] }
 0x277   : > { %8963 = vst [vmem:[#allocation28_spill] sm:$0xff] %v7818_v56  ;;  %3220 = vmatmul.bf16.gmra.mxu0 %v1866_v53  ;;  %v1468_v56 = vunpack.c.l.b16 %v5147_v13  ;;  %v1568_v13 = vunpack.c.l.b16 %v1492_v54 }
 0x278   : > { %3191 = vmatmul.bf16.gmra.mxu3 %v1952_v29  ;;  %v8966_v29 = vld [vmem:[#allocation29_spill] sm:$0xff] }
 0x279   : > { %8967 = vst [vmem:[#allocation29_spill] sm:$0xff] %v7837_v33 }
 0x27b   : > { %v7828_v35 = vpop.f32.mrf.mxu3 }
 0x27c   : > { %8965 = vst [vmem:[#allocation41_spill] sm:$0xff] %v7828_v35  ;;  %v2922_v31 = vpop.f32.mrf.mxu0  ;;  %v8970_v35 = vld [vmem:[#allocation16_spill] sm:$0xff] }
 0x27d   : > { %v7835_v53 = vadd.f32 %v2922_v31, %v8966_v29  ;;  %v8971_v1 = vunpack.c.h.b16 %v8970_v35  ;;  %v1493_v31 = vsel %vm864_vm1, %v1491_v8, %v1492_v54  ;;  %v7850_v20 = vpop.f32.mrf.mxu1  ;;  %v5813_v54 = vld [vmem:[%s8829_s3 + $0x18] sm:$0xff] }
 0x27e   : > { %8973 = vst [vmem:[#allocation16_spill] sm:$0xff] %v7850_v20  ;;  %4391 = vmatpush.bf16.msra.mxu1 %v5813_v54 }
 0x27f   : > { %v1478_v55 = vpack.c.b16 %v8971_v1, %v1468_v56  ;;  %v7858_v56 = vpop.f32.mrf.mxu2 }
 0x280   : > { %8974 = vst [vmem:[#allocation30_spill] sm:$0xff] %v7858_v56 }
 0x281   : > { %v1494_v58 = vrot.slane %v1478_v55, 1 }
 0x283   : > { %v7842_v15 = vpop.f32.mrf.mxu3 }
 0x284   : > { %v2925_v9 = vpop.f32.mrf.mxu0 }
 0x285   : > { %v7848_v29 = vadd.f32 %v2925_v9, %v8972_v44  ;;  %v1496_v9 = vsel %vm864_vm1, %v1494_v58, %v1495_v3  ;;  %v7866_v6 = vpop.f32.mrf.mxu1  ;;  %v5821_v58 = vld [vmem:[%s8829_s3 + $0x58] sm:$0xff] }
 0x286   : > { %v1574_v8 = vunpack.c.l.b16 %v1496_v9  ;;  %8976 = vst [vmem:[#allocation31_spill] sm:$0xff] %v7866_v6  ;;  %4440 = vmatpush.bf16.msra.mxu2 %v5821_v58 }
 0x287   : > { %3225 = vmatmul.bf16.gmra.mxu0 %v1493_v31  ;;  %v7868_v44 = vpop.f32.mrf.mxu2 }
 0x288   : > { %3196 = vmatmul.bf16.gmra.mxu3 %v1961_v63  ;;  %v1881_v55 = vpack.c.b16 %v1574_v8, %v1568_v13  ;;  %8977 = vst [vmem:[#allocation42_spill] sm:$0xff] %v7868_v44  ;;  %v1580_v8 = vunpack.c.h.b16 %v1496_v9  ;;  %v6068_v9 = vld [vmem:[%s6405_s9 + $0x60] sm:$0xe] }
 0x28b   : > { %v7856_v27 = vpop.f32.mrf.mxu3 }
 0x28c   : > { %v2927_v35 = vpop.f32.mrf.mxu0 }
 0x28d   : > { %v7862_v63 = vadd.f32 %v2927_v35, %v8975_v16  ;;  %v7881_v16 = vpop.f32.mrf.mxu1 }
 0x28e   : > { %8979 = vst [vmem:[#allocation44_spill] sm:$0xff] %v7881_v16 }
 0x28f   : > { %v7886_v13 = vpop.f32.mrf.mxu2 }
 0x290   : > { %8981 = vst [vmem:[#allocation46_spill] sm:$0xff] %v7886_v13  ;;  %v6067_v13 = vld [vmem:[%s6405_s9 + $0x60] sm:$0xf0] }
 0x293   : > { %v7864_v1 = vpop.f32.mrf.mxu3 }
 0x294   : > { %v2930_v31 = vpop.f32.mrf.mxu0 }
 0x295   : > { %v7871_v20 = vadd.f32 %v2930_v31, %v7442_v38  ;;  %v7893_v54 = vpop.f32.mrf.mxu1 }
 0x296   : > { %8983 = vst [vmem:[#allocation48_spill] sm:$0xff] %v7893_v54 }
 0x297   : > { %8978 = vst [vmem:[#allocation43_spill] sm:$0xff] %v7871_v20  ;;  %3230 = vmatmul.bf16.gmra.mxu0 %v1881_v55  ;;  %v1586_v55 = vunpack.c.l.b16 %v1495_v3 }
 0x299   : > { %v1890_v58 = vpack.c.b16 %v1586_v55, %v1580_v8  ;;  %v6069_v8 = vor.u32 %v6068_v9, %v6067_v13  ;;  %v5149_v55 = vld [vmem:[%s6405_s9 + $0x70] sm:$0xe] }
 0x29b   : > { %v7879_v7 = vpop.f32.mrf.mxu3 }
 0x29c   : > { %v2932_v35 = vpop.f32.mrf.mxu0 }
 0x29d   : > { %v7884_v38 = vadd.f32 %v2932_v35, %v7462_v41  ;;  %v5832_v41 = vld [vmem:[%s8829_s3 + $0xb0] sm:$0xff]  ;;  %v7898_v35 = vpop.f32.mrf.mxu2  ;;  %v3024_v54 = vpop.f32.mrf.mxu1 }
 0x29e   : > { %8984 = vst [vmem:[#allocation49_spill] sm:$0xff] %v7898_v35  ;;  %4486 = vmatpush.bf16.msra.mxu3 %v5832_v41  ;;  %v5820_v41 = vld [vmem:[%s8829_s3 + $0x50] sm:$0xff]  ;;  %v8986_v35 = vunpack.c.h.b16 %v7270_v18  ;;  %v5831_v18 = vld [vmem:[%s8829_s3 + $0xa8] sm:$0xff] }
 0x29f   : > { %8980 = vst [vmem:[#allocation45_spill] sm:$0xff] %v7884_v38  ;;  %4441 = vmatpush.bf16.msra.mxu2 %v5820_v41  ;;  %v5811_v41 = vld [vmem:[%s8829_s3 + $0x8] sm:$0xff] }
 0x2a2   : > { %4487 = vmatpush.bf16.msra.mxu3 %v5831_v18 }
 0x2a3   : > { %v7888_v31 = vpop.f32.mrf.mxu3 }
 0x2a4   : > { %v2935_v44 = vpop.f32.mrf.mxu0 }
 0x2a5   : > { %v7891_v6 = vadd.f32 %v2935_v44, %v7486_v42  ;;  %v1470_v44 = vunpack.c.l.b16 %v5149_v55  ;;  %v3108_v56 = vpop.f32.mrf.mxu2  ;;  %v7923_v14 = vpop.f32.mrf.mxu1 }
 0x2a6   : > { %8987 = vst [vmem:[#allocation51_spill] sm:$0xff] %v7923_v14 }
 0x2a7   : > { %8982 = vst [vmem:[#allocation47_spill] sm:$0xff] %v7891_v6  ;;  %3235 = vmatmul.bf16.gmra.mxu0 %v1890_v58  ;;  %v1497_v58 = vrot.slane %v6069_v8, 1  ;;  %v1498_v6 = vrot.slane %v7477_v43, 1  ;;  %v1480_v20 = vpack.c.b16 %v8986_v35, %v1470_v44  ;;  %v1501_v43 = vrot.slane %v7500_v24, 1 }
 0x2a9   : > { %v1499_v9 = vsel %vm864_vm1, %v1497_v58, %v1498_v6  ;;  %v1500_v8 = vrot.slane %v1480_v20, 1  ;;  %v5812_v20 = vld [vmem:[%s8829_s3 + $0x10] sm:$0xff]  ;;  %v5830_v58 = vld [vmem:[%s8829_s3 + $0xa0] sm:$0xff] }
 0x2aa   : > { %4392 = vmatpush.bf16.msra.mxu1 %v5812_v20  ;;  %4488 = vmatpush.bf16.msra.mxu3 %v5830_v58  ;;  %v5828_v20 = vld [vmem:[%s8829_s3 + $0x90] sm:$0xff]  ;;  %v5827_v58 = vld [vmem:[%s8829_s3 + $0x88] sm:$0xff] }
 0x2ab   : > { %v7902_v3 = vpop.f32.mrf.mxu3 }
 0x2ac   : > { %v2937_v16 = vpop.f32.mrf.mxu0 }
 0x2ad   : > { %v7906_v42 = vadd.f32 %v2937_v16, %v7512_v46  ;;  %v7928_v44 = vpop.f32.mrf.mxu2 }
 0x2ae   : > { %8988 = vst [vmem:[#allocation52_spill] sm:$0xff] %v7928_v44  ;;  %4393 = vmatpush.bf16.msra.mxu1 %v5811_v41 }
 0x2af   : > { %8985 = vst [vmem:[#allocation50_spill] sm:$0xff] %v7906_v42 }
 0x2b3   : > { %v7909_v38 = vpop.f32.mrf.mxu3 }
 0x2b4   : > { %v2940_v13 = vpop.f32.mrf.mxu0 }
 0x2b5   : > { %v2941_v46 = vadd.f32 %v2940_v13, %v7551_v47  ;;  %v1502_v47 = vsel %vm864_vm1, %v1500_v8, %v1501_v43  ;;  %v3113_v18 = vpop.f32.mrf.mxu2 }
 0x2b7   : > { %v3025_v16 = vadd.f32 %v3024_v54, %v2941_v46  ;;  %3240 = vmatmul.bf16.gmra.mxu0 %v1499_v9  ;;  %v1610_v54 = vunpack.c.l.b16 %v1502_v47 }
 0x2b9   : > { %v7919_v55 = vadd.f32 %v3108_v56, %v3025_v16  ;;  %v1604_v56 = vunpack.c.l.b16 %v1498_v6  ;;  %v3029_v6 = vpop.f32.mrf.mxu1  ;;  %v5810_v16 = vld [vmem:[%s8829_s3] sm:$0xff] }
 0x2ba   : > { %4394 = vmatpush.bf16.msra.mxu1 %v5810_v16  ;;  %v5826_v16 = vld [vmem:[%s8829_s3 + $0x80] sm:$0xff] }
 0x2bb   : > { %v7921_v42 = vpop.f32.mrf.mxu3  ;;  %v1905_v9 = vpack.c.b16 %v1610_v54, %v1604_v56 }
 0x2bc   : > { %v2942_v35 = vpop.f32.mrf.mxu0 }
 0x2bd   : > { %v7935_v24 = vadd.f32 %v2942_v35, %v7593_v26  ;;  %v5829_v26 = vld [vmem:[%s8829_s3 + $0x98] sm:$0xff] }
 0x2be   : > { %4489 = vmatpush.bf16.msra.mxu3 %v5829_v26  ;;  %v3327_v26 = vlaneseq }
 0x2bf   : > { %8989 = vst [vmem:[#allocation53_spill] sm:$0xff] %v7935_v24  ;;  %v1504_v24 = vrot.slane %v7670_v12, 1 }
 0x2c2   : > { %4490 = vmatpush.bf16.msra.mxu3 %v5828_v20 }
 0x2c3   : > { %v7943_v13 = vpop.f32.mrf.mxu3 }
 0x2c4   : > { %v2945_v46 = vpop.f32.mrf.mxu0 }
 0x2c5   : > { %v2946_v8 = vadd.f32 %v2945_v46, %v7623_v10  ;;  %v1616_v46 = vunpack.c.h.b16 %v1502_v47 }
 0x2c6   : > { %4491 = vmatpush.bf16.msra.mxu3 %v5827_v58 }
 0x2c7   : > { %v3030_v35 = vadd.f32 %v3029_v6, %v2946_v8  ;;  %3245 = vmatmul.bf16.gmra.mxu0 %v1905_v9  ;;  %v5819_v9 = vld [vmem:[%s8829_s3 + $0x48] sm:$0xff]  ;;  %v1622_v6 = vunpack.c.l.b16 %v1501_v43  ;;  %v7973_v8 = vstv %s5442_s17 }
 0x2c8   : > { %4442 = vmatpush.bf16.msra.mxu2 %v5819_v9  ;;  %vm3331_vm2 = vcmp.ge.s32.totalorder %v7973_v8, 0  ;;  %vm3341_vm3 = vcmp.lt.s32.totalorder %v7973_v8, 16  ;;  %v6070_v9 = vld [vmem:[%s6405_s9 + $0x80] sm:$0xf0] }
 0x2c9   : > { %v7955_v56 = vadd.f32 %v3113_v18, %v3030_v35  ;;  %v7980_v35 = vshrl.u32 %v3327_v26, 7  ;;  %v1914_v47 = vpack.c.b16 %v1622_v6, %v1616_v46  ;;  %vm7985_vm4 = vmand %vm3331_vm2, %vm3341_vm3  ;;  %v6071_v26 = vld [vmem:[%s6405_s9 + $0x80] sm:$0xe] }
 0x2ca   : > { %4492 = vmatpush.bf16.msra.mxu3 %v5826_v16  ;;  %v6072_v16 = vor.u32 %v6071_v26, %v6070_v9 }
 0x2cb   : > { %v7957_v54 = vpop.f32.mrf.mxu3  ;;  %vm3361_vm5 = vcmp.ge.s32.totalorder %v7980_v35, 1  ;;  %v8001_v44 = vadd.s32 16, %v7980_v35 }
 0x2cc   : > { %v2947_v41 = vpop.f32.mrf.mxu0  ;;  %vm3364_vm6 = vmand %vm7985_vm4, %vm3361_vm5  ;;  %v1503_v14 = vrot.slane %v6072_v16, 1 }
 0x2cd   : > { %v7963_v10 = vadd.f32 %v2947_v41, %v7654_v2  ;;  %v5818_v2 = vld [vmem:[%s8829_s3 + $0x40] sm:$0xff]  ;;  %vm3396_vm7 = vcmp.le.s32.totalorder %v8001_v44, 16 }
 0x2ce   : > { %4443 = vmatpush.bf16.msra.mxu2 %v5818_v2  ;;  %vm3399_vm8 = vmand %vm7985_vm4, %vm3396_vm7  ;;  %v5870_v44 = vld [vmem:[%s8829_s3 + $0x1e0] sm:$0xff] }
 0x2cf   : > { %8990 = vst [vmem:[#allocation54_spill] sm:$0xff] %v7963_v10 }
 0x2d3   : > { %v7978_v18 = vpop.f32.mrf.mxu3 }
 0x2d4   : > { %8991 = vst [vmem:[#allocation55_spill] sm:$0xff] %v7978_v18  ;;  %v3211_v43 = vpop.f32.mrf.mxu0 }
 0x2d5   : > { %v3212_v20 = vadd.f32 %v3211_v43, %v7676_v60  ;;  %v5151_v60 = vld [vmem:[%s6405_s9 + $0x90] sm:$0xe] }
 0x2d7   : > { %3250 = vmatmul.bf16.gmra.mxu0 %v1914_v47  ;;  %v3286_v41 = vmax.f32 %v3212_v20, 0.0  ;;  %v1472_v47 = vunpack.c.l.b16 %v5151_v60  ;;  %v1505_v60 = vsel %vm864_vm1, %v1503_v14, %v1504_v24 }
 0x2d9   : > { %v3487_v2 = vsel %vm3364_vm6, %v3286_v41, 0.0  ;;  %v8996_v41 = vunpack.c.h.b16 %v7067_v23  ;;  %v3318_v23 = vadd.s32 1, %v7973_v8 }
 0x2da   : > { %v3517_v20 = vpack.c.bf16 %v3487_v2, %v3487_v2 }
 0x2db   : > { %v7996_v46 = vpop.f32.mrf.mxu3  ;;  %vm3332_vm9 = vcmp.ge.s32.totalorder %v3318_v23, 0  ;;  %vm3342_vm10 = vcmp.lt.s32.totalorder %v3318_v23, 16 }
 0x2dc   : > { %8994 = vst [vmem:[#allocation56_spill] sm:$0xff] %v7996_v46  ;;  %v3213_v6 = vpop.f32.mrf.mxu0  ;;  %v3563_v9 = vunpack.c.l.b16 %v3517_v20  ;;  %vm8023_vm11 = vmand %vm3332_vm9, %vm3342_vm10 }
 0x2dd   : > { %v3214_v43 = vadd.f32 %v3213_v6, %v7693_v59  ;;  %v1482_v59 = vpack.c.b16 %v8996_v41, %v1472_v47  ;;  %vm3367_vm12 = vmand %vm8023_vm11, %vm3361_vm5 }
 0x2de   : > { %vm3402_vm13 = vmand %vm8023_vm11, %vm3396_vm7 }
 0x2df   : > { %v3287_v10 = vmax.f32 %v3214_v43, 0.0 }
 0x2e1   : > { %v3488_v18 = vsel %vm7985_vm4, %v3287_v10, 0.0  ;;  %v1506_v10 = vrot.slane %v1482_v59, 1 }
 0x2e2   : > { %v3518_v33 = vpack.c.bf16 %v3488_v18, %v3488_v18  ;;  %v1507_v18 = vrot.slane %v7687_v22, 1  ;;  %v1640_v22 = vunpack.c.l.b16 %v1504_v24 }
 0x2e3   : > { %v8006_v46 = vpop.f32.mrf.mxu3 }
 0x2e4   : > { %8995 = vst [vmem:[#allocation57_spill] sm:$0xff] %v8006_v46  ;;  %v3564_v26 = vunpack.c.l.b16 %v3518_v33  ;;  %v3216_v6 = vpop.f32.mrf.mxu0  ;;  %v1508_v58 = vsel %vm864_vm1, %v1506_v10, %v1507_v18 }
 0x2e5   : > { %v3217_v16 = vadd.f32 %v3216_v6, %v7710_v21  ;;  %v1646_v6 = vunpack.c.l.b16 %v1508_v58 }
 0x2e6   : > { %v3579_v2 = vpack.c.b16 %v3564_v26, %v3563_v9 }
 0x2e7   : > { %v3288_v12 = vmax.f32 %v3217_v16, 0.0  ;;  %3255 = vmatmul.bf16.gmra.mxu0 %v1505_v60 }
 0x2e8   : > { %4395 = vmatmul.bf16.vlgmr.msra.gmra.mxu1 %v3579_v2  ;;  %v3622_v14 = vshll.u32 %v3579_v2, 16 }
 0x2e9   : > { %v3489_v33 = vsel %vm3399_vm8, %v3288_v12, 0.0  ;;  %v3723_v12 = vrot.slane %v3579_v2, 1 }
 0x2ea   : > { %v3519_v43 = vpack.c.bf16 %v3489_v33, %v3489_v33  ;;  %v3624_v59 = vrot.slane %v3622_v14, 1  ;;  %v3620_v33 = vshrl.u32 %v3579_v2, 16  ;;  %v1929_v14 = vpack.c.b16 %v1646_v6, %v1640_v22 }
 0x2eb   : > { %v8019_v47 = vpop.f32.mrf.mxu3 }
 0x2ec   : > { %8997 = vst [vmem:[#allocation58_spill] sm:$0xff] %v8019_v47  ;;  %v3603_v21 = vunpack.c.l.b16 %v3519_v43  ;;  %v3218_v20 = vpop.f32.mrf.mxu0  ;;  %v3625_v23 = vor.u32 %v3624_v59, %v3620_v33 }
 0x2ed   : > { %v3219_v41 = vadd.f32 %v3218_v20, %v7729_v49 }
 0x2ee   : > { %v3611_v9 = vpack.c.b16 %v3603_v21, %v3603_v21 }
 0x2ef   : > { %v3289_v43 = vmax.f32 %v3219_v41, 0.0 }
 0x2f0   : > { %v3627_v60 = vshll.u32 %v3611_v9, 16  ;;  %v3724_v16 = vrot.slane %v3611_v9, 1 }
 0x2f1   : > { %v3490_v20 = vsel %vm3367_vm12, %v3289_v43, 0.0  ;;  %v1652_v43 = vunpack.c.h.b16 %v1508_v58 }
 0x2f2   : > { %v3629_v47 = vrot.slane %v3627_v60, 1  ;;  %v3725_v10 = vsel %vm864_vm1, %v3723_v12, %v3724_v16  ;;  %v3520_v9 = vpack.c.bf16 %v3490_v20, %v3490_v20  ;;  %v3320_v20 = vadd.s32 3, %v7973_v8 }
 0x2f3   : > { %v8031_v49 = vpop.f32.mrf.mxu3  ;;  %4493 = vmatmul.bf16.vlgmr.msra.gmra.mxu3 %v3725_v10  ;;  %v1658_v10 = vunpack.c.l.b16 %v1507_v18  ;;  %v2977_v18 = vadd.f32 %v7508_v45, %v7634_v51 }
 0x2f4   : > { %9000 = vst [vmem:[#allocation59_spill] sm:$0xff] %v8031_v49  ;;  %v3221_v24 = vpop.f32.mrf.mxu0  ;;  %v3630_v21 = vsel %vm683_vm0, %v3625_v23, %v3629_v47  ;;  %v3565_v59 = vunpack.c.l.b16 %v3520_v9  ;;  %v2975_v47 = vadd.f32 %v7483_v39, %v7608_v40  ;;  %vm3334_vm6 = vcmp.ge.s32.totalorder %v3320_v20, 0 }
 0x2f5   : > { %v3222_v2 = vadd.f32 %v3221_v24, %v7740_v34  ;;  %4444 = vmatmul.bf16.vlgmr.msra.gmra.mxu2 %v3630_v21  ;;  %v3061_v45 = vadd.f32 %v7515_v50, %v2977_v18  ;;  %vm3344_vm8 = vcmp.lt.s32.totalorder %v3320_v20, 16  ;;  %v9008_v20 = vld [vmem:[#allocation18_spill] sm:$0xff] }
 0x2f6   : > { %vm8156_vm9 = vmand %vm3334_vm6, %vm3344_vm8 }
 0x2f7   : > { %v3290_v41 = vmax.f32 %v3222_v2, 0.0  ;;  %3260 = vmatmul.bf16.gmra.mxu0 %v1929_v14  ;;  %v1938_v14 = vpack.c.b16 %v1658_v10, %v1652_v43  ;;  %v3145_v43 = vadd.f32 %v7791_v52, %v3061_v45  ;;  %v8089_v10 = vld [vmem:[%s8829_s3 + $0x1b0] sm:$0xff]  ;;  %vm3373_vm10 = vmand %vm8156_vm9, %vm3361_vm5 }
 0x2f9   : > { %v3491_v60 = vsel %vm8023_vm11, %v3290_v41, 0.0  ;;  %vm3408_vm11 = vmand %vm8156_vm9, %vm3396_vm7 }
 0x2fa   : > { %v3521_v46 = vpack.c.bf16 %v3491_v60, %v3491_v60 }
 0x2fb   : > { %v3192_v49 = vpop.f32.mrf.mxu3 }
 0x2fc   : > { %v8039_v16 = vadd.f32 %v3192_v49, %v7919_v55  ;;  %v3566_v22 = vunpack.c.l.b16 %v3521_v46  ;;  %v3223_v6 = vpop.f32.mrf.mxu0  ;;  %v3319_v55 = vadd.s32 2, %v7973_v8  ;;  %v3059_v46 = vadd.f32 %v7488_v5, %v2975_v47 }
 0x2fd   : > { %v3224_v34 = vadd.f32 %v3223_v6, %v7753_v25 }
 0x2fe   : > { %v8044_v12 = vpack.c.b16 %v3566_v22, %v3565_v59  ;;  %v3143_v23 = vadd.f32 %v7774_v62, %v3059_v46  ;;  %vm3333_vm14 = vcmp.ge.s32.totalorder %v3319_v55, 0  ;;  %vm3343_vm15 = vcmp.lt.s32.totalorder %v3319_v55, 16  ;;  %v8066_v62 = vld [vmem:[%s8829_s3 + $0x1b8] sm:$0xff]  ;;  %v6073_v59 = vld [vmem:[%s6405_s9 + $0xa0] sm:$0xf0] }
 0x2ff   : > { %v3291_v33 = vmax.f32 %v3224_v34, 0.0  ;;  %vm8059_vm2 = vmand %vm3333_vm14, %vm3343_vm15  ;;  %v6074_v22 = vld [vmem:[%s6405_s9 + $0xa0] sm:$0xe]  ;;  %4681 = vmatpush.bf16.msrb.mxu0 %v8066_v62 }
 0x300   : > { %4400 = vmatmul.bf16.gmra.mxu1 %v8044_v12  ;;  %v3634_v25 = vshll.u32 %v8044_v12, 16  ;;  %v3726_v2 = vrot.slane %v8044_v12, 1  ;;  %v3632_v9 = vshrl.u32 %v8044_v12, 16  ;;  %vm3370_vm3 = vmand %vm8059_vm2, %vm3361_vm5 }
 0x301   : > { %v3492_v49 = vsel %vm3402_vm13, %v3291_v33, 0.0  ;;  %vm3405_vm4 = vmand %vm8059_vm2, %vm3396_vm7 }
 0x302   : > { %v3522_v39 = vpack.c.bf16 %v3492_v49, %v3492_v49  ;;  %v3636_v21 = vrot.slane %v3634_v25, 1  ;;  %v6075_v49 = vor.u32 %v6074_v22, %v6073_v59  ;;  %v5153_v25 = vld [vmem:[%s6405_s9 + $0xb0] sm:$0xe]  ;;  %v5841_v22 = vld [vmem:[%s8829_s3 + $0xf8] sm:$0xff] }
 0x303   : > { %v8053_v40 = vpop.f32.mrf.mxu3  ;;  %4682 = vmatpush.bf16.msrb.mxu0 %v8089_v10  ;;  %4534 = vmatpush.bf16.msrb.mxu1 %v5841_v22  ;;  %v8181_v22 = vld [vmem:[%s8829_s3 + $0x180] sm:$0xff] }
 0x304   : > { %v3604_v26 = vunpack.c.l.b16 %v3522_v39  ;;  %v3226_v24 = vpop.f32.mrf.mxu0  ;;  %v3637_v34 = vor.u32 %v3636_v21, %v3632_v9  ;;  %v2980_v39 = vadd.f32 %v7543_v4, %v7665_v11  ;;  %v1509_v18 = vrot.slane %v6075_v49, 1 }
 0x305   : > { %v3227_v58 = vadd.f32 %v3226_v24, %v3143_v23 }
 0x306   : > { %v3612_v5 = vpack.c.b16 %v3604_v26, %v3604_v26  ;;  %v1474_v26 = vunpack.c.l.b16 %v5153_v25  ;;  %v3064_v4 = vadd.f32 %v7554_v61, %v2980_v39  ;;  %v8148_v25 = vld [vmem:[%s8829_s3 + $0x190] sm:$0xff] }
 0x307   : > { %3265 = vmatmul.bf16.gmra.mxu0 %v1938_v14  ;;  %v3292_v51 = vmax.f32 %v3227_v58, 0.0  ;;  %v8102_v14 = vld [vmem:[%s8829_s3 + $0x1a8] sm:$0xff]  ;;  %v1510_v58 = vrot.slane %v7765_v57, 1 }
 0x308   : > { %v3727_v41 = vrot.slane %v3612_v5, 1  ;;  %v3639_v60 = vshll.u32 %v3612_v5, 16  ;;  %4683 = vmatpush.bf16.msrb.mxu0 %v8102_v14  ;;  %v3148_v21 = vadd.f32 %v7803_v19, %v3064_v4 }
 0x309   : > { %v3493_v52 = vsel %vm3370_vm3, %v3292_v51, 0.0  ;;  %v1511_v61 = vsel %vm864_vm1, %v1509_v18, %v1510_v58  ;;  %v2982_v51 = vadd.f32 %v7580_v32, %v7683_v30  ;;  %v8136_v32 = vld [vmem:[%s8829_s3 + $0x198] sm:$0xff]  ;;  %v1676_v4 = vunpack.c.l.b16 %v1510_v58 }
 0x30a   : > { %v8079_v47 = vsel %vm864_vm1, %v3726_v2, %v3727_v41  ;;  %v3641_v33 = vrot.slane %v3639_v60, 1  ;;  %v3523_v24 = vpack.c.bf16 %v3493_v52, %v3493_v52  ;;  %v8113_v2 = vld [vmem:[%s8829_s3 + $0x1a0] sm:$0xff]  ;;  %v9003_v41 = vunpack.c.h.b16 %v7586_v17  ;;  %v5849_v17 = vld [vmem:[%s8829_s3 + $0x138] sm:$0xff] }
 0x30b   : > { %v3197_v6 = vpop.f32.mrf.mxu3  ;;  %4498 = vmatmul.bf16.gmra.mxu3 %v8079_v47  ;;  %4583 = vmatpush.bf16.msrb.mxu2 %v5849_v17 }
 0x30c   : > { %v8083_v50 = vadd.f32 %v3197_v6, %v7955_v56  ;;  %v3228_v55 = vpop.f32.mrf.mxu0  ;;  %v8092_v46 = vsel %vm683_vm0, %v3637_v34, %v3641_v33  ;;  %v1484_v9 = vpack.c.b16 %v9003_v41, %v1474_v26  ;;  %v3567_v60 = vunpack.c.l.b16 %v3523_v24  ;;  %4684 = vmatpush.bf16.msrb.mxu0 %v8113_v2 }
 0x30d   : > { %v3229_v23 = vadd.f32 %v3228_v55, %v3145_v43  ;;  %4449 = vmatmul.bf16.gmra.mxu2 %v8092_v46  ;;  %v1513_v34 = vrot.slane %v7786_v48, 1  ;;  %v3066_v33 = vadd.f32 %v7595_v28, %v2982_v51  ;;  %v9007_v51 = vld [vmem:[#allocation41_spill] sm:$0xff]  ;;  %v5847_v48 = vld [vmem:[%s8829_s3 + $0x128] sm:$0xff] }
 0x30e   : > { %v1512_v30 = vrot.slane %v1484_v9, 1  ;;  %v9006_v9 = vld [vmem:[#allocation9_spill] sm:$0xff] }
 0x30f   : > { %v3293_v56 = vmax.f32 %v3229_v23, 0.0  ;;  %v3150_v39 = vadd.f32 %v7813_v0, %v3066_v33  ;;  %v9009_v33 = vld [vmem:[#allocation7_spill] sm:$0xff] }
 0x310   : > { %4685 = vmatpush.bf16.msrb.mxu0 %v8136_v32  ;;  %v1514_v28 = vsel %vm864_vm1, %v1512_v30, %v1513_v34 }
 0x311   : > { %v3494_v11 = vsel %vm8059_vm2, %v3293_v56, 0.0  ;;  %v2985_v56 = vadd.f32 %v7618_v36, %v7700_v37 }
 0x312   : > { %v3524_v5 = vpack.c.bf16 %v3494_v11, %v3494_v11  ;;  %v1682_v11 = vunpack.c.l.b16 %v1514_v28 }
 0x314   : > { %v3568_v57 = vunpack.c.l.b16 %v3524_v5  ;;  %v3231_v45 = vpop.f32.mrf.mxu0  ;;  %4686 = vmatpush.bf16.msrb.mxu0 %v8148_v25  ;;  %v8163_v5 = vld [vmem:[%s8829_s3 + $0x188] sm:$0xff]  ;;  %v1953_v17 = vpack.c.b16 %v1682_v11, %v1676_v4 }
 0x315   : > { %v3232_v59 = vadd.f32 %v3231_v45, %v3148_v21 }
 0x316   : > { %v8121_v19 = vpack.c.b16 %v3568_v57, %v3567_v60  ;;  %v3069_v60 = vadd.f32 %v9006_v9, %v2985_v56  ;;  %v9012_v9 = vld [vmem:[#allocation10_spill] sm:$0xff] }
 0x317   : > { %v3294_v6 = vmax.f32 %v3232_v59, 0.0  ;;  %3270 = vmatmul.bf16.gmra.mxu0 %v1511_v61 }
 0x318   : > { %4405 = vmatmul.bf16.gmra.mxu1 %v8121_v19  ;;  %v3646_v49 = vshll.u32 %v8121_v19, 16  ;;  %v3729_v41 = vrot.slane %v8121_v19, 1  ;;  %v3644_v37 = vshrl.u32 %v8121_v19, 16  ;;  %4687 = vmatpush.bf16.msrb.mxu0 %v8163_v5  ;;  %v3153_v59 = vadd.f32 %v9007_v51, %v3069_v60 }
 0x319   : > { %v3495_v43 = vsel %vm3405_vm4, %v3294_v6, 0.0  ;;  %v1688_v51 = vunpack.c.h.b16 %v1514_v28  ;;  %v9014_v28 = vld [vmem:[#allocation22_spill] sm:$0xff] }
 0x31a   : > { %v3525_v55 = vpack.c.bf16 %v3495_v43, %v3495_v43  ;;  %v3648_v24 = vrot.slane %v3646_v49, 1  ;;  %v2987_v43 = vadd.f32 %v9009_v33, %v9008_v20 }
 0x31c   : > { %v3605_v52 = vunpack.c.l.b16 %v3525_v55  ;;  %v3233_v23 = vpop.f32.mrf.mxu0  ;;  %v3649_v45 = vor.u32 %v3648_v24, %v3644_v37  ;;  %4688 = vmatpush.bf16.msrb.mxu0 %v8181_v22  ;;  %v9011_v37 = vld [vmem:[#allocation20_spill] sm:$0xff] }
 0x31d   : > { %v3234_v26 = vadd.f32 %v3233_v23, %v3150_v39  ;;  %v5848_v39 = vld [vmem:[%s8829_s3 + $0x130] sm:$0xff]  ;;  %v2990_v60 = vadd.f32 %v9012_v9, %v9011_v37 }
 0x31e   : > { %v3613_v0 = vpack.c.b16 %v3605_v52, %v3605_v52  ;;  %v5840_v52 = vld [vmem:[%s8829_s3 + $0xf0] sm:$0xff]  ;;  %4584 = vmatpush.bf16.msrb.mxu2 %v5848_v39 }
 0x31f   : > { %v3295_v57 = vmax.f32 %v3234_v26, 0.0  ;;  %4535 = vmatpush.bf16.msrb.mxu1 %v5840_v52  ;;  %v9010_v26 = vld [vmem:[#allocation13_spill] sm:$0xff]  ;;  %v9015_v52 = vld [vmem:[#allocation14_spill] sm:$0xff] }
 0x320   : > { %v3651_v21 = vshll.u32 %v3613_v0, 16  ;;  %v3730_v36 = vrot.slane %v3613_v0, 1  ;;  %v3071_v0 = vadd.f32 %v9010_v26, %v2987_v43 }
 0x321   : > { %v3496_v55 = vsel %vm3373_vm10, %v3295_v57, 0.0 }
 0x322   : > { %v8174_v58 = vsel %vm864_vm1, %v3729_v41, %v3730_v36  ;;  %v3653_v61 = vrot.slane %v3651_v21, 1  ;;  %v3526_v56 = vpack.c.bf16 %v3496_v55, %v3496_v55  ;;  %v3155_v11 = vadd.f32 %v7842_v15, %v3071_v0  ;;  %4585 = vmatpush.bf16.msrb.mxu2 %v5847_v48 }
 0x323   : > { %4503 = vmatmul.bf16.gmra.mxu3 %v8174_v58  ;;  %v3321_v15 = vadd.s32 4, %v7973_v8 }
 0x324   : > { %v3236_v6 = vpop.f32.mrf.mxu0  ;;  %v8184_v30 = vsel %vm683_vm0, %v3649_v45, %v3653_v61  ;;  %v3569_v21 = vunpack.c.l.b16 %v3526_v56 }
 0x325   : > { %v3237_v49 = vadd.f32 %v3236_v6, %v3153_v59  ;;  %4454 = vmatmul.bf16.gmra.mxu2 %v8184_v30  ;;  %v1694_v59 = vunpack.c.l.b16 %v1513_v34  ;;  %vm3335_vm12 = vcmp.ge.s32.totalorder %v3321_v15, 0  ;;  %vm3345_vm13 = vcmp.lt.s32.totalorder %v3321_v15, 16  ;;  %v5839_v34 = vld [vmem:[%s8829_s3 + $0xe8] sm:$0xff] }
 0x326   : > { %4536 = vmatpush.bf16.msrb.mxu1 %v5839_v34  ;;  %vm8223_vm14 = vmand %vm3335_vm12, %vm3345_vm13  ;;  %v9019_v15 = vld [vmem:[#allocation12_spill] sm:$0xff] }
 0x327   : > { %v3296_v23 = vmax.f32 %v3237_v49, 0.0  ;;  %3275 = vmatmul.bf16.gmra.mxu0 %v1953_v17  ;;  %v9013_v17 = vld [vmem:[#allocation8_spill] sm:$0xff]  ;;  %v1962_v49 = vpack.c.b16 %v1694_v59, %v1688_v51  ;;  %vm3376_vm15 = vmand %vm8223_vm14, %vm3361_vm5 }
 0x328   : > { %v3074_v6 = vadd.f32 %v9013_v17, %v2990_v60  ;;  %v9020_v17 = vld [vmem:[#allocation15_spill] sm:$0xff]  ;;  %vm3411_vm2 = vmand %vm8223_vm14, %vm3396_vm7 }
 0x329   : > { %v3497_v24 = vsel %vm8156_vm9, %v3296_v23, 0.0  ;;  %v2992_v23 = vadd.f32 %v9015_v52, %v9014_v28 }
 0x32a   : > { %v3527_v4 = vpack.c.bf16 %v3497_v24, %v3497_v24  ;;  %v3158_v55 = vadd.f32 %v7856_v27, %v3074_v6  ;;  %v2995_v6 = vadd.f32 %v9020_v17, %v9019_v15  ;;  %v9025_v15 = vld [vmem:[#allocation25_spill] sm:$0xff] }
 0x32b   : > { %v9026_v17 = vld [vmem:[#allocation33_spill] sm:$0xff] }
 0x32c   : > { %v3570_v41 = vunpack.c.l.b16 %v3527_v4  ;;  %v3238_v36 = vpop.f32.mrf.mxu0 }
 0x32d   : > { %v3239_v57 = vadd.f32 %v3238_v36, %v3155_v11 }
 0x32e   : > { %v8202_v45 = vpack.c.b16 %v3570_v41, %v3569_v21  ;;  %v9018_v41 = vld [vmem:[#allocation11_spill] sm:$0xff] }
 0x32f   : > { %v3297_v61 = vmax.f32 %v3239_v57, 0.0  ;;  %v3076_v36 = vadd.f32 %v9018_v41, %v2992_v23  ;;  %v9022_v23 = vld [vmem:[#allocation24_spill] sm:$0xff] }
 0x330   : > { %4410 = vmatmul.bf16.gmra.mxu1 %v8202_v45  ;;  %v3658_v43 = vshll.u32 %v8202_v45, 16  ;;  %v3732_v24 = vrot.slane %v8202_v45, 1  ;;  %v3656_v11 = vshrl.u32 %v8202_v45, 16  ;;  %v9024_v41 = vld [vmem:[#allocation32_spill] sm:$0xff] }
 0x331   : > { %v3498_v20 = vsel %vm3408_vm11, %v3297_v61, 0.0  ;;  %v3160_v61 = vadd.f32 %v7864_v1, %v3076_v36 }
 0x332   : > { %v3528_v33 = vpack.c.bf16 %v3498_v20, %v3498_v20  ;;  %v3660_v0 = vrot.slane %v3658_v43, 1 }
 0x334   : > { %v3606_v18 = vunpack.c.l.b16 %v3528_v33  ;;  %v3241_v39 = vpop.f32.mrf.mxu0  ;;  %v3661_v60 = vor.u32 %v3660_v0, %v3656_v11 }
 0x335   : > { %v3242_v56 = vadd.f32 %v3241_v39, %v3158_v55 }
 0x336   : > { %v3614_v26 = vpack.c.b16 %v3606_v18, %v3606_v18 }
 0x337   : > { %3280 = vmatmul.bf16.gmra.mxu0 %v1962_v49  ;;  %v3298_v37 = vmax.f32 %v3242_v56, 0.0  ;;  %v9021_v49 = vld [vmem:[#allocation17_spill] sm:$0xff]  ;;  %v9023_v56 = vld [vmem:[#allocation19_spill] sm:$0xff] }
 0x338   : > { %v3733_v4 = vrot.slane %v3614_v26, 1  ;;  %v3663_v21 = vshll.u32 %v3614_v26, 16  ;;  %v3079_v18 = vadd.f32 %v9021_v49, %v2995_v6  ;;  %v2997_v26 = vadd.f32 %v9023_v56, %v9022_v23 }
 0x339   : > { %v3499_v20 = vsel %vm3376_vm15, %v3298_v37, 0.0  ;;  %v3000_v6 = vadd.f32 %v9026_v17, %v9025_v15 }
 0x33a   : > { %v8235_v9 = vsel %vm864_vm1, %v3732_v24, %v3733_v4  ;;  %v3665_v57 = vrot.slane %v3663_v21, 1  ;;  %v3529_v55 = vpack.c.bf16 %v3499_v20, %v3499_v20  ;;  %v3163_v48 = vadd.f32 %v7879_v7, %v3079_v18  ;;  %v5846_v4 = vld [vmem:[%s8829_s3 + $0x120] sm:$0xff] }
 0x33b   : > { %4508 = vmatmul.bf16.gmra.mxu3 %v8235_v9  ;;  %v5838_v7 = vld [vmem:[%s8829_s3 + $0xe0] sm:$0xff]  ;;  %v3322_v21 = vadd.s32 5, %v7973_v8  ;;  %4586 = vmatpush.bf16.msrb.mxu2 %v5846_v4  ;;  %v3081_v36 = vadd.f32 %v9024_v41, %v2997_v26  ;;  %v9030_v4 = vld [vmem:[#allocation26_spill] sm:$0xff] }
 0x33c   : > { %v3243_v51 = vpop.f32.mrf.mxu0  ;;  %v8240_v59 = vsel %vm683_vm0, %v3661_v60, %v3665_v57  ;;  %v3571_v34 = vunpack.c.l.b16 %v3529_v55  ;;  %4537 = vmatpush.bf16.msrb.mxu1 %v5838_v7  ;;  %v9031_v7 = vld [vmem:[#allocation23_spill] sm:$0xff]  ;;  %v5844_v55 = vld [vmem:[%s8829_s3 + $0x110] sm:$0xff] }
 0x33d   : > { %v3244_v33 = vadd.f32 %v3243_v51, %v3160_v61  ;;  %4459 = vmatmul.bf16.gmra.mxu2 %v8240_v59  ;;  %v3165_v57 = vadd.f32 %v7888_v31, %v3081_v36  ;;  %vm3336_vm3 = vcmp.ge.s32.totalorder %v3322_v21, 0  ;;  %vm3346_vm4 = vcmp.lt.s32.totalorder %v3322_v21, 16  ;;  %v5845_v36 = vld [vmem:[%s8829_s3 + $0x118] sm:$0xff] }
 0x33e   : > { %vm8271_vm6 = vmand %vm3336_vm3, %vm3346_vm4 }
 0x33f   : > { %v3299_v43 = vmax.f32 %v3244_v33, 0.0  ;;  %vm3379_vm8 = vmand %vm8271_vm6, %vm3361_vm5  ;;  %4587 = vmatpush.bf16.msrb.mxu2 %v5845_v36 }
 0x340   : > { %vm3414_vm9 = vmand %vm8271_vm6, %vm3396_vm7 }
 0x341   : > { %v3500_v1 = vsel %vm8223_vm14, %v3299_v43, 0.0 }
 0x342   : > { %v3530_v39 = vpack.c.bf16 %v3500_v1, %v3500_v1 }
 0x343   : > { %4588 = vmatpush.bf16.msrb.mxu2 %v5844_v55 }
 0x344   : > { %v3572_v28 = vunpack.c.l.b16 %v3530_v39  ;;  %v3246_v52 = vpop.f32.mrf.mxu0  ;;  %v9029_v39 = vld [vmem:[#allocation34_spill] sm:$0xff] }
 0x345   : > { %v3247_v0 = vadd.f32 %v3246_v52, %v3163_v48  ;;  %v3084_v48 = vadd.f32 %v9029_v39, %v3000_v6  ;;  %v3323_v39 = vadd.s32 6, %v7973_v8 }
 0x346   : > { %v8251_v24 = vpack.c.b16 %v3572_v28, %v3571_v34 }
 0x347   : > { %v3300_v11 = vmax.f32 %v3247_v0, 0.0  ;;  %4689 = vmatmul.bf16.vlgmr.msrb.gmra.mxu0 %v8121_v19  ;;  %v3168_v56 = vadd.f32 %v7902_v3, %v3084_v48  ;;  %v5837_v3 = vld [vmem:[%s8829_s3 + $0xd8] sm:$0xff]  ;;  %vm3337_vm10 = vcmp.ge.s32.totalorder %v3323_v39, 0  ;;  %vm3347_vm11 = vcmp.lt.s32.totalorder %v3323_v39, 16 }
 0x348   : > { %4415 = vmatmul.bf16.gmra.mxu1 %v8251_v24  ;;  %v3670_v60 = vshll.u32 %v8251_v24, 16  ;;  %v3735_v18 = vrot.slane %v8251_v24, 1  ;;  %v3668_v31 = vshrl.u32 %v8251_v24, 16  ;;  %vm8325_vm12 = vmand %vm3337_vm10, %vm3347_vm11 }
 0x349   : > { %v3501_v27 = vsel %vm3411_vm2, %v3300_v11, 0.0  ;;  %v3002_v11 = vadd.f32 %v9031_v7, %v9030_v4  ;;  %4538 = vmatpush.bf16.msrb.mxu1 %v5837_v3  ;;  %v5836_v7 = vld [vmem:[%s8829_s3 + $0xd0] sm:$0xff]  ;;  %vm3382_vm13 = vmand %vm8325_vm12, %vm3361_vm5 }
 0x34a   : > { %v3531_v37 = vpack.c.bf16 %v3501_v27, %v3501_v27  ;;  %v3672_v43 = vrot.slane %v3670_v60, 1  ;;  %v9032_v60 = vld [vmem:[#allocation21_spill] sm:$0xff]  ;;  %vm3417_vm14 = vmand %vm8325_vm12, %vm3396_vm7 }
 0x34c   : > { %v3607_v61 = vunpack.c.l.b16 %v3531_v37  ;;  %v3248_v51 = vpop.f32.mrf.mxu0  ;;  %v3673_v52 = vor.u32 %v3672_v43, %v3668_v31  ;;  %v9034_v43 = vld [vmem:[#allocation35_spill] sm:$0xff] }
 0x34d   : > { %v3249_v20 = vadd.f32 %v3248_v51, %v3165_v57  ;;  %v3086_v57 = vadd.f32 %v9032_v60, %v3002_v11  ;;  %v9036_v11 = vld [vmem:[#allocation37_spill] sm:$0xff]  ;;  %4539 = vmatpush.bf16.msrb.mxu1 %v5836_v7 }
 0x34e   : > { %v3615_v33 = vpack.c.b16 %v3607_v61, %v3607_v61 }
 0x34f   : > { %v3301_v34 = vmax.f32 %v3249_v20, 0.0  ;;  %v3170_v15 = vadd.f32 %v7909_v38, %v3086_v57  ;;  %v9035_v38 = vld [vmem:[#allocation36_spill] sm:$0xff] }
 0x350   : > { %v3675_v49 = vshll.u32 %v3615_v33, 16  ;;  %v3736_v1 = vrot.slane %v3615_v33, 1  ;;  %v9033_v33 = vld [vmem:[#allocation28_spill] sm:$0xff] }
 0x351   : > { %v3502_v21 = vsel %vm3379_vm8, %v3301_v34, 0.0 }
 0x352   : > { %v8283_v28 = vsel %vm864_vm1, %v3735_v18, %v3736_v1  ;;  %v3677_v23 = vrot.slane %v3675_v49, 1  ;;  %v3532_v37 = vpack.c.bf16 %v3502_v21, %v3502_v21  ;;  %v3005_v49 = vadd.f32 %v9034_v43, %v9033_v33  ;;  %v5857_v33 = vld [vmem:[%s8829_s3 + $0x178] sm:$0xff]  ;;  %v8345_v43 = vpop.f32.mrf.mxu1 }
 0x353   : > { %4513 = vmatmul.bf16.gmra.mxu3 %v8283_v28  ;;  %v3007_v21 = vadd.f32 %v9036_v11, %v7835_v53  ;;  %v8367_v11 = vld [vmem:[%s8830_s4] ss:$0 sm:$0xff] }
 0x354   : > { %v3251_v26 = vpop.f32.mrf.mxu0  ;;  %v8288_v0 = vsel %vm683_vm0, %v3673_v52, %v3677_v23  ;;  %v3573_v17 = vunpack.c.l.b16 %v3532_v37  ;;  %v3089_v48 = vadd.f32 %v9035_v38, %v3005_v49  ;;  %4632 = vmatpush.bf16.msrb.mxu3 %v5857_v33 }
 0x355   : > { %v3252_v41 = vadd.f32 %v3251_v26, %v3168_v56  ;;  %4464 = vmatmul.bf16.gmra.mxu2 %v8288_v0 }
 0x356   : > { %v3173_v56 = vadd.f32 %v7921_v42, %v3089_v48  ;;  %v5835_v42 = vld [vmem:[%s8829_s3 + $0xc8] sm:$0xff] }
 0x357   : > { %v3302_v27 = vmax.f32 %v3252_v41, 0.0  ;;  %4694 = vmatmul.bf16.gmra.mxu0 %v8202_v45  ;;  %4540 = vmatpush.bf16.msrb.mxu1 %v5835_v42 }
 0x359   : > { %v3503_v61 = vsel %vm8271_vm6, %v3302_v27, 0.0 }
 0x35a   : > { %v3533_v51 = vpack.c.bf16 %v3503_v61, %v3503_v61  ;;  %v9039_v61 = vld [vmem:[#allocation38_spill] sm:$0xff] }
 0x35c   : > { %v3574_v6 = vunpack.c.l.b16 %v3533_v51  ;;  %v3253_v20 = vpop.f32.mrf.mxu0  ;;  %v3091_v51 = vadd.f32 %v9039_v61, %v3007_v21  ;;  %v5855_v21 = vld [vmem:[%s8829_s3 + $0x168] sm:$0xff] }
 0x35d   : > { %v3254_v18 = vadd.f32 %v3253_v20, %v3170_v15 }
 0x35e   : > { %v8306_v1 = vpack.c.b16 %v3574_v6, %v3573_v17  ;;  %v3175_v20 = vadd.f32 %v7943_v13, %v3091_v51 }
 0x35f   : > { %v3303_v31 = vmax.f32 %v3254_v18, 0.0 }
 0x360   : > { %4420 = vmatmul.bf16.gmra.mxu1 %v8306_v1  ;;  %v3682_v23 = vshll.u32 %v8306_v1, 16  ;;  %v3738_v27 = vrot.slane %v8306_v1, 1  ;;  %v3680_v60 = vshrl.u32 %v8306_v1, 16 }
 0x361   : > { %v3504_v34 = vsel %vm3414_vm9, %v3303_v31, 0.0  ;;  %v9040_v31 = vld [vmem:[#allocation39_spill] sm:$0xff] }
 0x362   : > { %v3534_v52 = vpack.c.bf16 %v3504_v34, %v3504_v34  ;;  %v3684_v3 = vrot.slane %v3682_v23, 1  ;;  %v3010_v39 = vadd.f32 %v9040_v31, %v7848_v29  ;;  %v5856_v34 = vld [vmem:[%s8829_s3 + $0x170] sm:$0xff]  ;;  %v8361_v29 = vpop.f32.mrf.mxu3 }
 0x363   : > { %4633 = vmatpush.bf16.msrb.mxu3 %v5856_v34 }
 0x364   : > { %v3608_v26 = vunpack.c.l.b16 %v3534_v52  ;;  %v3256_v4 = vpop.f32.mrf.mxu0  ;;  %v3685_v17 = vor.u32 %v3684_v3, %v3680_v60  ;;  %v8356_v52 = vpop.f32.mrf.mxu2 }
 0x365   : > { %v3257_v41 = vadd.f32 %v3256_v4, %v3173_v56  ;;  %v9041_v56 = vld [vmem:[#allocation40_spill] sm:$0xff] }
 0x366   : > { %v3616_v36 = vpack.c.b16 %v3608_v26, %v3608_v26  ;;  %v3094_v26 = vadd.f32 %v9041_v56, %v3010_v39 }
 0x367   : > { %4699 = vmatmul.bf16.gmra.mxu0 %v8251_v24  ;;  %v3304_v53 = vmax.f32 %v3257_v41, 0.0  ;;  %4634 = vmatpush.bf16.msrb.mxu3 %v5855_v21  ;;  %v9046_v21 = vld [vmem:[#allocation16_spill] sm:$0xff] }
 0x368   : > { %v3739_v37 = vrot.slane %v3616_v36, 1  ;;  %v3687_v57 = vshll.u32 %v3616_v36, 16  ;;  %v3178_v7 = vadd.f32 %v7957_v54, %v3094_v26  ;;  %v4396_v36 = vpop.f32.mrf.mxu1 }
 0x369   : > { %v3505_v38 = vsel %vm3382_vm13, %v3304_v53, 0.0  ;;  %v4397_v54 = vadd.f32 %v8367_v11, %v4396_v36  ;;  %v5854_v53 = vld [vmem:[%s8829_s3 + $0x160] sm:$0xff] }
 0x36a   : > { %v8338_v15 = vsel %vm864_vm1, %v3738_v27, %v3739_v37  ;;  %v3689_v6 = vrot.slane %v3687_v57, 1  ;;  %v3535_v23 = vpack.c.bf16 %v3505_v38, %v3505_v38  ;;  %v9042_v37 = vld [vmem:[#allocation29_spill] sm:$0xff] }
 0x36b   : > { %4518 = vmatmul.bf16.gmra.mxu3 %v8338_v15  ;;  %v3012_v60 = vadd.f32 %v9042_v37, %v7862_v63  ;;  %v9058_v37 = vld [vmem:[#allocation58_spill] sm:$0xff] }
 0x36c   : > { %v3258_v49 = vpop.f32.mrf.mxu0  ;;  %v8348_v18 = vsel %vm683_vm0, %v3685_v17, %v3689_v6  ;;  %v3575_v41 = vunpack.c.l.b16 %v3535_v23  ;;  %v3324_v17 = vadd.s32 7, %v7973_v8  ;;  %v5843_v6 = vld [vmem:[%s8829_s3 + $0x108] sm:$0xff]  ;;  %4635 = vmatpush.bf16.msrb.mxu3 %v5854_v53  ;;  %v5853_v23 = vld [vmem:[%s8829_s3 + $0x158] sm:$0xff] }
 0x36d   : > { %v3259_v48 = vadd.f32 %v3258_v49, %v3175_v20  ;;  %4469 = vmatmul.bf16.gmra.mxu2 %v8348_v18  ;;  %v9043_v20 = vld [vmem:[#allocation27_spill] sm:$0xff] }
 0x36e   : > { %v3096_v33 = vadd.f32 %v9043_v20, %v3012_v60  ;;  %4589 = vmatpush.bf16.msrb.mxu2 %v5843_v6  ;;  %vm3338_vm15 = vcmp.ge.s32.totalorder %v3324_v17, 0  ;;  %vm3348_vm2 = vcmp.lt.s32.totalorder %v3324_v17, 16  ;;  %v5852_v60 = vld [vmem:[%s8829_s3 + $0x150] sm:$0xff] }
 0x36f   : > { %v3305_v13 = vmax.f32 %v3259_v48, 0.0  ;;  %vm8406_vm3 = vmand %vm3338_vm15, %vm3348_vm2 }
 0x370   : > { %4636 = vmatpush.bf16.msrb.mxu3 %v5853_v23  ;;  %vm3385_vm4 = vmand %vm8406_vm3, %vm3361_vm5  ;;  %v9052_v23 = vld [vmem:[#allocation31_spill] sm:$0xff] }
 0x371   : > { %v3506_v4 = vsel %vm8325_vm12, %v3305_v13, 0.0  ;;  %v9044_v13 = vld [vmem:[#allocation55_spill] sm:$0xff]  ;;  %vm3420_vm6 = vmand %vm8406_vm3, %vm3396_vm7 }
 0x372   : > { %v3536_v55 = vpack.c.bf16 %v3506_v4, %v3506_v4  ;;  %v3180_v34 = vadd.f32 %v9044_v13, %v3096_v33 }
 0x374   : > { %v3576_v3 = vunpack.c.l.b16 %v3536_v55  ;;  %v3261_v27 = vpop.f32.mrf.mxu0  ;;  %v5834_v55 = vld [vmem:[%s8829_s3 + $0xc0] sm:$0xff]  ;;  %4637 = vmatpush.bf16.msrb.mxu3 %v5852_v60 }
 0x375   : > { %v3262_v57 = vadd.f32 %v3261_v27, %v3178_v7  ;;  %v9045_v7 = vld [vmem:[#allocation43_spill] sm:$0xff]  ;;  %4541 = vmatpush.bf16.msrb.mxu1 %v5834_v55 }
 0x376   : > { %v8374_v61 = vpack.c.b16 %v3576_v3, %v3575_v41  ;;  %v4494_v38 = vpop.f32.mrf.mxu3  ;;  %v3015_v41 = vadd.f32 %v9046_v21, %v9045_v7  ;;  %v5842_v7 = vld [vmem:[%s8829_s3 + $0x100] sm:$0xff] }
 0x377   : > { %v3306_v51 = vmax.f32 %v3262_v57, 0.0  ;;  %4704 = vmatmul.bf16.gmra.mxu0 %v8306_v1  ;;  %4590 = vmatpush.bf16.msrb.mxu2 %v5842_v7 }
 0x378   : > { %4425 = vmatmul.bf16.gmra.mxu1 %v8374_v61  ;;  %v4445_v63 = vpop.f32.mrf.mxu2  ;;  %v3694_v48 = vshll.u32 %v8374_v61, 16  ;;  %v3692_v53 = vshrl.u32 %v8374_v61, 16 }
 0x379   : > { %v3507_v49 = vsel %vm3417_vm14, %v3306_v51, 0.0  ;;  %v4446_v31 = vadd.f32 %v4445_v63, %v4397_v54  ;;  %v3741_v54 = vrot.slane %v8374_v61, 1  ;;  %v9049_v63 = vld [vmem:[#allocation30_spill] sm:$0xff] }
 0x37a   : > { %v3537_v39 = vpack.c.bf16 %v3507_v49, %v3507_v49  ;;  %v3696_v27 = vrot.slane %v3694_v48, 1  ;;  %v3099_v17 = vadd.f32 %v9049_v63, %v3015_v41  ;;  %v9050_v49 = vld [vmem:[#allocation56_spill] sm:$0xff]  ;;  %v5850_v41 = vld [vmem:[%s8829_s3 + $0x140] sm:$0xff] }
 0x37b   : > { %v8399_v56 = vadd.f32 %v4494_v38, %v4446_v31  ;;  %v8428_v38 = vpop.f32.mrf.mxu1 }
 0x37c   : > { %v3609_v26 = vunpack.c.l.b16 %v3537_v39  ;;  %v3263_v4 = vpop.f32.mrf.mxu0  ;;  %v3697_v20 = vor.u32 %v3696_v27, %v3692_v53  ;;  %v3183_v31 = vadd.f32 %v9050_v49, %v3099_v17  ;;  %v5851_v39 = vld [vmem:[%s8829_s3 + $0x148] sm:$0xff]  ;;  %v9053_v27 = vld [vmem:[#allocation42_spill] sm:$0xff]  ;;  %v9054_v53 = vld [vmem:[#allocation57_spill] sm:$0xff] }
 0x37d   : > { %v3264_v36 = vadd.f32 %v3263_v4, %v3180_v34  ;;  %v9051_v34 = vld [vmem:[#allocation45_spill] sm:$0xff]  ;;  %4638 = vmatpush.bf16.msrb.mxu3 %v5851_v39  ;;  %v9055_v49 = vld [vmem:[#allocation47_spill] sm:$0xff] }
 0x37e   : > { %v3617_v3 = vpack.c.b16 %v3609_v26, %v3609_v26  ;;  %v3017_v26 = vadd.f32 %v9052_v23, %v9051_v34 }
 0x37f   : > { %v3307_v6 = vmax.f32 %v3264_v36, 0.0 }
 0x380   : > { %v3699_v57 = vshll.u32 %v3617_v3, 16  ;;  %v3742_v51 = vrot.slane %v3617_v3, 1  ;;  %v8443_v3 = vpop.f32.mrf.mxu2  ;;  %v3101_v60 = vadd.f32 %v9053_v27, %v3017_v26 }
 0x381   : > { %v3508_v4 = vsel %vm3385_vm4, %v3307_v6, 0.0  ;;  %4639 = vmatpush.bf16.msrb.mxu3 %v5850_v41 }
 0x382   : > { %v8421_v42 = vsel %vm864_vm1, %v3741_v54, %v3742_v51  ;;  %v3701_v33 = vrot.slane %v3699_v57, 1  ;;  %v3538_v36 = vpack.c.bf16 %v3508_v4, %v3508_v4  ;;  %v8448_v54 = vpop.f32.mrf.mxu3  ;;  %v3185_v63 = vadd.f32 %v9054_v53, %v3101_v60 }
 0x383   : > { %4523 = vmatmul.bf16.gmra.mxu3 %v8421_v42  ;;  %v4401_v6 = vpop.f32.mrf.mxu1  ;;  %v3325_v4 = vadd.s32 8, %v7973_v8 }
 0x384   : > { %v3266_v48 = vpop.f32.mrf.mxu0  ;;  %v8431_v13 = vsel %vm683_vm0, %v3697_v20, %v3701_v33  ;;  %v3577_v17 = vunpack.c.l.b16 %v3538_v36 }
 0x385   : > { %v3267_v55 = vadd.f32 %v3266_v48, %v3183_v31  ;;  %4474 = vmatmul.bf16.gmra.mxu2 %v8431_v13  ;;  %6092 = vmatpush.bf16.msra.mxu3 %v8066_v62  ;;  %v9056_v31 = vld [vmem:[#allocation44_spill] sm:$0xff]  ;;  %v4402_v62 = vadd.f32 %v8367_v11, %v4401_v6  ;;  %vm3339_vm8 = vcmp.ge.s32.totalorder %v3325_v4, 0  ;;  %vm3349_vm9 = vcmp.lt.s32.totalorder %v3325_v4, 16  ;;  %v9059_v6 = vld [vmem:[#allocation50_spill] sm:$0xff]  ;;  %v9063_v4 = vld [vmem:[#allocation49_spill] sm:$0xff] }
 0x386   : > { %v3020_v39 = vadd.f32 %v9056_v31, %v9055_v49  ;;  %vm8478_vm10 = vmand %vm3339_vm8, %vm3349_vm9 }
 0x387   : > { %v3308_v21 = vmax.f32 %v3267_v55, 0.0  ;;  %4709 = vmatmul.bf16.gmra.mxu0 %v8374_v61  ;;  %v9057_v55 = vld [vmem:[#allocation46_spill] sm:$0xff]  ;;  %vm3388_vm11 = vmand %vm8478_vm10, %vm3361_vm5 }
 0x388   : > { %v3104_v7 = vadd.f32 %v9057_v55, %v3020_v39  ;;  %vm3423_vm12 = vmand %vm8478_vm10, %vm3396_vm7  ;;  %v9067_v39 = vld [vmem:[#allocation52_spill] sm:$0xff] }
 0x389   : > { %v3509_v57 = vsel %vm8406_vm3, %v3308_v21, 0.0  ;;  %6093 = vmatpush.bf16.msra.mxu3 %v8089_v10 }
 0x38a   : > { %v3539_v51 = vpack.c.bf16 %v3509_v57, %v3509_v57  ;;  %v3188_v10 = vadd.f32 %v9058_v37, %v3104_v7 }
 0x38c   : > { %v3578_v20 = vunpack.c.l.b16 %v3539_v51  ;;  %v3268_v33 = vpop.f32.mrf.mxu0 }
 0x38d   : > { %v3269_v48 = vadd.f32 %v3268_v33, %v3185_v63  ;;  %6094 = vmatpush.bf16.msra.mxu3 %v8102_v14  ;;  %v5881_v63 = vld [vmem:[%s8829_s3 + $0x238] sm:$0xff] }
 0x38e   : > { %v8454_v34 = vpack.c.b16 %v3578_v20, %v3577_v17  ;;  %v4499_v27 = vpop.f32.mrf.mxu3  ;;  %v5873_v17 = vld [vmem:[%s8829_s3 + $0x1f8] sm:$0xff]  ;;  %v9060_v20 = vld [vmem:[#allocation48_spill] sm:$0xff]  ;;  %4779 = vmatpush.bf16.msra.mxu2 %v5881_v63 }
 0x38f   : > { %v3309_v23 = vmax.f32 %v3269_v48, 0.0  ;;  %v3022_v33 = vadd.f32 %v9060_v20, %v9059_v6  ;;  %4730 = vmatpush.bf16.msra.mxu1 %v5873_v17 }
 0x390   : > { %4430 = vmatmul.bf16.gmra.mxu1 %v8454_v34  ;;  %v4450_v26 = vpop.f32.mrf.mxu2  ;;  %v3706_v60 = vshll.u32 %v8454_v34, 16 }
 0x391   : > { %v3510_v21 = vsel %vm3420_vm6, %v3309_v23, 0.0  ;;  %v4451_v41 = vadd.f32 %v4450_v26, %v4402_v62  ;;  %6095 = vmatpush.bf16.msra.mxu3 %v8113_v2  ;;  %v3744_v62 = vrot.slane %v8454_v34, 1  ;;  %v3704_v26 = vshrl.u32 %v8454_v34, 16  ;;  %v9064_v2 = vld [vmem:[#allocation59_spill] sm:$0xff] }
 0x392   : > { %v3540_v36 = vpack.c.bf16 %v3510_v21, %v3510_v21  ;;  %v3708_v31 = vrot.slane %v3706_v60, 1  ;;  %v3106_v55 = vadd.f32 %v9063_v4, %v3022_v33  ;;  %v8496_v60 = vpop.f32.mrf.mxu1 }
 0x393   : > { %v8468_v57 = vadd.f32 %v4499_v27, %v4451_v41 }
 0x394   : > { %v3610_v51 = vunpack.c.l.b16 %v3540_v36  ;;  %v3271_v53 = vpop.f32.mrf.mxu0  ;;  %v3709_v41 = vor.u32 %v3708_v31, %v3704_v26  ;;  %v3190_v27 = vadd.f32 %v9064_v2, %v3106_v55 }
 0x395   : > { %v3272_v14 = vadd.f32 %v3271_v53, %v3188_v10  ;;  %6096 = vmatpush.bf16.msra.mxu3 %v8136_v32 }
 0x396   : > { %v3618_v49 = vpack.c.b16 %v3610_v51, %v3610_v51  ;;  %v8509_v33 = vpop.f32.mrf.mxu3 }
 0x397   : > { %4714 = vmatmul.bf16.gmra.mxu0 %v8454_v34  ;;  %v3310_v7 = vmax.f32 %v3272_v14, 0.0 }
 0x398   : > { %v3711_v48 = vshll.u32 %v3618_v49, 16  ;;  %v3745_v23 = vrot.slane %v3618_v49, 1  ;;  %v8503_v6 = vpop.f32.mrf.mxu2 }
 0x399   : > { %v3511_v51 = vsel %vm3388_vm11, %v3310_v7, 0.0  ;;  %6097 = vmatpush.bf16.msra.mxu3 %v8148_v25 }
 0x39a   : > { %v8492_v21 = vsel %vm864_vm1, %v3744_v62, %v3745_v23  ;;  %v3713_v36 = vrot.slane %v3711_v48, 1  ;;  %v3541_v17 = vpack.c.bf16 %v3511_v51, %v3511_v51  ;;  %v4406_v32 = vpop.f32.mrf.mxu1  ;;  %v9065_v62 = vld [vmem:[#allocation53_spill] sm:$0xff]  ;;  %v9066_v23 = vld [vmem:[#allocation51_spill] sm:$0xff] }
 0x39b   : > { %4528 = vmatmul.bf16.gmra.mxu3 %v8492_v21  ;;  %v3027_v26 = vadd.f32 %v9066_v23, %v9065_v62  ;;  %v4407_v25 = vadd.f32 %v8367_v11, %v4406_v32 }
 0x39c   : > { %v3273_v37 = vpop.f32.mrf.mxu0  ;;  %v8499_v10 = vsel %vm683_vm0, %v3709_v41, %v3713_v36  ;;  %v3757_v49 = vunpack.c.l.b16 %v3541_v17  ;;  %v5880_v41 = vld [vmem:[%s8829_s3 + $0x230] sm:$0xff] }
 0x39d   : > { %v3274_v53 = vadd.f32 %v3273_v37, %v3190_v27  ;;  %4479 = vmatmul.bf16.gmra.mxu2 %v8499_v10  ;;  %6098 = vmatpush.bf16.msra.mxu3 %v8163_v5  ;;  %v3326_v5 = vadd.s32 9, %v7973_v8  ;;  %v3111_v36 = vadd.f32 %v9067_v39, %v3027_v26 }
 0x39e   : > { %4780 = vmatpush.bf16.msra.mxu2 %v5880_v41 }
 0x39f   : > { %v3311_v63 = vmax.f32 %v3274_v53, 0.0  ;;  %v3195_v8 = vadd.f32 %v8053_v40, %v3111_v36  ;;  %vm3340_vm13 = vcmp.ge.s32.totalorder %v3326_v5, 0  ;;  %vm3350_vm14 = vcmp.lt.s32.totalorder %v3326_v5, 16  ;;  %v5871_v40 = vld [vmem:[%s8829_s3 + $0x1e8] sm:$0xff] }
 0x3a0   : > { %4542 = vmatmul.bf16.vlgmr.msrb.gmra.mxu1 %v8044_v12  ;;  %vm8542_vm15 = vmand %vm3340_vm13, %vm3350_vm14 }
 0x3a1   : > { %v3512_v20 = vsel %vm8478_vm10, %v3311_v63, 0.0  ;;  %6099 = vmatpush.bf16.msra.mxu3 %v8181_v22  ;;  %v5879_v22 = vld [vmem:[%s8829_s3 + $0x228] sm:$0xff]  ;;  %vm3391_vm2 = vmand %vm8542_vm15, %vm3361_vm5 }
 0x3a2   : > { %v3542_v14 = vpack.c.bf16 %v3512_v20, %v3512_v20  ;;  %4781 = vmatpush.bf16.msra.mxu2 %v5879_v22  ;;  %vm3426_vm5 = vmand %vm8542_vm15, %vm3396_vm7  ;;  %v5869_v22 = vld [vmem:[%s8829_s3 + $0x1d8] sm:$0xff] }
 0x3a4   : > { %v3758_v31 = vunpack.c.l.b16 %v3542_v14  ;;  %v3276_v48 = vpop.f32.mrf.mxu0  ;;  %v9070_v14 = vld [vmem:[#allocation54_spill] sm:$0xff] }
 0x3a5   : > { %v3277_v4 = vadd.f32 %v3276_v48, %v8039_v16  ;;  %v5872_v16 = vld [vmem:[%s8829_s3 + $0x1f0] sm:$0xff] }
 0x3a6   : > { %v8515_v12 = vpack.c.b16 %v3758_v31, %v3757_v49  ;;  %v4504_v37 = vpop.f32.mrf.mxu3  ;;  %4731 = vmatpush.bf16.msra.mxu1 %v5872_v16  ;;  %v3032_v49 = vadd.f32 %v8345_v43, %v9070_v14 }
 0x3a7   : > { %v3312_v55 = vmax.f32 %v3277_v4, 0.0 }
 0x3a8   : > { %v4455_v7 = vpop.f32.mrf.mxu2  ;;  %4719 = vmatmul.bf16.gmra.mxu0 %v8515_v12  ;;  %v3116_v23 = vadd.f32 %v8356_v52, %v3032_v49  ;;  %v5878_v52 = vld [vmem:[%s8829_s3 + $0x220] sm:$0xff] }
 0x3a9   : > { %v8532_v2 = vsel %vm3423_vm12, %v3312_v55, 0.0  ;;  %v4456_v27 = vadd.f32 %v4455_v7, %v4407_v25  ;;  %4782 = vmatpush.bf16.msra.mxu2 %v5878_v52 }
 0x3aa   : > { %4732 = vmatpush.bf16.msra.mxu1 %v5871_v40  ;;  %v3200_v25 = vadd.f32 %v8361_v29, %v3116_v23 }
 0x3ab   : > { %4640 = vmatmul.bf16.vlgmr.msrb.gmra.mxu3 %v8079_v47  ;;  %v8536_v51 = vadd.f32 %v4504_v37, %v4456_v27 }
 0x3ac   : > { %v3278_v53 = vpop.f32.mrf.mxu0 }
 0x3ad   : > { %v3279_v63 = vadd.f32 %v3278_v53, %v3195_v8  ;;  %4591 = vmatmul.bf16.vlgmr.msrb.gmra.mxu2 %v8092_v46  ;;  %v8554_v46 = vpop.f32.mrf.mxu1 }
 0x3ae   : > { %v8564_v26 = vpop.f32.mrf.mxu3  ;;  %4733 = vmatpush.bf16.msra.mxu1 %v5870_v44 }
 0x3af   : > { %v3313_v47 = vmax.f32 %v3279_v63, 0.0 }
 0x3b0   : > { %4547 = vmatmul.bf16.gmra.mxu1 %v8121_v19  ;;  %v8559_v62 = vpop.f32.mrf.mxu2 }
 0x3b1   : > { %v3514_v32 = vsel %vm3391_vm2, %v3313_v47, 0.0 }
 0x3b2   : > { %v3544_v48 = vpack.c.bf16 %v3514_v32, %v3514_v32  ;;  %4734 = vmatpush.bf16.msra.mxu1 %v5869_v22 }
 0x3b4   : > { %v3281_v20 = vpop.f32.mrf.mxu0  ;;  %v3783_v43 = vunpack.c.l.b16 %v3544_v48 }
 0x3b5   : > { %v3282_v19 = vadd.f32 %v3281_v20, %v8083_v50  ;;  %v4411_v55 = vpop.f32.mrf.mxu1 }
 0x3b6   : > { %v4412_v29 = vadd.f32 %v8367_v11, %v4411_v55  ;;  %v5867_v55 = vld [vmem:[%s8829_s3 + $0x1c8] sm:$0xff] }
 0x3b7   : > { %v3314_v31 = vmax.f32 %v3282_v19, 0.0  ;;  %v5868_v19 = vld [vmem:[%s8829_s3 + $0x1d0] sm:$0xff] }
 0x3b8   : > { %4735 = vmatpush.bf16.msra.mxu1 %v5868_v19 }
 0x3b9   : > { %v3515_v35 = vsel %vm8542_vm15, %v3314_v31, 0.0 }
 0x3ba   : > { %v3545_v4 = vpack.c.bf16 %v3515_v35, %v3515_v35 }
 0x3bb   : > { %4645 = vmatmul.bf16.gmra.mxu3 %v8174_v58 }
 0x3bc   : > { %v3784_v7 = vunpack.c.l.b16 %v3545_v4  ;;  %v3283_v50 = vpop.f32.mrf.mxu0  ;;  %4736 = vmatpush.bf16.msra.mxu1 %v5867_v55 }
 0x3bd   : > { %v3284_v5 = vadd.f32 %v3283_v50, %v3200_v25  ;;  %4596 = vmatmul.bf16.gmra.mxu2 %v8184_v30  ;;  %v8588_v53 = vpop.f32.mrf.mxu1 }
 0x3be   : > { %v8569_v41 = vpack.c.b16 %v3784_v7, %v3783_v43  ;;  %v4509_v37 = vpop.f32.mrf.mxu3 }
 0x3bf   : > { %v3315_v16 = vmax.f32 %v3284_v5, 0.0 }
 0x3c0   : > { %v4460_v39 = vpop.f32.mrf.mxu2  ;;  %4552 = vmatmul.bf16.gmra.mxu1 %v8202_v45  ;;  %v5877_v45 = vld [vmem:[%s8829_s3 + $0x218] sm:$0xff] }
 0x3c1   : > { %v8580_v36 = vsel %vm3426_vm5, %v3315_v16, 0.0  ;;  %v4461_v27 = vadd.f32 %v4460_v39, %v4412_v29  ;;  %4783 = vmatpush.bf16.msra.mxu2 %v5877_v45  ;;  %v5866_v29 = vld [vmem:[%s8829_s3 + $0x1c0] sm:$0xff] }
 0x3c2   : > { %4737 = vmatpush.bf16.msra.mxu1 %v5866_v29 }
 0x3c3   : > { %v8585_v8 = vadd.f32 %v4509_v37, %v4461_v27  ;;  %v3543_v37 = vpack.c.bf16 %v8532_v2, %v8532_v2  ;;  %v3767_v2 = vshll.u32 %v8515_v12, 16 }
 0x3c5   : > { %v4416_v40 = vpop.f32.mrf.mxu1  ;;  %v3769_v55 = vrot.slane %v3767_v2, 1 }
 0x3c6   : > { %v8600_v17 = vpop.f32.mrf.mxu3  ;;  %v4417_v47 = vadd.f32 %v8367_v11, %v4416_v40 }
 0x3c8   : > { %v8594_v63 = vpop.f32.mrf.mxu2 }
 0x3cb   : > { %4650 = vmatmul.bf16.gmra.mxu3 %v8235_v9 }
 0x3cd   : > { %4601 = vmatmul.bf16.gmra.mxu2 %v8240_v59  ;;  %v8614_v31 = vpop.f32.mrf.mxu1 }
 0x3d0   : > { %4557 = vmatmul.bf16.gmra.mxu1 %v8251_v24  ;;  %v5876_v24 = vld [vmem:[%s8829_s3 + $0x210] sm:$0xff] }
 0x3d1   : > { %4784 = vmatpush.bf16.msra.mxu2 %v5876_v24 }
 0x3d6   : > { %v4514_v49 = vpop.f32.mrf.mxu3 }
 0x3d8   : > { %v4465_v20 = vpop.f32.mrf.mxu2 }
 0x3d9   : > { %v4466_v14 = vadd.f32 %v4465_v20, %v4417_v47  ;;  %v3762_v20 = vunpack.c.l.b16 %v3543_v37 }
 0x3db   : > { %4655 = vmatmul.bf16.gmra.mxu3 %v8283_v28  ;;  %v8604_v32 = vadd.f32 %v4514_v49, %v4466_v14  ;;  %v3763_v49 = vpack.c.b16 %v3762_v20, %v3762_v20 }
 0x3dd   : > { %4606 = vmatmul.bf16.gmra.mxu2 %v8288_v0  ;;  %v4421_v23 = vpop.f32.mrf.mxu1 }
 0x3de   : > { %v8618_v35 = vpop.f32.mrf.mxu3  ;;  %v4422_v4 = vadd.f32 %v8367_v11, %v4421_v23 }
 0x3e0   : > { %4562 = vmatmul.bf16.gmra.mxu1 %v8306_v1  ;;  %v8616_v48 = vpop.f32.mrf.mxu2  ;;  %v5875_v1 = vld [vmem:[%s8829_s3 + $0x208] sm:$0xff] }
 0x3e1   : > { %4785 = vmatpush.bf16.msra.mxu2 %v5875_v1 }
 0x3e5   : > { %v8630_v50 = vpop.f32.mrf.mxu1 }
 0x3eb   : > { %4660 = vmatmul.bf16.gmra.mxu3 %v8338_v15 }
 0x3ed   : > { %4611 = vmatmul.bf16.gmra.mxu2 %v8348_v18 }
 0x3ee   : > { %v4519_v7 = vpop.f32.mrf.mxu3 }
 0x3f0   : > { %v4470_v25 = vpop.f32.mrf.mxu2  ;;  %4567 = vmatmul.bf16.gmra.mxu1 %v8374_v61  ;;  %v5874_v61 = vld [vmem:[%s8829_s3 + $0x200] sm:$0xff] }
 0x3f1   : > { %v4471_v43 = vadd.f32 %v4470_v25, %v4422_v4  ;;  %4786 = vmatpush.bf16.msra.mxu2 %v5874_v61  ;;  %v3772_v4 = vshll.u32 %v3763_v49, 16 }
 0x3f3   : > { %v8632_v5 = vadd.f32 %v4519_v7, %v4471_v43  ;;  %v3778_v43 = vrot.slane %v3763_v49, 1  ;;  %v3777_v7 = vrot.slane %v8515_v12, 1  ;;  %v3774_v29 = vrot.slane %v3772_v4, 1 }
 0x3f5   : > { %v4426_v52 = vpop.f32.mrf.mxu1  ;;  %v8662_v61 = vsel %vm864_vm1, %v3777_v7, %v3778_v43 }
 0x3f6   : > { %v8642_v16 = vpop.f32.mrf.mxu3  ;;  %v4427_v44 = vadd.f32 %v8367_v11, %v4426_v52  ;;  %v3765_v52 = vshrl.u32 %v8515_v12, 16 }
 0x3f8   : > { %v8644_v39 = vpop.f32.mrf.mxu2 }
 0x3fb   : > { %4665 = vmatmul.bf16.gmra.mxu3 %v8421_v42 }
 0x3fd   : > { %4616 = vmatmul.bf16.gmra.mxu2 %v8431_v13  ;;  %v4428_v27 = vpop.f32.mrf.mxu1 }
 0x400   : > { %4572 = vmatmul.bf16.gmra.mxu1 %v8454_v34  ;;  %v4429_v34 = vadd.f32 %v8367_v11, %v4428_v27  ;;  %v3770_v27 = vor.u32 %v3769_v55, %v3765_v52 }
 0x406   : > { %v4524_v45 = vpop.f32.mrf.mxu3 }
 0x408   : > { %v4475_v22 = vpop.f32.mrf.mxu2 }
 0x409   : > { %v4476_v40 = vadd.f32 %v4475_v22, %v4427_v44  ;;  %v8666_v44 = vsel %vm683_vm0, %v3770_v27, %v3774_v29 }
 0x40b   : > { %4670 = vmatmul.bf16.gmra.mxu3 %v8492_v21  ;;  %v8651_v47 = vadd.f32 %v4524_v45, %v4476_v40 }
 0x40d   : > { %v4431_v14 = vpop.f32.mrf.mxu1  ;;  %4621 = vmatmul.bf16.gmra.mxu2 %v8499_v10 }
 0x40e   : > { %v4526_v23 = vpop.f32.mrf.mxu3  ;;  %v4432_v22 = vadd.f32 %v8367_v11, %v4431_v14 }
 0x410   : > { %v4477_v24 = vpop.f32.mrf.mxu2  ;;  %4577 = vmatmul.bf16.gmra.mxu1 %v8515_v12 }
 0x411   : > { %v4478_v19 = vadd.f32 %v4477_v24, %v4429_v34 }
 0x413   : > { %v8657_v1 = vadd.f32 %v4526_v23, %v4478_v19 }
 0x415   : > { %v4433_v25 = vpop.f32.mrf.mxu1 }
 0x416   : > { %v4434_v24 = vadd.f32 %v8367_v11, %v4433_v25 }
 0x41b   : > { %4675 = vmatmul.bf16.gmra.mxu3 %v8662_v61 }
 0x41d   : > { %v4543_v37 = vpop.f32.mrf.mxu1  ;;  %4626 = vmatmul.bf16.gmra.mxu2 %v8666_v44 }
 0x41e   : > { %v4544_v45 = vadd.f32 %v4543_v37, %v8399_v56  ;;  %v4529_v40 = vpop.f32.mrf.mxu3 }
 0x420   : > { %v4480_v20 = vpop.f32.mrf.mxu2  ;;  %4738 = vmatmul.bf16.vlgmr.msra.gmra.mxu1 %v8184_v30  ;;  %v4399_v30 = vadd.f32 %v8367_v11, %v8428_v38  ;;  %v4404_v38 = vadd.f32 %v8367_v11, %v8496_v60  ;;  %v4409_v60 = vadd.f32 %v8367_v11, %v8554_v46  ;;  %v4414_v46 = vadd.f32 %v8367_v11, %v8588_v53 }
 0x421   : > { %v4481_v12 = vadd.f32 %v4480_v20, %v4432_v22  ;;  %v4424_v53 = vadd.f32 %v8367_v11, %v8630_v50 }
 0x422   : > { %v4448_v25 = vadd.f32 %v8443_v3, %v4399_v30  ;;  %v4453_v3 = vadd.f32 %v8503_v6, %v4404_v38  ;;  %v4458_v6 = vadd.f32 %v8559_v62, %v4409_v60  ;;  %v4463_v62 = vadd.f32 %v8594_v63, %v4414_v46 }
 0x423   : > { %v8672_v34 = vadd.f32 %v4529_v40, %v4481_v12  ;;  %v4473_v63 = vadd.f32 %v8644_v39, %v4424_v53 }
 0x424   : > { %v4497_v7 = vadd.f32 %v8448_v54, %v4448_v25  ;;  %v4502_v54 = vadd.f32 %v8509_v33, %v4453_v3  ;;  %v4507_v33 = vadd.f32 %v8564_v26, %v4458_v6  ;;  %v4512_v26 = vadd.f32 %v8600_v17, %v4463_v62 }
 0x425   : > { %v4545_v49 = vpop.f32.mrf.mxu1 }
 0x426   : > { %v4531_v2 = vpop.f32.mrf.mxu3  ;;  %v4546_v29 = vadd.f32 %v4545_v49, %v4497_v7 }
 0x428   : > { %v4482_v19 = vpop.f32.mrf.mxu2 }
 0x429   : > { %v4483_v23 = vadd.f32 %v4482_v19, %v4434_v24 }
 0x42b   : > { %4724 = vmatmul.bf16.vlgmr.msra.gmra.mxu3 %v8569_v41  ;;  %v8676_v4 = vadd.f32 %v4531_v2, %v4483_v23 }
 0x42d   : > { %v4548_v56 = vpop.f32.mrf.mxu1  ;;  %4787 = vmatmul.bf16.vlgmr.msra.gmra.mxu2 %v8174_v58 }
 0x42e   : > { %v4549_v14 = vadd.f32 %v4548_v56, %v8468_v57 }
 0x430   : > { %v4592_v43 = vpop.f32.mrf.mxu2  ;;  %4743 = vmatmul.bf16.gmra.mxu1 %v8240_v59 }
 0x431   : > { %v8684_v55 = vadd.f32 %v4592_v43, %v4544_v45 }
 0x435   : > { %v4550_v52 = vpop.f32.mrf.mxu1 }
 0x436   : > { %v4551_v40 = vadd.f32 %v4550_v52, %v4502_v54  ;;  %v3793_v54 = vshll.u32 %v8569_v41, 16 }
 0x438   : > { %v4594_v27 = vpop.f32.mrf.mxu2 }
 0x439   : > { %v8687_v37 = vadd.f32 %v4594_v27, %v4546_v29  ;;  %v4522_v29 = vadd.f32 %v8642_v16, %v4473_v63 }
 0x43d   : > { %v4553_v58 = vpop.f32.mrf.mxu1  ;;  %4792 = vmatmul.bf16.gmra.mxu2 %v8235_v9 }
 0x43e   : > { %v4554_v57 = vadd.f32 %v4553_v58, %v8536_v51 }
 0x440   : > { %v4597_v59 = vpop.f32.mrf.mxu2  ;;  %4748 = vmatmul.bf16.gmra.mxu1 %v8288_v0 }
 0x441   : > { %v8695_v45 = vadd.f32 %v4597_v59, %v4549_v14 }
 0x445   : > { %v4555_v22 = vpop.f32.mrf.mxu1 }
 0x446   : > { %v4556_v19 = vadd.f32 %v4555_v22, %v4507_v33 }
 0x448   : > { %v4599_v20 = vpop.f32.mrf.mxu2 }
 0x449   : > { %v8698_v12 = vadd.f32 %v4599_v20, %v4551_v40 }
 0x44d   : > { %v4558_v9 = vpop.f32.mrf.mxu1  ;;  %4797 = vmatmul.bf16.gmra.mxu2 %v8283_v28 }
 0x44e   : > { %v4559_v51 = vadd.f32 %v4558_v9, %v8585_v8 }
 0x450   : > { %v4602_v0 = vpop.f32.mrf.mxu2  ;;  %4753 = vmatmul.bf16.gmra.mxu1 %v8348_v18 }
 0x451   : > { %v8706_v49 = vadd.f32 %v4602_v0, %v4554_v57 }
 0x455   : > { %v4560_v24 = vpop.f32.mrf.mxu1 }
 0x456   : > { %v4561_v30 = vadd.f32 %v4560_v24, %v4512_v26  ;;  %v4690_v24 = vpop.f32.mrf.mxu0 }
 0x458   : > { %v4604_v23 = vpop.f32.mrf.mxu2 }
 0x459   : > { %v8709_v2 = vadd.f32 %v4604_v23, %v4556_v19 }
 0x45d   : > { %v4563_v28 = vpop.f32.mrf.mxu1  ;;  %4802 = vmatmul.bf16.gmra.mxu2 %v8338_v15 }
 0x45e   : > { %v4564_v8 = vadd.f32 %v4563_v28, %v8604_v32  ;;  %v4692_v62 = vpop.f32.mrf.mxu0 }
 0x460   : > { %v4607_v18 = vpop.f32.mrf.mxu2  ;;  %4758 = vmatmul.bf16.gmra.mxu1 %v8431_v13  ;;  %v4419_v13 = vadd.f32 %v8367_v11, %v8614_v31  ;;  %v3546_v11 = vpack.c.bf16 %v8580_v36, %v8580_v36 }
 0x461   : > { %v8717_v56 = vadd.f32 %v4607_v18, %v4559_v51 }
 0x462   : > { %v4468_v17 = vadd.f32 %v8616_v48, %v4419_v13  ;;  %v3788_v48 = vunpack.c.l.b16 %v3546_v11 }
 0x464   : > { %v3789_v59 = vpack.c.b16 %v3788_v48, %v3788_v48  ;;  %v4829_v48 = vld [vmem:[%s6266_s12 + $0x8] sm:$0xff] }
 0x465   : > { %v4565_v14 = vpop.f32.mrf.mxu1 }
 0x466   : > { %v3798_v40 = vshll.u32 %v3789_v59, 16  ;;  %v3804_v46 = vrot.slane %v3789_v59, 1  ;;  %v4695_v53 = vpop.f32.mrf.mxu0 }
 0x468   : > { %v4609_v43 = vpop.f32.mrf.mxu2  ;;  %v3800_v9 = vrot.slane %v3798_v40, 1 }
 0x469   : > { %v8720_v25 = vadd.f32 %v4609_v43, %v4561_v30 }
 0x46d   : > { %v4568_v15 = vpop.f32.mrf.mxu1  ;;  %4807 = vmatmul.bf16.gmra.mxu2 %v8421_v42  ;;  %v4517_v42 = vadd.f32 %v8618_v35, %v4468_v17 }
 0x46e   : > { %v4569_v32 = vadd.f32 %v4568_v15, %v8632_v5  ;;  %v4641_v5 = vpop.f32.mrf.mxu3 }
 0x46f   : > { %v4566_v58 = vadd.f32 %v4565_v14, %v4517_v42 }
 0x470   : > { %v4612_v7 = vpop.f32.mrf.mxu2  ;;  %4763 = vmatmul.bf16.gmra.mxu1 %v8499_v10 }
 0x471   : > { %v8731_v52 = vadd.f32 %v4612_v7, %v4564_v8 }
 0x475   : > { %v4570_v27 = vpop.f32.mrf.mxu1 }
 0x476   : > { %v4571_v50 = vadd.f32 %v4570_v27, %v4522_v29  ;;  %v4643_v16 = vpop.f32.mrf.mxu3  ;;  %v4697_v29 = vpop.f32.mrf.mxu0  ;;  %v4828_v27 = vld [vmem:[%s6266_s12] sm:$0xff] }
 0x478   : > { %v4614_v57 = vpop.f32.mrf.mxu2 }
 0x479   : > { %v8735_v38 = vadd.f32 %v4614_v57, %v4566_v58 }
 0x47d   : > { %v4573_v31 = vpop.f32.mrf.mxu1  ;;  %4812 = vmatmul.bf16.gmra.mxu2 %v8492_v21  ;;  %v3795_v21 = vrot.slane %v3793_v54, 1 }
 0x47e   : > { %v4574_v10 = vadd.f32 %v4573_v31, %v8651_v47  ;;  %v3791_v47 = vshrl.u32 %v8569_v41, 16  ;;  %v4646_v51 = vpop.f32.mrf.mxu3 }
 0x480   : > { %v4617_v39 = vpop.f32.mrf.mxu2  ;;  %4768 = vmatmul.bf16.gmra.mxu1 %v8666_v44  ;;  %v3796_v44 = vor.u32 %v3795_v21, %v3791_v47  ;;  %v4830_v21 = vld [vmem:[%s6266_s12 + $0x10] sm:$0xff] }
 0x481   : > { %v8742_v35 = vadd.f32 %v4617_v39, %v4569_v32  ;;  %v4642_v32 = vadd.f32 %v4641_v5, %v8684_v55  ;;  %v4647_v39 = vadd.f32 %v4646_v51, %v8695_v45 }
 0x482   : > { %v3801_v6 = vsel %vm683_vm0, %v3796_v44, %v3800_v9 }
 0x485   : > { %v4575_v3 = vpop.f32.mrf.mxu1 }
 0x486   : > { %v4576_v22 = vadd.f32 %v4575_v3, %v8657_v1  ;;  %v4648_v23 = vpop.f32.mrf.mxu3  ;;  %v4700_v3 = vpop.f32.mrf.mxu0 }
 0x487   : > { %v4649_v47 = vadd.f32 %v4648_v23, %v8698_v12 }
 0x488   : > { %v4619_v36 = vpop.f32.mrf.mxu2 }
 0x489   : > { %v8746_v20 = vadd.f32 %v4619_v36, %v4571_v50  ;;  %v4644_v50 = vadd.f32 %v4643_v16, %v8687_v37 }
 0x48b   : > { %v4693_v31 = vadd.f32 %v4692_v62, %v4644_v50 }
 0x48d   : > { %v4578_v60 = vpop.f32.mrf.mxu1  ;;  %4817 = vmatmul.bf16.gmra.mxu2 %v8662_v61  ;;  %v3803_v61 = vrot.slane %v8569_v41, 1  ;;  %v4691_v41 = vadd.f32 %v4690_v24, %v4642_v32  ;;  %v4831_v24 = vld [vmem:[%s6266_s12 + $0x18] sm:$0xff] }
 0x48e   : > { %v4579_v0 = vadd.f32 %v4578_v60, %v8672_v34  ;;  %v4651_v14 = vpop.f32.mrf.mxu3  ;;  %v4702_v44 = vpop.f32.mrf.mxu0 }
 0x48f   : > { %v3805_v34 = vsel %vm864_vm1, %v3803_v61, %v3804_v46 }
 0x490   : > { %v4622_v33 = vpop.f32.mrf.mxu2  ;;  %4773 = vmatmul.bf16.gmra.mxu1 %v3801_v6 }
 0x491   : > { %v8752_v1 = vadd.f32 %v4622_v33, %v4574_v10 }
 0x495   : > { %v4580_v19 = vpop.f32.mrf.mxu1 }
 0x496   : > { %v4581_v28 = vadd.f32 %v4580_v19, %v8676_v4  ;;  %v4653_v63 = vpop.f32.mrf.mxu3  ;;  %v4652_v19 = vadd.f32 %v4651_v14, %v8706_v49  ;;  %v4705_v23 = vpop.f32.mrf.mxu0 }
 0x498   : > { %v4624_v8 = vpop.f32.mrf.mxu2  ;;  %v4701_v46 = vadd.f32 %v4700_v3, %v4652_v19  ;;  %v4835_v3 = vld [vmem:[%s6266_s12 + $0x38] sm:$0xff] }
 0x499   : > { %v8755_v18 = vadd.f32 %v4624_v8, %v4576_v22  ;;  %v4696_v22 = vadd.f32 %v4695_v53, %v4647_v39 }
 0x49d   : > { %v4739_v26 = vpop.f32.mrf.mxu1  ;;  %4822 = vmatmul.bf16.gmra.mxu2 %v3805_v34  ;;  %v4832_v34 = vld [vmem:[%s6266_s12 + $0x20] sm:$0xff] }
 0x49e   : > { %v4740_v17 = vadd.f32 %v4739_v26, %v4691_v41  ;;  %v4656_v11 = vpop.f32.mrf.mxu3  ;;  %v4654_v26 = vadd.f32 %v4653_v63, %v8709_v2  ;;  %v4707_v32 = vpop.f32.mrf.mxu0 }
 0x4a0   : > { %v4627_v30 = vpop.f32.mrf.mxu2 }
 0x4a1   : > { %v8759_v43 = vadd.f32 %v4627_v30, %v4579_v0  ;;  %v4698_v0 = vadd.f32 %v4697_v29, %v4649_v47  ;;  %v4836_v47 = vld [vmem:[%s6266_s12 + $0x40] sm:$0xff] }
 0x4a5   : > { %v4741_v15 = vpop.f32.mrf.mxu1 }
 0x4a6   : > { %v4742_v5 = vadd.f32 %v4741_v15, %v4693_v31  ;;  %v4658_v16 = vpop.f32.mrf.mxu3 }
 0x4a7   : > { %v4659_v31 = vadd.f32 %v4658_v16, %v8720_v25 }
 0x4a8   : > { %v4629_v4 = vpop.f32.mrf.mxu2 }
 0x4a9   : > { %v8762_v13 = vadd.f32 %v4629_v4, %v4581_v28  ;;  %v4703_v4 = vadd.f32 %v4702_v44, %v4654_v26 }
 0x4ad   : > { %v4744_v7 = vpop.f32.mrf.mxu1 }
 0x4ae   : > { %v4745_v40 = vadd.f32 %v4744_v7, %v4696_v22  ;;  %v4661_v6 = vpop.f32.mrf.mxu3  ;;  %v4833_v7 = vld [vmem:[%s6266_s12 + $0x28] sm:$0xff] }
 0x4b0   : > { %v4788_v42 = vpop.f32.mrf.mxu2 }
 0x4b1   : > { %v4789_v58 = vadd.f32 %v4788_v42, %v4740_v17  ;;  %v4657_v17 = vadd.f32 %v4656_v11, %v8717_v56 }
 0x4b3   : > { %v4844_v57 = vadd.f32 %v4828_v27, %v4789_v58  ;;  %v4706_v50 = vadd.f32 %v4705_v23, %v4657_v17 }
 0x4b5   : > { %4860 = vst [vmem:[%s6271_s15] sm:$0xff] %v4844_v57  ;;  %v4746_v55 = vpop.f32.mrf.mxu1  ;;  %v4834_v57 = vld [vmem:[%s6266_s12 + $0x30] sm:$0xff] }
 0x4b6   : > { %v4747_v51 = vadd.f32 %v4746_v55, %v4698_v0  ;;  %v4663_v15 = vpop.f32.mrf.mxu3 }
 0x4b8   : > { %v4790_v10 = vpop.f32.mrf.mxu2 }
 0x4b9   : > { %v4791_v59 = vadd.f32 %v4790_v10, %v4742_v5  ;;  %v4710_v5 = vpop.f32.mrf.mxu0 }
 0x4bb   : > { %v4845_v54 = vadd.f32 %v4829_v48, %v4791_v59  ;;  %v4708_v48 = vadd.f32 %v4707_v32, %v4659_v31 }
 0x4bd   : > { %4861 = vst [vmem:[%s6271_s15 + $0x8] sm:$0xff] %v4845_v54  ;;  %v4749_v37 = vpop.f32.mrf.mxu1  ;;  %v4662_v54 = vadd.f32 %v4661_v6, %v8731_v52 }
 0x4be   : > { %v4750_v61 = vadd.f32 %v4749_v37, %v4701_v46  ;;  %v4666_v27 = vpop.f32.mrf.mxu3 }
 0x4bf   : > { %v4711_v25 = vadd.f32 %v4710_v5, %v4662_v54 }
 0x4c0   : > { %v4793_v36 = vpop.f32.mrf.mxu2 }
 0x4c1   : > { %v4794_v9 = vadd.f32 %v4793_v36, %v4745_v40  ;;  %v4712_v40 = vpop.f32.mrf.mxu0 }
 0x4c3   : > { %v4846_v60 = vadd.f32 %v4830_v21, %v4794_v9  ;;  %v4664_v9 = vadd.f32 %v4663_v15, %v8735_v38 }
 0x4c5   : > { %4862 = vst [vmem:[%s6271_s15 + $0x10] sm:$0xff] %v4846_v60  ;;  %v4751_v45 = vpop.f32.mrf.mxu1 }
 0x4c6   : > { %v4752_v14 = vadd.f32 %v4751_v45, %v4703_v4  ;;  %v4668_v56 = vpop.f32.mrf.mxu3  ;;  %v4713_v45 = vadd.f32 %v4712_v40, %v4664_v9 }
 0x4c8   : > { %v4795_v33 = vpop.f32.mrf.mxu2 }
 0x4c9   : > { %v4796_v28 = vadd.f32 %v4795_v33, %v4747_v51  ;;  %v4715_v52 = vpop.f32.mrf.mxu0  ;;  %v4837_v33 = vld [vmem:[%s6266_s12 + $0x48] sm:$0xff] }
 0x4cb   : > { %v4847_v8 = vadd.f32 %v4831_v24, %v4796_v28  ;;  %v4667_v24 = vadd.f32 %v4666_v27, %v8742_v35 }
 0x4cd   : > { %4863 = vst [vmem:[%s6271_s15 + $0x18] sm:$0xff] %v4847_v8  ;;  %v4754_v12 = vpop.f32.mrf.mxu1  ;;  %v4716_v38 = vadd.f32 %v4715_v52, %v4667_v24 }
 0x4ce   : > { %v4755_v63 = vadd.f32 %v4754_v12, %v4706_v50  ;;  %v4671_v36 = vpop.f32.mrf.mxu3 }
 0x4cf   : > { %v4672_v32 = vadd.f32 %v4671_v36, %v8752_v1 }
 0x4d0   : > { %v4798_v62 = vpop.f32.mrf.mxu2 }
 0x4d1   : > { %v4799_v30 = vadd.f32 %v4798_v62, %v4750_v61  ;;  %v4717_v23 = vpop.f32.mrf.mxu0  ;;  %v4838_v62 = vld [vmem:[%s6266_s12 + $0x50] sm:$0xff] }
 0x4d3   : > { %v4848_v53 = vadd.f32 %v4832_v34, %v4799_v30  ;;  %v4669_v34 = vadd.f32 %v4668_v56, %v8746_v20 }
 0x4d5   : > { %4864 = vst [vmem:[%s6271_s15 + $0x20] sm:$0xff] %v4848_v53  ;;  %v4756_v49 = vpop.f32.mrf.mxu1  ;;  %v4718_v53 = vadd.f32 %v4717_v23, %v4669_v34 }
 0x4d6   : > { %v4757_v11 = vadd.f32 %v4756_v49, %v4708_v48  ;;  %v4673_v28 = vpop.f32.mrf.mxu3  ;;  %v4841_v48 = vld [vmem:[%s6266_s12 + $0x68] sm:$0xff] }
 0x4d8   : > { %v4800_v41 = vpop.f32.mrf.mxu2 }
 0x4d9   : > { %v4801_v29 = vadd.f32 %v4800_v41, %v4752_v14  ;;  %v4839_v14 = vld [vmem:[%s6266_s12 + $0x58] sm:$0xff] }
 0x4db   : > { %v4849_v42 = vadd.f32 %v4833_v7, %v4801_v29  ;;  %v4720_v7 = vpop.f32.mrf.mxu0 }
 0x4dc   : > { %v4721_v29 = vadd.f32 %v4720_v7, %v4672_v32 }
 0x4dd   : > { %4865 = vst [vmem:[%s6271_s15 + $0x28] sm:$0xff] %v4849_v42  ;;  %v4759_v2 = vpop.f32.mrf.mxu1 }
 0x4de   : > { %v4760_v16 = vadd.f32 %v4759_v2, %v4711_v25  ;;  %v4676_v15 = vpop.f32.mrf.mxu3  ;;  %v4840_v2 = vld [vmem:[%s6266_s12 + $0x60] sm:$0xff] }
 0x4e0   : > { %v4803_v58 = vpop.f32.mrf.mxu2 }
 0x4e1   : > { %v4804_v55 = vadd.f32 %v4803_v58, %v4755_v63  ;;  %v4674_v63 = vadd.f32 %v4673_v28, %v8755_v18 }
 0x4e3   : > { %v4850_v10 = vadd.f32 %v4834_v57, %v4804_v55  ;;  %v4722_v31 = vpop.f32.mrf.mxu0 }
 0x4e4   : > { %v4723_v1 = vadd.f32 %v4722_v31, %v4674_v63 }
 0x4e5   : > { %4866 = vst [vmem:[%s6271_s15 + $0x30] sm:$0xff] %v4850_v10  ;;  %v4761_v39 = vpop.f32.mrf.mxu1 }
 0x4e6   : > { %v4762_v51 = vadd.f32 %v4761_v39, %v4713_v45  ;;  %v4678_v20 = vpop.f32.mrf.mxu3  ;;  %v4677_v39 = vadd.f32 %v4676_v15, %v8759_v43 }
 0x4e7   : > { %v4679_v25 = vadd.f32 %v4678_v20, %v8762_v13 }
 0x4e8   : > { %v4805_v59 = vpop.f32.mrf.mxu2 }
 0x4e9   : > { %v4806_v22 = vadd.f32 %v4805_v59, %v4757_v11 }
 0x4eb   : > { %v4851_v37 = vadd.f32 %v4835_v3, %v4806_v22  ;;  %v4842_v22 = vld [vmem:[%s6266_s12 + $0x70] sm:$0xff] }
 0x4ed   : > { %4867 = vst [vmem:[%s6271_s15 + $0x38] sm:$0xff] %v4851_v37  ;;  %v4764_v44 = vpop.f32.mrf.mxu1 }
 0x4ee   : > { %v4765_v12 = vadd.f32 %v4764_v44, %v4716_v38  ;;  %v4725_v5 = vpop.f32.mrf.mxu3 }
 0x4ef   : > { %v4726_v3 = vadd.f32 %v4725_v5, %v4677_v39 }
 0x4f0   : > { %v4808_v21 = vpop.f32.mrf.mxu2 }
 0x4f1   : > { %v4809_v60 = vadd.f32 %v4808_v21, %v4760_v16 }
 0x4f3   : > { %v4852_v0 = vadd.f32 %v4836_v47, %v4809_v60  ;;  %v4843_v60 = vld [vmem:[%s6266_s12 + $0x78] sm:$0xff] }
 0x4f5   : > { %4868 = vst [vmem:[%s6271_s15 + $0x40] sm:$0xff] %v4852_v0  ;;  %v4766_v46 = vpop.f32.mrf.mxu1 }
 0x4f6   : > { %v4767_v4 = vadd.f32 %v4766_v46, %v4718_v53  ;;  %v4727_v40 = vpop.f32.mrf.mxu3 }
 0x4f7   : > { %v4728_v21 = vadd.f32 %v4727_v40, %v4679_v25 }
 0x4f8   : > { %v4810_v6 = vpop.f32.mrf.mxu2 }
 0x4f9   : > { %v4811_v19 = vadd.f32 %v4810_v6, %v4762_v51 }
 0x4fb   : > { %v4853_v8 = vadd.f32 %v4837_v33, %v4811_v19 }
 0x4fd   : > { %4869 = vst [vmem:[%s6271_s15 + $0x48] sm:$0xff] %v4853_v8  ;;  %v4769_v35 = vpop.f32.mrf.mxu1 }
 0x4fe   : > { %v4770_v42 = vadd.f32 %v4769_v35, %v4721_v29 }
 0x500   : > { %v4813_v61 = vpop.f32.mrf.mxu2 }
 0x501   : > { %v4814_v26 = vadd.f32 %v4813_v61, %v4765_v12 }
 0x503   : > { %v4854_v30 = vadd.f32 %v4838_v62, %v4814_v26 }
 0x505   : > { %4870 = vst [vmem:[%s6271_s15 + $0x50] sm:$0xff] %v4854_v30  ;;  %v4771_v27 = vpop.f32.mrf.mxu1 }
 0x506   : > { %v4772_v55 = vadd.f32 %v4771_v27, %v4723_v1 }
 0x508   : > { %v4815_v49 = vpop.f32.mrf.mxu2 }
 0x509   : > { %v4816_v41 = vadd.f32 %v4815_v49, %v4767_v4 }
 0x50b   : > { %v4855_v17 = vadd.f32 %v4839_v14, %v4816_v41 }
 0x50d   : > { %4871 = vst [vmem:[%s6271_s15 + $0x58] sm:$0xff] %v4855_v17  ;;  %v4774_v11 = vpop.f32.mrf.mxu1 }
 0x50e   : > { %v4775_v18 = vadd.f32 %v4774_v11, %v4726_v3 }
 0x510   : > { %v4818_v50 = vpop.f32.mrf.mxu2 }
 0x511   : > { %v4819_v58 = vadd.f32 %v4818_v50, %v4770_v42 }
 0x513   : > { %v4856_v57 = vadd.f32 %v4840_v2, %v4819_v58 }
 0x515   : > { %4872 = vst [vmem:[%s6271_s15 + $0x60] sm:$0xff] %v4856_v57  ;;  %v4776_v36 = vpop.f32.mrf.mxu1 }
 0x516   : > { %v4777_v47 = vadd.f32 %v4776_v36, %v4728_v21 }
 0x518   : > { %v4820_v10 = vpop.f32.mrf.mxu2 }
 0x519   : > { %v4821_v56 = vadd.f32 %v4820_v10, %v4772_v55 }
 0x51b   : > { %v4857_v59 = vadd.f32 %v4841_v48, %v4821_v56 }
 0x51d   : > { %4873 = vst [vmem:[%s6271_s15 + $0x68] sm:$0xff] %v4857_v59 }
 0x520   : > { %v4823_v54 = vpop.f32.mrf.mxu2 }
 0x521   : > { %v4824_v37 = vadd.f32 %v4823_v54, %v4775_v18 }
 0x523   : > { %v4858_v16 = vadd.f32 %v4842_v22, %v4824_v37 }
 0x525   : > { %4874 = vst [vmem:[%s6271_s15 + $0x70] sm:$0xff] %v4858_v16 }
 0x528   : > { %v4825_v9 = vpop.f32.mrf.mxu2 }
 0x529   : > { %v4826_v43 = vadd.f32 %v4825_v9, %v4777_v47 }
 0x52b   : > { %v4859_v44 = vadd.f32 %v4843_v60, %v4826_v43 }
 0x52d   : > { %4875 = vst [vmem:[%s6271_s15 + $0x78] sm:$0xff] %v4859_v44 }
 0x52e PF: > { %s16_s25 = sadd.s32 1, %s6186_s25   ;;  %s9071_s21 = smov %s6178_s23 }
 0x52f   : > { %p13_p9 = scmp.ge.s32.totalorder %s16_s25, 6   ;;  %s9072_s22 = smov %s6182_s24 }
 0x530   : > { %s9073_s23 = smov %s9076_s26  ;;  %s9074_s24 = smov %s9080_s27 }
 0x531   :  { %15 = sbr.rel (!%p13_p9) target bundleno = 3 (0x3), region = 133 }
 0x536   :  { %4906 = vsyncmov [#allocation3] }
 0x539   :  { %s4907_s12 = vpop.sfrf %4906 }
 0x53a   :  { %p5733_p10 = scmp.ne.s32.totalorder %s4907_s12, 0 }
 0x53c   :  { %4911 = shalt.err (%p5733_p10)  }
 0x53d   :  { %4913 = vsyncmov [#allocation3 + $0x1] }
 0x540   :  { %s4914_s15 = vpop.sfrf %4913 }
 0x541   :  { %p5734_p11 = scmp.ne.s32.totalorder %s4914_s15, 0 }
 0x543   :  { %4918 = shalt.err (%p5734_p11)  }

</bundles_post_ra>
